<compile_context>
chip_gen: v5e
topology: v5e:2x2
jax: 0.10.0
libtpu: 0.0.40
codegen_flags: <defaults>
</compile_context>

<pallas_src>
import functools

import jax
import jax.numpy as jnp
import numpy as np
from jax.experimental import pallas as pl
from jax.experimental.pallas import tpu as pltpu

NEG_SLOPE = 0.2


def _leaky(x):
    return jnp.where(x >= 0, x, NEG_SLOPE * x)


# ----------------------------------------------------------------------------
# The single fused kernel (one grid step == one batch image)
# ----------------------------------------------------------------------------
def fused_forward_kernel(x_ref, hm_ref, m_ref, wf_ref, bf_ref,
                         w1_ref, b1_ref, w2_ref, b2_ref, r_ref, s_ref,
                         o_ref, *, H, W, nb):
    HW = H * W

    # ---- conv_first: 1x1 conv + bias + LeakyReLU ----------------------------
    # (RC, Cin) @ (Cin, HW) -> (RC, HW); lane dim = HW (dense, unmasked).
    y = jnp.dot(wf_ref[...], x_ref[0], preferred_element_type=jnp.float32)
    y = _leaky(y + bf_ref[...])

    def conv3x3(act, w_ref, b_ref, blk):
        """3x3 conv (stride 1, pad 1) as 9 accumulated MXU matmuls.

        act: (Cin_eff, HW).  w_ref[blk, k]: (Cout, Cin_eff) for tap k.
        Shifted taps are produced with an XLU lane roll + a {0,1} boundary
        mask (m_ref[k], shape (1, HW)) that zeroes out-of-image positions.
        """
        acc = None
        for k in range(9):
            dy, dx = k // 3 - 1, k % 3 - 1
            if dy == 0 and dx == 0:
                tap = act
            else:
                shift = (-(dy * W + dx)) % HW          # static python int
                tap = pltpu.roll(act, shift, axis=1) * m_ref[k]
            part = jnp.dot(w_ref[blk, k], tap,
                           preferred_element_type=jnp.float32)
            acc = part if acc is None else acc + part
        return acc + b_ref[blk]                         # bias (Cout, 1)

    # ---- body: GroupResBlocks (grouped convs as dense block-diagonal) -------
    for blk in range(nb):
        t = _leaky(conv3x3(y, w1_ref, b1_ref, blk))
        y = y + conv3x3(t, w2_ref, b2_ref, blk)         # res_scale = 1.0

    # ---- fusion: softmax over heatmap channels + group-weighted sum ---------
    hm = hm_ref[0]                                      # (G, HW)
    mmax = jnp.max(hm, axis=0, keepdims=True)           # (1, HW)
    e = jnp.exp(hm - mmax)
    denom = jnp.sum(e, axis=0, keepdims=True)
    attn = e * pl.reciprocal(denom, approx=True)        # EUP reciprocal

    # R^T broadcasts per-group attention across the group's channels,
    # S^T sums the weighted feature back over groups; both have N = HW.
    attn_rep = jnp.dot(r_ref[...], attn,
                       preferred_element_type=jnp.float32)   # (RC, HW)
    o_ref[0] = jnp.dot(s_ref[...], y * attn_rep,
                       preferred_element_type=jnp.float32)   # (Cin, HW)


# ----------------------------------------------------------------------------
# Wrapper: layout plumbing + pallas_call
# ----------------------------------------------------------------------------
def _make_tap_masks(H, W):
    """(9, 1, HW) {0,1} masks: tap (dy,dx) valid where the shifted pixel is in-image."""
    HW = H * W
    yy = np.arange(H).reshape(H, 1)
    xx = np.arange(W).reshape(1, W)
    masks = np.zeros((9, 1, HW), np.float32)
    for k in range(9):
        dy, dx = k // 3 - 1, k % 3 - 1
        valid = ((yy + dy >= 0) & (yy + dy < H) &
                 (xx + dx >= 0) & (xx + dx < W))
        masks[k, 0] = valid.astype(np.float32).reshape(HW)
    return jnp.asarray(masks)


def feature_heatmap_fusing_forward(feature_nchw, heatmap_nchw, kp):
    B, Cin, H, W = feature_nchw.shape
    G, RC, MC, nb = kp["G"], kp["RC"], kp["MC"], kp["nb"]
    HW = H * W

    # Pure reshapes of NCHW (contiguous) — no transpose / relayout.
    x = feature_nchw.reshape(B, Cin, HW).astype(jnp.float32)
    hm = heatmap_nchw.reshape(B, G, HW).astype(jnp.float32)
    masks = _make_tap_masks(H, W)

    kern = functools.partial(fused_forward_kernel, H=H, W=W, nb=nb)

    def _full(shape):
        return pl.BlockSpec(shape, lambda b, _s=len(shape): (0,) * _s)

    out = pl.pallas_call(
        kern,
        out_shape=jax.ShapeDtypeStruct((B, Cin, HW), jnp.float32),
        grid=(B,),
        in_specs=[
            pl.BlockSpec((1, Cin, HW), lambda b: (b, 0, 0)),   # feature
            pl.BlockSpec((1, G, HW), lambda b: (b, 0, 0)),     # heatmap
            _full((9, 1, HW)),                                 # tap masks
            _full((RC, Cin)),                                  # wf (1x1)
            _full((RC, 1)),                                    # bf
            _full((nb, 9, MC, RC)),                            # W1 per-tap
            _full((nb, MC, 1)),                                # B1
            _full((nb, 9, RC, MC)),                            # W2 per-tap
            _full((nb, RC, 1)),                                # B2
            _full((RC, G)),                                    # R^T (attn repeat)
            _full((Cin, RC)),                                  # S^T (group sum)
        ],
        out_specs=pl.BlockSpec((1, Cin, HW), lambda b: (b, 0, 0)),
        compiler_params=pltpu.CompilerParams(
            dimension_semantics=("parallel",)),
    )(x, hm, masks, kp["wf"], kp["bf"], kp["W1"], kp["B1"], kp["W2"],
      kp["B2"], kp["R"], kp["S"])

    return out.reshape(B, Cin, H, W)                    # pure reshape back


# ----------------------------------------------------------------------------
# Parameters: torch-layout init + one-time conversion to kernel layout
# ----------------------------------------------------------------------------
def init_params(key, in_channels, num_heatmaps, num_blocks, mid_channels=None):
    """Synthetic parameters in PyTorch layout (grouped OIHW)."""
    res_ch = in_channels * num_heatmaps
    mid_ch = num_heatmaps * in_channels if mid_channels is None else mid_channels
    G = num_heatmaps
    keys = jax.random.split(key, 2 + 4 * num_blocks)
    params = {
        "w_first": 0.1 * jax.random.normal(keys[0], (res_ch, in_channels, 1, 1), jnp.float32),
        "b_first": 0.1 * jax.random.normal(keys[1], (res_ch,), jnp.float32),
        "blocks": [],
    }
    for i in range(num_blocks):
        k = keys[2 + 4 * i: 2 + 4 * (i + 1)]
        w1 = 0.1 * jax.random.normal(k[0], (mid_ch, res_ch // G, 3, 3), jnp.float32)
        b1 = 0.1 * jax.random.normal(k[1], (mid_ch,), jnp.float32)
        w2 = 0.1 * jax.random.normal(k[2], (res_ch, mid_ch // G, 3, 3), jnp.float32)
        b2 = 0.1 * jax.random.normal(k[3], (res_ch,), jnp.float32)
        params["blocks"].append((w1, b1, w2, b2))
    return params


def _grouped_to_dense_np(w, groups, cin_total):
    w = np.asarray(w)
    cout, cin_pg, kh, kw = w.shape
    cout_pg = cout // groups
    dense = np.zeros((cout, cin_total, kh, kw), w.dtype)
    for g in range(groups):
        dense[g * cout_pg:(g + 1) * cout_pg, g * cin_pg:(g + 1) * cin_pg] = \
            w[g * cout_pg:(g + 1) * cout_pg]
    return dense


def _oihw_to_taps_np(w_dense):
    # (Cout, Cin, 3, 3) -> (9, Cout, Cin); tap index k = kh*3 + kw
    cout, cin = w_dense.shape[:2]
    return np.transpose(w_dense, (2, 3, 0, 1)).reshape(9, cout, cin)


def prepare_kernel_params(params, in_channels, num_heatmaps, mid_channels=None):
    """One-time conversion (hoisted out of the forward) to kernel layout."""
    Cin = in_channels
    G = num_heatmaps
    RC = Cin * G
    MC = G * Cin if mid_channels is None else mid_channels

    wf = np.asarray(params["w_first"])[:, :, 0, 0].astype(np.float32)       # (RC, Cin)
    bf = np.asarray(params["b_first"]).reshape(RC, 1).astype(np.float32)

    W1, B1, W2, B2 = [], [], [], []
    for (w1, b1, w2, b2) in params["blocks"]:
        W1.append(_oihw_to_taps_np(_grouped_to_dense_np(w1, G, RC)).astype(np.float32))
        B1.append(np.asarray(b1, np.float32).reshape(MC, 1))
        W2.append(_oihw_to_taps_np(_grouped_to_dense_np(w2, G, MC)).astype(np.float32))
        B2.append(np.asarray(b2, np.float32).reshape(RC, 1))

    # R^T broadcasts per-group attention across that group's channels,
    # S^T sums the weighted feature back over groups (lane-dense matmuls).
    rT = np.zeros((RC, G), np.float32)
    sT = np.zeros((Cin, RC), np.float32)
    for g in range(G):
        rT[g * Cin:(g + 1) * Cin, g] = 1.0
    for j in range(RC):
        sT[j % Cin, j] = 1.0

    return {
        "wf": jnp.asarray(wf), "bf": jnp.asarray(bf),
        "W1": jnp.asarray(np.stack(W1)), "B1": jnp.asarray(np.stack(B1)),
        "W2": jnp.asarray(np.stack(W2)), "B2": jnp.asarray(np.stack(B2)),
        "R": jnp.asarray(rT), "S": jnp.asarray(sT),
        "G": G, "RC": RC, "MC": MC, "nb": len(params["blocks"]),
    }


# ----------------------------------------------------------------------------
# Pure-JAX reference (matches PyTorch semantics) for verification
# ----------------------------------------------------------------------------
def ref_forward(feature, heatmap, params, num_heatmaps):
    G = num_heatmaps

    def conv(x, w, b, groups, pad):
        y = jax.lax.conv_general_dilated(
            x, w, (1, 1), pad,
            dimension_numbers=("NCHW", "OIHW", "NCHW"),
            feature_group_count=groups)
        return y + b.reshape(1, -1, 1, 1)

    leaky = lambda v: jnp.where(v >= 0, v, NEG_SLOPE * v)
    y = leaky(conv(feature, params["w_first"], params["b_first"], 1, "VALID"))
    for (w1, b1, w2, b2) in params["blocks"]:
        r = leaky(conv(y, w1, b1, G, "SAME"))
        r = conv(r, w2, b2, G, "SAME")
        y = y + r
    attn = jax.nn.softmax(heatmap, axis=1)
    B, Cin, H, W = feature.shape
    f = y.reshape(B, G, Cin, H, W) * attn[:, :, None, :, :]
    return f.sum(axis=1)


if __name__ == "__main__":
    key = jax.random.PRNGKey(0)
    kf, kh, kp_key = jax.random.split(key, 3)

    B, Cin, H, W = 2, 4, 16, 16
    num_heatmaps, num_blocks = 4, 2

    feature = jax.random.normal(kf, (B, Cin, H, W), jnp.float32)
    heatmap = jax.random.normal(kh, (B, num_heatmaps, H, W), jnp.float32)

    params = init_params(kp_key, Cin, num_heatmaps, num_blocks)
    kparams = prepare_kernel_params(params, Cin, num_heatmaps)   # one-time prep

    out = feature_heatmap_fusing_forward(feature, heatmap, kparams)
    out = jax.block_until_ready(out)

    ref = ref_forward(feature, heatmap, params, num_heatmaps)
    # Tolerance relaxed vs. 1e-4 because the softmax denominator now uses the
    # EUP approximate reciprocal (pl.reciprocal(approx=True)).
    np.testing.assert_allclose(np.asarray(out), np.asarray(ref),
                               rtol=5e-3, atol=5e-3)

    print("KERNEL_OK")
</pallas_src>

<mosaic_0001>
module attributes {stable_mosaic.version = 11 : i64} {
  func.func @fused_forward_kernel(%arg0: i32, %arg1: memref<1x4x256xf32, #tpu.memory_space<vmem>>, %arg2: memref<1x4x256xf32, #tpu.memory_space<vmem>>, %arg3: memref<9x1x256xf32, #tpu.memory_space<vmem>>, %arg4: memref<16x4xf32, #tpu.memory_space<vmem>>, %arg5: memref<16x1xf32, #tpu.memory_space<vmem>>, %arg6: memref<2x9x16x16xf32, #tpu.memory_space<vmem>>, %arg7: memref<2x16x1xf32, #tpu.memory_space<vmem>>, %arg8: memref<2x9x16x16xf32, #tpu.memory_space<vmem>>, %arg9: memref<2x16x1xf32, #tpu.memory_space<vmem>>, %arg10: memref<16x4xf32, #tpu.memory_space<vmem>>, %arg11: memref<4x16xf32, #tpu.memory_space<vmem>>, %arg12: memref<1x4x256xf32, #tpu.memory_space<vmem>>) attributes {dimension_semantics = [#tpu.dimension_semantics<parallel>], iteration_bounds = array<i64: 2>, scalar_prefetch = 0 : i64, scratch_operands = 0 : i64, tpu.core_type = #tpu.core_type<tc>, window_params = [{transform_indices = @transform_0, window_bounds = array<i64: 1, 4, 256>}, {transform_indices = @transform_1, window_bounds = array<i64: 1, 4, 256>}, {pipeline_mode = #tpu.pipeline_mode<synchronous>, transform_indices = @transform_2, window_bounds = array<i64: 9, 1, 256>}, {pipeline_mode = #tpu.pipeline_mode<synchronous>, transform_indices = @transform_3, window_bounds = array<i64: 16, 4>}, {pipeline_mode = #tpu.pipeline_mode<synchronous>, transform_indices = @transform_4, window_bounds = array<i64: 16, 1>}, {pipeline_mode = #tpu.pipeline_mode<synchronous>, transform_indices = @transform_5, window_bounds = array<i64: 2, 9, 16, 16>}, {pipeline_mode = #tpu.pipeline_mode<synchronous>, transform_indices = @transform_6, window_bounds = array<i64: 2, 16, 1>}, {pipeline_mode = #tpu.pipeline_mode<synchronous>, transform_indices = @transform_7, window_bounds = array<i64: 2, 9, 16, 16>}, {pipeline_mode = #tpu.pipeline_mode<synchronous>, transform_indices = @transform_8, window_bounds = array<i64: 2, 16, 1>}, {pipeline_mode = #tpu.pipeline_mode<synchronous>, transform_indices = @transform_9, window_bounds = array<i64: 16, 4>}, {pipeline_mode = #tpu.pipeline_mode<synchronous>, transform_indices = @transform_10, window_bounds = array<i64: 4, 16>}, {transform_indices = @transform_11, window_bounds = array<i64: 1, 4, 256>}]} {
    %c0 = arith.constant 0 : index
    %c0_0 = arith.constant 0 : index
    %0 = vector.load %arg4[%c0, %c0_0] : memref<16x4xf32, #tpu.memory_space<vmem>>, vector<16x4xf32>
    %c0_1 = arith.constant 0 : index
    %c0_2 = arith.constant 0 : index
    %c0_3 = arith.constant 0 : index
    %1 = vector.load %arg1[%c0_1, %c0_2, %c0_3] : memref<1x4x256xf32, #tpu.memory_space<vmem>>, vector<1x4x256xf32>
    %2 = vector.shape_cast %1 : vector<1x4x256xf32> to vector<4x256xf32>
    %cst = arith.constant dense<0.000000e+00> : vector<16x256xf32>
    %3 = tpu.matmul %0, %2, %cst {dimension_numbers = #tpu.dot_dimension_numbers<[1], [0], [0], [1], [0, 0, 1, 1], [], []>} : vector<16x4xf32>, vector<4x256xf32>, vector<16x256xf32> -> vector<16x256xf32>
    %c0_4 = arith.constant 0 : index
    %c0_5 = arith.constant 0 : index
    %4 = vector.load %arg5[%c0_4, %c0_5] : memref<16x1xf32, #tpu.memory_space<vmem>>, vector<16x1xf32>
    %5 = vector.broadcast %4 : vector<16x1xf32> to vector<16x256xf32>
    %6 = arith.addf %3, %5 : vector<16x256xf32>
    %cst_6 = arith.constant 0.000000e+00 : f32
    %7 = vector.broadcast %cst_6 : f32 to vector<16x256xf32>
    %8 = arith.cmpf oge, %6, %7 : vector<16x256xf32>
    %cst_7 = arith.constant 2.000000e-01 : f32
    %9 = vector.broadcast %cst_7 : f32 to vector<16x256xf32>
    %10 = arith.mulf %9, %6 : vector<16x256xf32>
    %11 = arith.select %8, %6, %10 : vector<16x256xi1>, vector<16x256xf32>
    %c17_i32 = arith.constant 17 : i32
    %12 = tpu.dynamic_rotate %11 by %c17_i32 dim 1 : vector<16x256xf32>, i32 -> vector<16x256xf32>
    %c0_8 = arith.constant 0 : index
    %c0_9 = arith.constant 0 : index
    %c0_10 = arith.constant 0 : index
    %13 = vector.load %arg3[%c0_8, %c0_9, %c0_10] : memref<9x1x256xf32, #tpu.memory_space<vmem>>, vector<1x1x256xf32>
    %14 = vector.shape_cast %13 : vector<1x1x256xf32> to vector<1x256xf32>
    %15 = vector.broadcast %14 : vector<1x256xf32> to vector<16x256xf32>
    %16 = arith.mulf %12, %15 : vector<16x256xf32>
    %c0_11 = arith.constant 0 : index
    %c0_12 = arith.constant 0 : index
    %c0_13 = arith.constant 0 : index
    %c0_14 = arith.constant 0 : index
    %17 = vector.load %arg6[%c0_11, %c0_12, %c0_13, %c0_14] : memref<2x9x16x16xf32, #tpu.memory_space<vmem>>, vector<1x1x16x16xf32>
    %18 = vector.shape_cast %17 : vector<1x1x16x16xf32> to vector<16x16xf32>
    %cst_15 = arith.constant dense<0.000000e+00> : vector<16x256xf32>
    %19 = tpu.matmul %18, %16, %cst_15 {dimension_numbers = #tpu.dot_dimension_numbers<[1], [0], [0], [1], [0, 0, 1, 1], [], []>} : vector<16x16xf32>, vector<16x256xf32>, vector<16x256xf32> -> vector<16x256xf32>
    %c16_i32 = arith.constant 16 : i32
    %20 = tpu.dynamic_rotate %11 by %c16_i32 dim 1 : vector<16x256xf32>, i32 -> vector<16x256xf32>
    %c1 = arith.constant 1 : index
    %c0_16 = arith.constant 0 : index
    %c0_17 = arith.constant 0 : index
    %21 = vector.load %arg3[%c1, %c0_16, %c0_17] : memref<9x1x256xf32, #tpu.memory_space<vmem>>, vector<1x1x256xf32>
    %22 = vector.shape_cast %21 : vector<1x1x256xf32> to vector<1x256xf32>
    %23 = vector.broadcast %22 : vector<1x256xf32> to vector<16x256xf32>
    %24 = arith.mulf %20, %23 : vector<16x256xf32>
    %c0_18 = arith.constant 0 : index
    %c1_19 = arith.constant 1 : index
    %c0_20 = arith.constant 0 : index
    %c0_21 = arith.constant 0 : index
    %25 = vector.load %arg6[%c0_18, %c1_19, %c0_20, %c0_21] : memref<2x9x16x16xf32, #tpu.memory_space<vmem>>, vector<1x1x16x16xf32>
    %26 = vector.shape_cast %25 : vector<1x1x16x16xf32> to vector<16x16xf32>
    %cst_22 = arith.constant dense<0.000000e+00> : vector<16x256xf32>
    %27 = tpu.matmul %26, %24, %cst_22 {dimension_numbers = #tpu.dot_dimension_numbers<[1], [0], [0], [1], [0, 0, 1, 1], [], []>} : vector<16x16xf32>, vector<16x256xf32>, vector<16x256xf32> -> vector<16x256xf32>
    %28 = arith.addf %19, %27 : vector<16x256xf32>
    %c15_i32 = arith.constant 15 : i32
    %29 = tpu.dynamic_rotate %11 by %c15_i32 dim 1 : vector<16x256xf32>, i32 -> vector<16x256xf32>
    %c2 = arith.constant 2 : index
    %c0_23 = arith.constant 0 : index
    %c0_24 = arith.constant 0 : index
    %30 = vector.load %arg3[%c2, %c0_23, %c0_24] : memref<9x1x256xf32, #tpu.memory_space<vmem>>, vector<1x1x256xf32>
    %31 = vector.shape_cast %30 : vector<1x1x256xf32> to vector<1x256xf32>
    %32 = vector.broadcast %31 : vector<1x256xf32> to vector<16x256xf32>
    %33 = arith.mulf %29, %32 : vector<16x256xf32>
    %c0_25 = arith.constant 0 : index
    %c2_26 = arith.constant 2 : index
    %c0_27 = arith.constant 0 : index
    %c0_28 = arith.constant 0 : index
    %34 = vector.load %arg6[%c0_25, %c2_26, %c0_27, %c0_28] : memref<2x9x16x16xf32, #tpu.memory_space<vmem>>, vector<1x1x16x16xf32>
    %35 = vector.shape_cast %34 : vector<1x1x16x16xf32> to vector<16x16xf32>
    %cst_29 = arith.constant dense<0.000000e+00> : vector<16x256xf32>
    %36 = tpu.matmul %35, %33, %cst_29 {dimension_numbers = #tpu.dot_dimension_numbers<[1], [0], [0], [1], [0, 0, 1, 1], [], []>} : vector<16x16xf32>, vector<16x256xf32>, vector<16x256xf32> -> vector<16x256xf32>
    %37 = arith.addf %28, %36 : vector<16x256xf32>
    %c1_i32 = arith.constant 1 : i32
    %38 = tpu.dynamic_rotate %11 by %c1_i32 dim 1 : vector<16x256xf32>, i32 -> vector<16x256xf32>
    %c3 = arith.constant 3 : index
    %c0_30 = arith.constant 0 : index
    %c0_31 = arith.constant 0 : index
    %39 = vector.load %arg3[%c3, %c0_30, %c0_31] : memref<9x1x256xf32, #tpu.memory_space<vmem>>, vector<1x1x256xf32>
    %40 = vector.shape_cast %39 : vector<1x1x256xf32> to vector<1x256xf32>
    %41 = vector.broadcast %40 : vector<1x256xf32> to vector<16x256xf32>
    %42 = arith.mulf %38, %41 : vector<16x256xf32>
    %c0_32 = arith.constant 0 : index
    %c3_33 = arith.constant 3 : index
    %c0_34 = arith.constant 0 : index
    %c0_35 = arith.constant 0 : index
    %43 = vector.load %arg6[%c0_32, %c3_33, %c0_34, %c0_35] : memref<2x9x16x16xf32, #tpu.memory_space<vmem>>, vector<1x1x16x16xf32>
    %44 = vector.shape_cast %43 : vector<1x1x16x16xf32> to vector<16x16xf32>
    %cst_36 = arith.constant dense<0.000000e+00> : vector<16x256xf32>
    %45 = tpu.matmul %44, %42, %cst_36 {dimension_numbers = #tpu.dot_dimension_numbers<[1], [0], [0], [1], [0, 0, 1, 1], [], []>} : vector<16x16xf32>, vector<16x256xf32>, vector<16x256xf32> -> vector<16x256xf32>
    %46 = arith.addf %37, %45 : vector<16x256xf32>
    %c0_37 = arith.constant 0 : index
    %c4 = arith.constant 4 : index
    %c0_38 = arith.constant 0 : index
    %c0_39 = arith.constant 0 : index
    %47 = vector.load %arg6[%c0_37, %c4, %c0_38, %c0_39] : memref<2x9x16x16xf32, #tpu.memory_space<vmem>>, vector<1x1x16x16xf32>
    %48 = vector.shape_cast %47 : vector<1x1x16x16xf32> to vector<16x16xf32>
    %cst_40 = arith.constant dense<0.000000e+00> : vector<16x256xf32>
    %49 = tpu.matmul %48, %11, %cst_40 {dimension_numbers = #tpu.dot_dimension_numbers<[1], [0], [0], [1], [0, 0, 1, 1], [], []>} : vector<16x16xf32>, vector<16x256xf32>, vector<16x256xf32> -> vector<16x256xf32>
    %50 = arith.addf %46, %49 : vector<16x256xf32>
    %c255_i32 = arith.constant 255 : i32
    %51 = tpu.dynamic_rotate %11 by %c255_i32 dim 1 : vector<16x256xf32>, i32 -> vector<16x256xf32>
    %c5 = arith.constant 5 : index
    %c0_41 = arith.constant 0 : index
    %c0_42 = arith.constant 0 : index
    %52 = vector.load %arg3[%c5, %c0_41, %c0_42] : memref<9x1x256xf32, #tpu.memory_space<vmem>>, vector<1x1x256xf32>
    %53 = vector.shape_cast %52 : vector<1x1x256xf32> to vector<1x256xf32>
    %54 = vector.broadcast %53 : vector<1x256xf32> to vector<16x256xf32>
    %55 = arith.mulf %51, %54 : vector<16x256xf32>
    %c0_43 = arith.constant 0 : index
    %c5_44 = arith.constant 5 : index
    %c0_45 = arith.constant 0 : index
    %c0_46 = arith.constant 0 : index
    %56 = vector.load %arg6[%c0_43, %c5_44, %c0_45, %c0_46] : memref<2x9x16x16xf32, #tpu.memory_space<vmem>>, vector<1x1x16x16xf32>
    %57 = vector.shape_cast %56 : vector<1x1x16x16xf32> to vector<16x16xf32>
    %cst_47 = arith.constant dense<0.000000e+00> : vector<16x256xf32>
    %58 = tpu.matmul %57, %55, %cst_47 {dimension_numbers = #tpu.dot_dimension_numbers<[1], [0], [0], [1], [0, 0, 1, 1], [], []>} : vector<16x16xf32>, vector<16x256xf32>, vector<16x256xf32> -> vector<16x256xf32>
    %59 = arith.addf %50, %58 : vector<16x256xf32>
    %c241_i32 = arith.constant 241 : i32
    %60 = tpu.dynamic_rotate %11 by %c241_i32 dim 1 : vector<16x256xf32>, i32 -> vector<16x256xf32>
    %c6 = arith.constant 6 : index
    %c0_48 = arith.constant 0 : index
    %c0_49 = arith.constant 0 : index
    %61 = vector.load %arg3[%c6, %c0_48, %c0_49] : memref<9x1x256xf32, #tpu.memory_space<vmem>>, vector<1x1x256xf32>
    %62 = vector.shape_cast %61 : vector<1x1x256xf32> to vector<1x256xf32>
    %63 = vector.broadcast %62 : vector<1x256xf32> to vector<16x256xf32>
    %64 = arith.mulf %60, %63 : vector<16x256xf32>
    %c0_50 = arith.constant 0 : index
    %c6_51 = arith.constant 6 : index
    %c0_52 = arith.constant 0 : index
    %c0_53 = arith.constant 0 : index
    %65 = vector.load %arg6[%c0_50, %c6_51, %c0_52, %c0_53] : memref<2x9x16x16xf32, #tpu.memory_space<vmem>>, vector<1x1x16x16xf32>
    %66 = vector.shape_cast %65 : vector<1x1x16x16xf32> to vector<16x16xf32>
    %cst_54 = arith.constant dense<0.000000e+00> : vector<16x256xf32>
    %67 = tpu.matmul %66, %64, %cst_54 {dimension_numbers = #tpu.dot_dimension_numbers<[1], [0], [0], [1], [0, 0, 1, 1], [], []>} : vector<16x16xf32>, vector<16x256xf32>, vector<16x256xf32> -> vector<16x256xf32>
    %68 = arith.addf %59, %67 : vector<16x256xf32>
    %c240_i32 = arith.constant 240 : i32
    %69 = tpu.dynamic_rotate %11 by %c240_i32 dim 1 : vector<16x256xf32>, i32 -> vector<16x256xf32>
    %c7 = arith.constant 7 : index
    %c0_55 = arith.constant 0 : index
    %c0_56 = arith.constant 0 : index
    %70 = vector.load %arg3[%c7, %c0_55, %c0_56] : memref<9x1x256xf32, #tpu.memory_space<vmem>>, vector<1x1x256xf32>
    %71 = vector.shape_cast %70 : vector<1x1x256xf32> to vector<1x256xf32>
    %72 = vector.broadcast %71 : vector<1x256xf32> to vector<16x256xf32>
    %73 = arith.mulf %69, %72 : vector<16x256xf32>
    %c0_57 = arith.constant 0 : index
    %c7_58 = arith.constant 7 : index
    %c0_59 = arith.constant 0 : index
    %c0_60 = arith.constant 0 : index
    %74 = vector.load %arg6[%c0_57, %c7_58, %c0_59, %c0_60] : memref<2x9x16x16xf32, #tpu.memory_space<vmem>>, vector<1x1x16x16xf32>
    %75 = vector.shape_cast %74 : vector<1x1x16x16xf32> to vector<16x16xf32>
    %cst_61 = arith.constant dense<0.000000e+00> : vector<16x256xf32>
    %76 = tpu.matmul %75, %73, %cst_61 {dimension_numbers = #tpu.dot_dimension_numbers<[1], [0], [0], [1], [0, 0, 1, 1], [], []>} : vector<16x16xf32>, vector<16x256xf32>, vector<16x256xf32> -> vector<16x256xf32>
    %77 = arith.addf %68, %76 : vector<16x256xf32>
    %c239_i32 = arith.constant 239 : i32
    %78 = tpu.dynamic_rotate %11 by %c239_i32 dim 1 : vector<16x256xf32>, i32 -> vector<16x256xf32>
    %c8 = arith.constant 8 : index
    %c0_62 = arith.constant 0 : index
    %c0_63 = arith.constant 0 : index
    %79 = vector.load %arg3[%c8, %c0_62, %c0_63] : memref<9x1x256xf32, #tpu.memory_space<vmem>>, vector<1x1x256xf32>
    %80 = vector.shape_cast %79 : vector<1x1x256xf32> to vector<1x256xf32>
    %81 = vector.broadcast %80 : vector<1x256xf32> to vector<16x256xf32>
    %82 = arith.mulf %78, %81 : vector<16x256xf32>
    %c0_64 = arith.constant 0 : index
    %c8_65 = arith.constant 8 : index
    %c0_66 = arith.constant 0 : index
    %c0_67 = arith.constant 0 : index
    %83 = vector.load %arg6[%c0_64, %c8_65, %c0_66, %c0_67] : memref<2x9x16x16xf32, #tpu.memory_space<vmem>>, vector<1x1x16x16xf32>
    %84 = vector.shape_cast %83 : vector<1x1x16x16xf32> to vector<16x16xf32>
    %cst_68 = arith.constant dense<0.000000e+00> : vector<16x256xf32>
    %85 = tpu.matmul %84, %82, %cst_68 {dimension_numbers = #tpu.dot_dimension_numbers<[1], [0], [0], [1], [0, 0, 1, 1], [], []>} : vector<16x16xf32>, vector<16x256xf32>, vector<16x256xf32> -> vector<16x256xf32>
    %86 = arith.addf %77, %85 : vector<16x256xf32>
    %c0_69 = arith.constant 0 : index
    %c0_70 = arith.constant 0 : index
    %c0_71 = arith.constant 0 : index
    %87 = vector.load %arg7[%c0_69, %c0_70, %c0_71] : memref<2x16x1xf32, #tpu.memory_space<vmem>>, vector<1x16x1xf32>
    %88 = vector.shape_cast %87 : vector<1x16x1xf32> to vector<16x1xf32>
    %89 = vector.broadcast %88 : vector<16x1xf32> to vector<16x256xf32>
    %90 = arith.addf %86, %89 : vector<16x256xf32>
    %cst_72 = arith.constant 0.000000e+00 : f32
    %91 = vector.broadcast %cst_72 : f32 to vector<16x256xf32>
    %92 = arith.cmpf oge, %90, %91 : vector<16x256xf32>
    %cst_73 = arith.constant 2.000000e-01 : f32
    %93 = vector.broadcast %cst_73 : f32 to vector<16x256xf32>
    %94 = arith.mulf %93, %90 : vector<16x256xf32>
    %95 = arith.select %92, %90, %94 : vector<16x256xi1>, vector<16x256xf32>
    %c17_i32_74 = arith.constant 17 : i32
    %96 = tpu.dynamic_rotate %95 by %c17_i32_74 dim 1 : vector<16x256xf32>, i32 -> vector<16x256xf32>
    %c0_75 = arith.constant 0 : index
    %c0_76 = arith.constant 0 : index
    %c0_77 = arith.constant 0 : index
    %97 = vector.load %arg3[%c0_75, %c0_76, %c0_77] : memref<9x1x256xf32, #tpu.memory_space<vmem>>, vector<1x1x256xf32>
    %98 = vector.shape_cast %97 : vector<1x1x256xf32> to vector<1x256xf32>
    %99 = vector.broadcast %98 : vector<1x256xf32> to vector<16x256xf32>
    %100 = arith.mulf %96, %99 : vector<16x256xf32>
    %c0_78 = arith.constant 0 : index
    %c0_79 = arith.constant 0 : index
    %c0_80 = arith.constant 0 : index
    %c0_81 = arith.constant 0 : index
    %101 = vector.load %arg8[%c0_78, %c0_79, %c0_80, %c0_81] : memref<2x9x16x16xf32, #tpu.memory_space<vmem>>, vector<1x1x16x16xf32>
    %102 = vector.shape_cast %101 : vector<1x1x16x16xf32> to vector<16x16xf32>
    %cst_82 = arith.constant dense<0.000000e+00> : vector<16x256xf32>
    %103 = tpu.matmul %102, %100, %cst_82 {dimension_numbers = #tpu.dot_dimension_numbers<[1], [0], [0], [1], [0, 0, 1, 1], [], []>} : vector<16x16xf32>, vector<16x256xf32>, vector<16x256xf32> -> vector<16x256xf32>
    %c16_i32_83 = arith.constant 16 : i32
    %104 = tpu.dynamic_rotate %95 by %c16_i32_83 dim 1 : vector<16x256xf32>, i32 -> vector<16x256xf32>
    %c1_84 = arith.constant 1 : index
    %c0_85 = arith.constant 0 : index
    %c0_86 = arith.constant 0 : index
    %105 = vector.load %arg3[%c1_84, %c0_85, %c0_86] : memref<9x1x256xf32, #tpu.memory_space<vmem>>, vector<1x1x256xf32>
    %106 = vector.shape_cast %105 : vector<1x1x256xf32> to vector<1x256xf32>
    %107 = vector.broadcast %106 : vector<1x256xf32> to vector<16x256xf32>
    %108 = arith.mulf %104, %107 : vector<16x256xf32>
    %c0_87 = arith.constant 0 : index
    %c1_88 = arith.constant 1 : index
    %c0_89 = arith.constant 0 : index
    %c0_90 = arith.constant 0 : index
    %109 = vector.load %arg8[%c0_87, %c1_88, %c0_89, %c0_90] : memref<2x9x16x16xf32, #tpu.memory_space<vmem>>, vector<1x1x16x16xf32>
    %110 = vector.shape_cast %109 : vector<1x1x16x16xf32> to vector<16x16xf32>
    %cst_91 = arith.constant dense<0.000000e+00> : vector<16x256xf32>
    %111 = tpu.matmul %110, %108, %cst_91 {dimension_numbers = #tpu.dot_dimension_numbers<[1], [0], [0], [1], [0, 0, 1, 1], [], []>} : vector<16x16xf32>, vector<16x256xf32>, vector<16x256xf32> -> vector<16x256xf32>
    %112 = arith.addf %103, %111 : vector<16x256xf32>
    %c15_i32_92 = arith.constant 15 : i32
    %113 = tpu.dynamic_rotate %95 by %c15_i32_92 dim 1 : vector<16x256xf32>, i32 -> vector<16x256xf32>
    %c2_93 = arith.constant 2 : index
    %c0_94 = arith.constant 0 : index
    %c0_95 = arith.constant 0 : index
    %114 = vector.load %arg3[%c2_93, %c0_94, %c0_95] : memref<9x1x256xf32, #tpu.memory_space<vmem>>, vector<1x1x256xf32>
    %115 = vector.shape_cast %114 : vector<1x1x256xf32> to vector<1x256xf32>
    %116 = vector.broadcast %115 : vector<1x256xf32> to vector<16x256xf32>
    %117 = arith.mulf %113, %116 : vector<16x256xf32>
    %c0_96 = arith.constant 0 : index
    %c2_97 = arith.constant 2 : index
    %c0_98 = arith.constant 0 : index
    %c0_99 = arith.constant 0 : index
    %118 = vector.load %arg8[%c0_96, %c2_97, %c0_98, %c0_99] : memref<2x9x16x16xf32, #tpu.memory_space<vmem>>, vector<1x1x16x16xf32>
    %119 = vector.shape_cast %118 : vector<1x1x16x16xf32> to vector<16x16xf32>
    %cst_100 = arith.constant dense<0.000000e+00> : vector<16x256xf32>
    %120 = tpu.matmul %119, %117, %cst_100 {dimension_numbers = #tpu.dot_dimension_numbers<[1], [0], [0], [1], [0, 0, 1, 1], [], []>} : vector<16x16xf32>, vector<16x256xf32>, vector<16x256xf32> -> vector<16x256xf32>
    %121 = arith.addf %112, %120 : vector<16x256xf32>
    %c1_i32_101 = arith.constant 1 : i32
    %122 = tpu.dynamic_rotate %95 by %c1_i32_101 dim 1 : vector<16x256xf32>, i32 -> vector<16x256xf32>
    %c3_102 = arith.constant 3 : index
    %c0_103 = arith.constant 0 : index
    %c0_104 = arith.constant 0 : index
    %123 = vector.load %arg3[%c3_102, %c0_103, %c0_104] : memref<9x1x256xf32, #tpu.memory_space<vmem>>, vector<1x1x256xf32>
    %124 = vector.shape_cast %123 : vector<1x1x256xf32> to vector<1x256xf32>
    %125 = vector.broadcast %124 : vector<1x256xf32> to vector<16x256xf32>
    %126 = arith.mulf %122, %125 : vector<16x256xf32>
    %c0_105 = arith.constant 0 : index
    %c3_106 = arith.constant 3 : index
    %c0_107 = arith.constant 0 : index
    %c0_108 = arith.constant 0 : index
    %127 = vector.load %arg8[%c0_105, %c3_106, %c0_107, %c0_108] : memref<2x9x16x16xf32, #tpu.memory_space<vmem>>, vector<1x1x16x16xf32>
    %128 = vector.shape_cast %127 : vector<1x1x16x16xf32> to vector<16x16xf32>
    %cst_109 = arith.constant dense<0.000000e+00> : vector<16x256xf32>
    %129 = tpu.matmul %128, %126, %cst_109 {dimension_numbers = #tpu.dot_dimension_numbers<[1], [0], [0], [1], [0, 0, 1, 1], [], []>} : vector<16x16xf32>, vector<16x256xf32>, vector<16x256xf32> -> vector<16x256xf32>
    %130 = arith.addf %121, %129 : vector<16x256xf32>
    %c0_110 = arith.constant 0 : index
    %c4_111 = arith.constant 4 : index
    %c0_112 = arith.constant 0 : index
    %c0_113 = arith.constant 0 : index
    %131 = vector.load %arg8[%c0_110, %c4_111, %c0_112, %c0_113] : memref<2x9x16x16xf32, #tpu.memory_space<vmem>>, vector<1x1x16x16xf32>
    %132 = vector.shape_cast %131 : vector<1x1x16x16xf32> to vector<16x16xf32>
    %cst_114 = arith.constant dense<0.000000e+00> : vector<16x256xf32>
    %133 = tpu.matmul %132, %95, %cst_114 {dimension_numbers = #tpu.dot_dimension_numbers<[1], [0], [0], [1], [0, 0, 1, 1], [], []>} : vector<16x16xf32>, vector<16x256xf32>, vector<16x256xf32> -> vector<16x256xf32>
    %134 = arith.addf %130, %133 : vector<16x256xf32>
    %c255_i32_115 = arith.constant 255 : i32
    %135 = tpu.dynamic_rotate %95 by %c255_i32_115 dim 1 : vector<16x256xf32>, i32 -> vector<16x256xf32>
    %c5_116 = arith.constant 5 : index
    %c0_117 = arith.constant 0 : index
    %c0_118 = arith.constant 0 : index
    %136 = vector.load %arg3[%c5_116, %c0_117, %c0_118] : memref<9x1x256xf32, #tpu.memory_space<vmem>>, vector<1x1x256xf32>
    %137 = vector.shape_cast %136 : vector<1x1x256xf32> to vector<1x256xf32>
    %138 = vector.broadcast %137 : vector<1x256xf32> to vector<16x256xf32>
    %139 = arith.mulf %135, %138 : vector<16x256xf32>
    %c0_119 = arith.constant 0 : index
    %c5_120 = arith.constant 5 : index
    %c0_121 = arith.constant 0 : index
    %c0_122 = arith.constant 0 : index
    %140 = vector.load %arg8[%c0_119, %c5_120, %c0_121, %c0_122] : memref<2x9x16x16xf32, #tpu.memory_space<vmem>>, vector<1x1x16x16xf32>
    %141 = vector.shape_cast %140 : vector<1x1x16x16xf32> to vector<16x16xf32>
    %cst_123 = arith.constant dense<0.000000e+00> : vector<16x256xf32>
    %142 = tpu.matmul %141, %139, %cst_123 {dimension_numbers = #tpu.dot_dimension_numbers<[1], [0], [0], [1], [0, 0, 1, 1], [], []>} : vector<16x16xf32>, vector<16x256xf32>, vector<16x256xf32> -> vector<16x256xf32>
    %143 = arith.addf %134, %142 : vector<16x256xf32>
    %c241_i32_124 = arith.constant 241 : i32
    %144 = tpu.dynamic_rotate %95 by %c241_i32_124 dim 1 : vector<16x256xf32>, i32 -> vector<16x256xf32>
    %c6_125 = arith.constant 6 : index
    %c0_126 = arith.constant 0 : index
    %c0_127 = arith.constant 0 : index
    %145 = vector.load %arg3[%c6_125, %c0_126, %c0_127] : memref<9x1x256xf32, #tpu.memory_space<vmem>>, vector<1x1x256xf32>
    %146 = vector.shape_cast %145 : vector<1x1x256xf32> to vector<1x256xf32>
    %147 = vector.broadcast %146 : vector<1x256xf32> to vector<16x256xf32>
    %148 = arith.mulf %144, %147 : vector<16x256xf32>
    %c0_128 = arith.constant 0 : index
    %c6_129 = arith.constant 6 : index
    %c0_130 = arith.constant 0 : index
    %c0_131 = arith.constant 0 : index
    %149 = vector.load %arg8[%c0_128, %c6_129, %c0_130, %c0_131] : memref<2x9x16x16xf32, #tpu.memory_space<vmem>>, vector<1x1x16x16xf32>
    %150 = vector.shape_cast %149 : vector<1x1x16x16xf32> to vector<16x16xf32>
    %cst_132 = arith.constant dense<0.000000e+00> : vector<16x256xf32>
    %151 = tpu.matmul %150, %148, %cst_132 {dimension_numbers = #tpu.dot_dimension_numbers<[1], [0], [0], [1], [0, 0, 1, 1], [], []>} : vector<16x16xf32>, vector<16x256xf32>, vector<16x256xf32> -> vector<16x256xf32>
    %152 = arith.addf %143, %151 : vector<16x256xf32>
    %c240_i32_133 = arith.constant 240 : i32
    %153 = tpu.dynamic_rotate %95 by %c240_i32_133 dim 1 : vector<16x256xf32>, i32 -> vector<16x256xf32>
    %c7_134 = arith.constant 7 : index
    %c0_135 = arith.constant 0 : index
    %c0_136 = arith.constant 0 : index
    %154 = vector.load %arg3[%c7_134, %c0_135, %c0_136] : memref<9x1x256xf32, #tpu.memory_space<vmem>>, vector<1x1x256xf32>
    %155 = vector.shape_cast %154 : vector<1x1x256xf32> to vector<1x256xf32>
    %156 = vector.broadcast %155 : vector<1x256xf32> to vector<16x256xf32>
    %157 = arith.mulf %153, %156 : vector<16x256xf32>
    %c0_137 = arith.constant 0 : index
    %c7_138 = arith.constant 7 : index
    %c0_139 = arith.constant 0 : index
    %c0_140 = arith.constant 0 : index
    %158 = vector.load %arg8[%c0_137, %c7_138, %c0_139, %c0_140] : memref<2x9x16x16xf32, #tpu.memory_space<vmem>>, vector<1x1x16x16xf32>
    %159 = vector.shape_cast %158 : vector<1x1x16x16xf32> to vector<16x16xf32>
    %cst_141 = arith.constant dense<0.000000e+00> : vector<16x256xf32>
    %160 = tpu.matmul %159, %157, %cst_141 {dimension_numbers = #tpu.dot_dimension_numbers<[1], [0], [0], [1], [0, 0, 1, 1], [], []>} : vector<16x16xf32>, vector<16x256xf32>, vector<16x256xf32> -> vector<16x256xf32>
    %161 = arith.addf %152, %160 : vector<16x256xf32>
    %c239_i32_142 = arith.constant 239 : i32
    %162 = tpu.dynamic_rotate %95 by %c239_i32_142 dim 1 : vector<16x256xf32>, i32 -> vector<16x256xf32>
    %c8_143 = arith.constant 8 : index
    %c0_144 = arith.constant 0 : index
    %c0_145 = arith.constant 0 : index
    %163 = vector.load %arg3[%c8_143, %c0_144, %c0_145] : memref<9x1x256xf32, #tpu.memory_space<vmem>>, vector<1x1x256xf32>
    %164 = vector.shape_cast %163 : vector<1x1x256xf32> to vector<1x256xf32>
    %165 = vector.broadcast %164 : vector<1x256xf32> to vector<16x256xf32>
    %166 = arith.mulf %162, %165 : vector<16x256xf32>
    %c0_146 = arith.constant 0 : index
    %c8_147 = arith.constant 8 : index
    %c0_148 = arith.constant 0 : index
    %c0_149 = arith.constant 0 : index
    %167 = vector.load %arg8[%c0_146, %c8_147, %c0_148, %c0_149] : memref<2x9x16x16xf32, #tpu.memory_space<vmem>>, vector<1x1x16x16xf32>
    %168 = vector.shape_cast %167 : vector<1x1x16x16xf32> to vector<16x16xf32>
    %cst_150 = arith.constant dense<0.000000e+00> : vector<16x256xf32>
    %169 = tpu.matmul %168, %166, %cst_150 {dimension_numbers = #tpu.dot_dimension_numbers<[1], [0], [0], [1], [0, 0, 1, 1], [], []>} : vector<16x16xf32>, vector<16x256xf32>, vector<16x256xf32> -> vector<16x256xf32>
    %170 = arith.addf %161, %169 : vector<16x256xf32>
    %c0_151 = arith.constant 0 : index
    %c0_152 = arith.constant 0 : index
    %c0_153 = arith.constant 0 : index
    %171 = vector.load %arg9[%c0_151, %c0_152, %c0_153] : memref<2x16x1xf32, #tpu.memory_space<vmem>>, vector<1x16x1xf32>
    %172 = vector.shape_cast %171 : vector<1x16x1xf32> to vector<16x1xf32>
    %173 = vector.broadcast %172 : vector<16x1xf32> to vector<16x256xf32>
    %174 = arith.addf %170, %173 : vector<16x256xf32>
    %175 = arith.addf %11, %174 : vector<16x256xf32>
    %c17_i32_154 = arith.constant 17 : i32
    %176 = tpu.dynamic_rotate %175 by %c17_i32_154 dim 1 : vector<16x256xf32>, i32 -> vector<16x256xf32>
    %c0_155 = arith.constant 0 : index
    %c0_156 = arith.constant 0 : index
    %c0_157 = arith.constant 0 : index
    %177 = vector.load %arg3[%c0_155, %c0_156, %c0_157] : memref<9x1x256xf32, #tpu.memory_space<vmem>>, vector<1x1x256xf32>
    %178 = vector.shape_cast %177 : vector<1x1x256xf32> to vector<1x256xf32>
    %179 = vector.broadcast %178 : vector<1x256xf32> to vector<16x256xf32>
    %180 = arith.mulf %176, %179 : vector<16x256xf32>
    %c1_158 = arith.constant 1 : index
    %c0_159 = arith.constant 0 : index
    %c0_160 = arith.constant 0 : index
    %c0_161 = arith.constant 0 : index
    %181 = vector.load %arg6[%c1_158, %c0_159, %c0_160, %c0_161] : memref<2x9x16x16xf32, #tpu.memory_space<vmem>>, vector<1x1x16x16xf32>
    %182 = vector.shape_cast %181 : vector<1x1x16x16xf32> to vector<16x16xf32>
    %cst_162 = arith.constant dense<0.000000e+00> : vector<16x256xf32>
    %183 = tpu.matmul %182, %180, %cst_162 {dimension_numbers = #tpu.dot_dimension_numbers<[1], [0], [0], [1], [0, 0, 1, 1], [], []>} : vector<16x16xf32>, vector<16x256xf32>, vector<16x256xf32> -> vector<16x256xf32>
    %c16_i32_163 = arith.constant 16 : i32
    %184 = tpu.dynamic_rotate %175 by %c16_i32_163 dim 1 : vector<16x256xf32>, i32 -> vector<16x256xf32>
    %c1_164 = arith.constant 1 : index
    %c0_165 = arith.constant 0 : index
    %c0_166 = arith.constant 0 : index
    %185 = vector.load %arg3[%c1_164, %c0_165, %c0_166] : memref<9x1x256xf32, #tpu.memory_space<vmem>>, vector<1x1x256xf32>
    %186 = vector.shape_cast %185 : vector<1x1x256xf32> to vector<1x256xf32>
    %187 = vector.broadcast %186 : vector<1x256xf32> to vector<16x256xf32>
    %188 = arith.mulf %184, %187 : vector<16x256xf32>
    %c1_167 = arith.constant 1 : index
    %c1_168 = arith.constant 1 : index
    %c0_169 = arith.constant 0 : index
    %c0_170 = arith.constant 0 : index
    %189 = vector.load %arg6[%c1_167, %c1_168, %c0_169, %c0_170] : memref<2x9x16x16xf32, #tpu.memory_space<vmem>>, vector<1x1x16x16xf32>
    %190 = vector.shape_cast %189 : vector<1x1x16x16xf32> to vector<16x16xf32>
    %cst_171 = arith.constant dense<0.000000e+00> : vector<16x256xf32>
    %191 = tpu.matmul %190, %188, %cst_171 {dimension_numbers = #tpu.dot_dimension_numbers<[1], [0], [0], [1], [0, 0, 1, 1], [], []>} : vector<16x16xf32>, vector<16x256xf32>, vector<16x256xf32> -> vector<16x256xf32>
    %192 = arith.addf %183, %191 : vector<16x256xf32>
    %c15_i32_172 = arith.constant 15 : i32
    %193 = tpu.dynamic_rotate %175 by %c15_i32_172 dim 1 : vector<16x256xf32>, i32 -> vector<16x256xf32>
    %c2_173 = arith.constant 2 : index
    %c0_174 = arith.constant 0 : index
    %c0_175 = arith.constant 0 : index
    %194 = vector.load %arg3[%c2_173, %c0_174, %c0_175] : memref<9x1x256xf32, #tpu.memory_space<vmem>>, vector<1x1x256xf32>
    %195 = vector.shape_cast %194 : vector<1x1x256xf32> to vector<1x256xf32>
    %196 = vector.broadcast %195 : vector<1x256xf32> to vector<16x256xf32>
    %197 = arith.mulf %193, %196 : vector<16x256xf32>
    %c1_176 = arith.constant 1 : index
    %c2_177 = arith.constant 2 : index
    %c0_178 = arith.constant 0 : index
    %c0_179 = arith.constant 0 : index
    %198 = vector.load %arg6[%c1_176, %c2_177, %c0_178, %c0_179] : memref<2x9x16x16xf32, #tpu.memory_space<vmem>>, vector<1x1x16x16xf32>
    %199 = vector.shape_cast %198 : vector<1x1x16x16xf32> to vector<16x16xf32>
    %cst_180 = arith.constant dense<0.000000e+00> : vector<16x256xf32>
    %200 = tpu.matmul %199, %197, %cst_180 {dimension_numbers = #tpu.dot_dimension_numbers<[1], [0], [0], [1], [0, 0, 1, 1], [], []>} : vector<16x16xf32>, vector<16x256xf32>, vector<16x256xf32> -> vector<16x256xf32>
    %201 = arith.addf %192, %200 : vector<16x256xf32>
    %c1_i32_181 = arith.constant 1 : i32
    %202 = tpu.dynamic_rotate %175 by %c1_i32_181 dim 1 : vector<16x256xf32>, i32 -> vector<16x256xf32>
    %c3_182 = arith.constant 3 : index
    %c0_183 = arith.constant 0 : index
    %c0_184 = arith.constant 0 : index
    %203 = vector.load %arg3[%c3_182, %c0_183, %c0_184] : memref<9x1x256xf32, #tpu.memory_space<vmem>>, vector<1x1x256xf32>
    %204 = vector.shape_cast %203 : vector<1x1x256xf32> to vector<1x256xf32>
    %205 = vector.broadcast %204 : vector<1x256xf32> to vector<16x256xf32>
    %206 = arith.mulf %202, %205 : vector<16x256xf32>
    %c1_185 = arith.constant 1 : index
    %c3_186 = arith.constant 3 : index
    %c0_187 = arith.constant 0 : index
    %c0_188 = arith.constant 0 : index
    %207 = vector.load %arg6[%c1_185, %c3_186, %c0_187, %c0_188] : memref<2x9x16x16xf32, #tpu.memory_space<vmem>>, vector<1x1x16x16xf32>
    %208 = vector.shape_cast %207 : vector<1x1x16x16xf32> to vector<16x16xf32>
    %cst_189 = arith.constant dense<0.000000e+00> : vector<16x256xf32>
    %209 = tpu.matmul %208, %206, %cst_189 {dimension_numbers = #tpu.dot_dimension_numbers<[1], [0], [0], [1], [0, 0, 1, 1], [], []>} : vector<16x16xf32>, vector<16x256xf32>, vector<16x256xf32> -> vector<16x256xf32>
    %210 = arith.addf %201, %209 : vector<16x256xf32>
    %c1_190 = arith.constant 1 : index
    %c4_191 = arith.constant 4 : index
    %c0_192 = arith.constant 0 : index
    %c0_193 = arith.constant 0 : index
    %211 = vector.load %arg6[%c1_190, %c4_191, %c0_192, %c0_193] : memref<2x9x16x16xf32, #tpu.memory_space<vmem>>, vector<1x1x16x16xf32>
    %212 = vector.shape_cast %211 : vector<1x1x16x16xf32> to vector<16x16xf32>
    %cst_194 = arith.constant dense<0.000000e+00> : vector<16x256xf32>
    %213 = tpu.matmul %212, %175, %cst_194 {dimension_numbers = #tpu.dot_dimension_numbers<[1], [0], [0], [1], [0, 0, 1, 1], [], []>} : vector<16x16xf32>, vector<16x256xf32>, vector<16x256xf32> -> vector<16x256xf32>
    %214 = arith.addf %210, %213 : vector<16x256xf32>
    %c255_i32_195 = arith.constant 255 : i32
    %215 = tpu.dynamic_rotate %175 by %c255_i32_195 dim 1 : vector<16x256xf32>, i32 -> vector<16x256xf32>
    %c5_196 = arith.constant 5 : index
    %c0_197 = arith.constant 0 : index
    %c0_198 = arith.constant 0 : index
    %216 = vector.load %arg3[%c5_196, %c0_197, %c0_198] : memref<9x1x256xf32, #tpu.memory_space<vmem>>, vector<1x1x256xf32>
    %217 = vector.shape_cast %216 : vector<1x1x256xf32> to vector<1x256xf32>
    %218 = vector.broadcast %217 : vector<1x256xf32> to vector<16x256xf32>
    %219 = arith.mulf %215, %218 : vector<16x256xf32>
    %c1_199 = arith.constant 1 : index
    %c5_200 = arith.constant 5 : index
    %c0_201 = arith.constant 0 : index
    %c0_202 = arith.constant 0 : index
    %220 = vector.load %arg6[%c1_199, %c5_200, %c0_201, %c0_202] : memref<2x9x16x16xf32, #tpu.memory_space<vmem>>, vector<1x1x16x16xf32>
    %221 = vector.shape_cast %220 : vector<1x1x16x16xf32> to vector<16x16xf32>
    %cst_203 = arith.constant dense<0.000000e+00> : vector<16x256xf32>
    %222 = tpu.matmul %221, %219, %cst_203 {dimension_numbers = #tpu.dot_dimension_numbers<[1], [0], [0], [1], [0, 0, 1, 1], [], []>} : vector<16x16xf32>, vector<16x256xf32>, vector<16x256xf32> -> vector<16x256xf32>
    %223 = arith.addf %214, %222 : vector<16x256xf32>
    %c241_i32_204 = arith.constant 241 : i32
    %224 = tpu.dynamic_rotate %175 by %c241_i32_204 dim 1 : vector<16x256xf32>, i32 -> vector<16x256xf32>
    %c6_205 = arith.constant 6 : index
    %c0_206 = arith.constant 0 : index
    %c0_207 = arith.constant 0 : index
    %225 = vector.load %arg3[%c6_205, %c0_206, %c0_207] : memref<9x1x256xf32, #tpu.memory_space<vmem>>, vector<1x1x256xf32>
    %226 = vector.shape_cast %225 : vector<1x1x256xf32> to vector<1x256xf32>
    %227 = vector.broadcast %226 : vector<1x256xf32> to vector<16x256xf32>
    %228 = arith.mulf %224, %227 : vector<16x256xf32>
    %c1_208 = arith.constant 1 : index
    %c6_209 = arith.constant 6 : index
    %c0_210 = arith.constant 0 : index
    %c0_211 = arith.constant 0 : index
    %229 = vector.load %arg6[%c1_208, %c6_209, %c0_210, %c0_211] : memref<2x9x16x16xf32, #tpu.memory_space<vmem>>, vector<1x1x16x16xf32>
    %230 = vector.shape_cast %229 : vector<1x1x16x16xf32> to vector<16x16xf32>
    %cst_212 = arith.constant dense<0.000000e+00> : vector<16x256xf32>
    %231 = tpu.matmul %230, %228, %cst_212 {dimension_numbers = #tpu.dot_dimension_numbers<[1], [0], [0], [1], [0, 0, 1, 1], [], []>} : vector<16x16xf32>, vector<16x256xf32>, vector<16x256xf32> -> vector<16x256xf32>
    %232 = arith.addf %223, %231 : vector<16x256xf32>
    %c240_i32_213 = arith.constant 240 : i32
    %233 = tpu.dynamic_rotate %175 by %c240_i32_213 dim 1 : vector<16x256xf32>, i32 -> vector<16x256xf32>
    %c7_214 = arith.constant 7 : index
    %c0_215 = arith.constant 0 : index
    %c0_216 = arith.constant 0 : index
    %234 = vector.load %arg3[%c7_214, %c0_215, %c0_216] : memref<9x1x256xf32, #tpu.memory_space<vmem>>, vector<1x1x256xf32>
    %235 = vector.shape_cast %234 : vector<1x1x256xf32> to vector<1x256xf32>
    %236 = vector.broadcast %235 : vector<1x256xf32> to vector<16x256xf32>
    %237 = arith.mulf %233, %236 : vector<16x256xf32>
    %c1_217 = arith.constant 1 : index
    %c7_218 = arith.constant 7 : index
    %c0_219 = arith.constant 0 : index
    %c0_220 = arith.constant 0 : index
    %238 = vector.load %arg6[%c1_217, %c7_218, %c0_219, %c0_220] : memref<2x9x16x16xf32, #tpu.memory_space<vmem>>, vector<1x1x16x16xf32>
    %239 = vector.shape_cast %238 : vector<1x1x16x16xf32> to vector<16x16xf32>
    %cst_221 = arith.constant dense<0.000000e+00> : vector<16x256xf32>
    %240 = tpu.matmul %239, %237, %cst_221 {dimension_numbers = #tpu.dot_dimension_numbers<[1], [0], [0], [1], [0, 0, 1, 1], [], []>} : vector<16x16xf32>, vector<16x256xf32>, vector<16x256xf32> -> vector<16x256xf32>
    %241 = arith.addf %232, %240 : vector<16x256xf32>
    %c239_i32_222 = arith.constant 239 : i32
    %242 = tpu.dynamic_rotate %175 by %c239_i32_222 dim 1 : vector<16x256xf32>, i32 -> vector<16x256xf32>
    %c8_223 = arith.constant 8 : index
    %c0_224 = arith.constant 0 : index
    %c0_225 = arith.constant 0 : index
    %243 = vector.load %arg3[%c8_223, %c0_224, %c0_225] : memref<9x1x256xf32, #tpu.memory_space<vmem>>, vector<1x1x256xf32>
    %244 = vector.shape_cast %243 : vector<1x1x256xf32> to vector<1x256xf32>
    %245 = vector.broadcast %244 : vector<1x256xf32> to vector<16x256xf32>
    %246 = arith.mulf %242, %245 : vector<16x256xf32>
    %c1_226 = arith.constant 1 : index
    %c8_227 = arith.constant 8 : index
    %c0_228 = arith.constant 0 : index
    %c0_229 = arith.constant 0 : index
    %247 = vector.load %arg6[%c1_226, %c8_227, %c0_228, %c0_229] : memref<2x9x16x16xf32, #tpu.memory_space<vmem>>, vector<1x1x16x16xf32>
    %248 = vector.shape_cast %247 : vector<1x1x16x16xf32> to vector<16x16xf32>
    %cst_230 = arith.constant dense<0.000000e+00> : vector<16x256xf32>
    %249 = tpu.matmul %248, %246, %cst_230 {dimension_numbers = #tpu.dot_dimension_numbers<[1], [0], [0], [1], [0, 0, 1, 1], [], []>} : vector<16x16xf32>, vector<16x256xf32>, vector<16x256xf32> -> vector<16x256xf32>
    %250 = arith.addf %241, %249 : vector<16x256xf32>
    %c1_231 = arith.constant 1 : index
    %c0_232 = arith.constant 0 : index
    %c0_233 = arith.constant 0 : index
    %251 = vector.load %arg7[%c1_231, %c0_232, %c0_233] : memref<2x16x1xf32, #tpu.memory_space<vmem>>, vector<1x16x1xf32>
    %252 = vector.shape_cast %251 : vector<1x16x1xf32> to vector<16x1xf32>
    %253 = vector.broadcast %252 : vector<16x1xf32> to vector<16x256xf32>
    %254 = arith.addf %250, %253 : vector<16x256xf32>
    %cst_234 = arith.constant 0.000000e+00 : f32
    %255 = vector.broadcast %cst_234 : f32 to vector<16x256xf32>
    %256 = arith.cmpf oge, %254, %255 : vector<16x256xf32>
    %cst_235 = arith.constant 2.000000e-01 : f32
    %257 = vector.broadcast %cst_235 : f32 to vector<16x256xf32>
    %258 = arith.mulf %257, %254 : vector<16x256xf32>
    %259 = arith.select %256, %254, %258 : vector<16x256xi1>, vector<16x256xf32>
    %c17_i32_236 = arith.constant 17 : i32
    %260 = tpu.dynamic_rotate %259 by %c17_i32_236 dim 1 : vector<16x256xf32>, i32 -> vector<16x256xf32>
    %c0_237 = arith.constant 0 : index
    %c0_238 = arith.constant 0 : index
    %c0_239 = arith.constant 0 : index
    %261 = vector.load %arg3[%c0_237, %c0_238, %c0_239] : memref<9x1x256xf32, #tpu.memory_space<vmem>>, vector<1x1x256xf32>
    %262 = vector.shape_cast %261 : vector<1x1x256xf32> to vector<1x256xf32>
    %263 = vector.broadcast %262 : vector<1x256xf32> to vector<16x256xf32>
    %264 = arith.mulf %260, %263 : vector<16x256xf32>
    %c1_240 = arith.constant 1 : index
    %c0_241 = arith.constant 0 : index
    %c0_242 = arith.constant 0 : index
    %c0_243 = arith.constant 0 : index
    %265 = vector.load %arg8[%c1_240, %c0_241, %c0_242, %c0_243] : memref<2x9x16x16xf32, #tpu.memory_space<vmem>>, vector<1x1x16x16xf32>
    %266 = vector.shape_cast %265 : vector<1x1x16x16xf32> to vector<16x16xf32>
    %cst_244 = arith.constant dense<0.000000e+00> : vector<16x256xf32>
    %267 = tpu.matmul %266, %264, %cst_244 {dimension_numbers = #tpu.dot_dimension_numbers<[1], [0], [0], [1], [0, 0, 1, 1], [], []>} : vector<16x16xf32>, vector<16x256xf32>, vector<16x256xf32> -> vector<16x256xf32>
    %c16_i32_245 = arith.constant 16 : i32
    %268 = tpu.dynamic_rotate %259 by %c16_i32_245 dim 1 : vector<16x256xf32>, i32 -> vector<16x256xf32>
    %c1_246 = arith.constant 1 : index
    %c0_247 = arith.constant 0 : index
    %c0_248 = arith.constant 0 : index
    %269 = vector.load %arg3[%c1_246, %c0_247, %c0_248] : memref<9x1x256xf32, #tpu.memory_space<vmem>>, vector<1x1x256xf32>
    %270 = vector.shape_cast %269 : vector<1x1x256xf32> to vector<1x256xf32>
    %271 = vector.broadcast %270 : vector<1x256xf32> to vector<16x256xf32>
    %272 = arith.mulf %268, %271 : vector<16x256xf32>
    %c1_249 = arith.constant 1 : index
    %c1_250 = arith.constant 1 : index
    %c0_251 = arith.constant 0 : index
    %c0_252 = arith.constant 0 : index
    %273 = vector.load %arg8[%c1_249, %c1_250, %c0_251, %c0_252] : memref<2x9x16x16xf32, #tpu.memory_space<vmem>>, vector<1x1x16x16xf32>
    %274 = vector.shape_cast %273 : vector<1x1x16x16xf32> to vector<16x16xf32>
    %cst_253 = arith.constant dense<0.000000e+00> : vector<16x256xf32>
    %275 = tpu.matmul %274, %272, %cst_253 {dimension_numbers = #tpu.dot_dimension_numbers<[1], [0], [0], [1], [0, 0, 1, 1], [], []>} : vector<16x16xf32>, vector<16x256xf32>, vector<16x256xf32> -> vector<16x256xf32>
    %276 = arith.addf %267, %275 : vector<16x256xf32>
    %c15_i32_254 = arith.constant 15 : i32
    %277 = tpu.dynamic_rotate %259 by %c15_i32_254 dim 1 : vector<16x256xf32>, i32 -> vector<16x256xf32>
    %c2_255 = arith.constant 2 : index
    %c0_256 = arith.constant 0 : index
    %c0_257 = arith.constant 0 : index
    %278 = vector.load %arg3[%c2_255, %c0_256, %c0_257] : memref<9x1x256xf32, #tpu.memory_space<vmem>>, vector<1x1x256xf32>
    %279 = vector.shape_cast %278 : vector<1x1x256xf32> to vector<1x256xf32>
    %280 = vector.broadcast %279 : vector<1x256xf32> to vector<16x256xf32>
    %281 = arith.mulf %277, %280 : vector<16x256xf32>
    %c1_258 = arith.constant 1 : index
    %c2_259 = arith.constant 2 : index
    %c0_260 = arith.constant 0 : index
    %c0_261 = arith.constant 0 : index
    %282 = vector.load %arg8[%c1_258, %c2_259, %c0_260, %c0_261] : memref<2x9x16x16xf32, #tpu.memory_space<vmem>>, vector<1x1x16x16xf32>
    %283 = vector.shape_cast %282 : vector<1x1x16x16xf32> to vector<16x16xf32>
    %cst_262 = arith.constant dense<0.000000e+00> : vector<16x256xf32>
    %284 = tpu.matmul %283, %281, %cst_262 {dimension_numbers = #tpu.dot_dimension_numbers<[1], [0], [0], [1], [0, 0, 1, 1], [], []>} : vector<16x16xf32>, vector<16x256xf32>, vector<16x256xf32> -> vector<16x256xf32>
    %285 = arith.addf %276, %284 : vector<16x256xf32>
    %c1_i32_263 = arith.constant 1 : i32
    %286 = tpu.dynamic_rotate %259 by %c1_i32_263 dim 1 : vector<16x256xf32>, i32 -> vector<16x256xf32>
    %c3_264 = arith.constant 3 : index
    %c0_265 = arith.constant 0 : index
    %c0_266 = arith.constant 0 : index
    %287 = vector.load %arg3[%c3_264, %c0_265, %c0_266] : memref<9x1x256xf32, #tpu.memory_space<vmem>>, vector<1x1x256xf32>
    %288 = vector.shape_cast %287 : vector<1x1x256xf32> to vector<1x256xf32>
    %289 = vector.broadcast %288 : vector<1x256xf32> to vector<16x256xf32>
    %290 = arith.mulf %286, %289 : vector<16x256xf32>
    %c1_267 = arith.constant 1 : index
    %c3_268 = arith.constant 3 : index
    %c0_269 = arith.constant 0 : index
    %c0_270 = arith.constant 0 : index
    %291 = vector.load %arg8[%c1_267, %c3_268, %c0_269, %c0_270] : memref<2x9x16x16xf32, #tpu.memory_space<vmem>>, vector<1x1x16x16xf32>
    %292 = vector.shape_cast %291 : vector<1x1x16x16xf32> to vector<16x16xf32>
    %cst_271 = arith.constant dense<0.000000e+00> : vector<16x256xf32>
    %293 = tpu.matmul %292, %290, %cst_271 {dimension_numbers = #tpu.dot_dimension_numbers<[1], [0], [0], [1], [0, 0, 1, 1], [], []>} : vector<16x16xf32>, vector<16x256xf32>, vector<16x256xf32> -> vector<16x256xf32>
    %294 = arith.addf %285, %293 : vector<16x256xf32>
    %c1_272 = arith.constant 1 : index
    %c4_273 = arith.constant 4 : index
    %c0_274 = arith.constant 0 : index
    %c0_275 = arith.constant 0 : index
    %295 = vector.load %arg8[%c1_272, %c4_273, %c0_274, %c0_275] : memref<2x9x16x16xf32, #tpu.memory_space<vmem>>, vector<1x1x16x16xf32>
    %296 = vector.shape_cast %295 : vector<1x1x16x16xf32> to vector<16x16xf32>
    %cst_276 = arith.constant dense<0.000000e+00> : vector<16x256xf32>
    %297 = tpu.matmul %296, %259, %cst_276 {dimension_numbers = #tpu.dot_dimension_numbers<[1], [0], [0], [1], [0, 0, 1, 1], [], []>} : vector<16x16xf32>, vector<16x256xf32>, vector<16x256xf32> -> vector<16x256xf32>
    %298 = arith.addf %294, %297 : vector<16x256xf32>
    %c255_i32_277 = arith.constant 255 : i32
    %299 = tpu.dynamic_rotate %259 by %c255_i32_277 dim 1 : vector<16x256xf32>, i32 -> vector<16x256xf32>
    %c5_278 = arith.constant 5 : index
    %c0_279 = arith.constant 0 : index
    %c0_280 = arith.constant 0 : index
    %300 = vector.load %arg3[%c5_278, %c0_279, %c0_280] : memref<9x1x256xf32, #tpu.memory_space<vmem>>, vector<1x1x256xf32>
    %301 = vector.shape_cast %300 : vector<1x1x256xf32> to vector<1x256xf32>
    %302 = vector.broadcast %301 : vector<1x256xf32> to vector<16x256xf32>
    %303 = arith.mulf %299, %302 : vector<16x256xf32>
    %c1_281 = arith.constant 1 : index
    %c5_282 = arith.constant 5 : index
    %c0_283 = arith.constant 0 : index
    %c0_284 = arith.constant 0 : index
    %304 = vector.load %arg8[%c1_281, %c5_282, %c0_283, %c0_284] : memref<2x9x16x16xf32, #tpu.memory_space<vmem>>, vector<1x1x16x16xf32>
    %305 = vector.shape_cast %304 : vector<1x1x16x16xf32> to vector<16x16xf32>
    %cst_285 = arith.constant dense<0.000000e+00> : vector<16x256xf32>
    %306 = tpu.matmul %305, %303, %cst_285 {dimension_numbers = #tpu.dot_dimension_numbers<[1], [0], [0], [1], [0, 0, 1, 1], [], []>} : vector<16x16xf32>, vector<16x256xf32>, vector<16x256xf32> -> vector<16x256xf32>
    %307 = arith.addf %298, %306 : vector<16x256xf32>
    %c241_i32_286 = arith.constant 241 : i32
    %308 = tpu.dynamic_rotate %259 by %c241_i32_286 dim 1 : vector<16x256xf32>, i32 -> vector<16x256xf32>
    %c6_287 = arith.constant 6 : index
    %c0_288 = arith.constant 0 : index
    %c0_289 = arith.constant 0 : index
    %309 = vector.load %arg3[%c6_287, %c0_288, %c0_289] : memref<9x1x256xf32, #tpu.memory_space<vmem>>, vector<1x1x256xf32>
    %310 = vector.shape_cast %309 : vector<1x1x256xf32> to vector<1x256xf32>
    %311 = vector.broadcast %310 : vector<1x256xf32> to vector<16x256xf32>
    %312 = arith.mulf %308, %311 : vector<16x256xf32>
    %c1_290 = arith.constant 1 : index
    %c6_291 = arith.constant 6 : index
    %c0_292 = arith.constant 0 : index
    %c0_293 = arith.constant 0 : index
    %313 = vector.load %arg8[%c1_290, %c6_291, %c0_292, %c0_293] : memref<2x9x16x16xf32, #tpu.memory_space<vmem>>, vector<1x1x16x16xf32>
    %314 = vector.shape_cast %313 : vector<1x1x16x16xf32> to vector<16x16xf32>
    %cst_294 = arith.constant dense<0.000000e+00> : vector<16x256xf32>
    %315 = tpu.matmul %314, %312, %cst_294 {dimension_numbers = #tpu.dot_dimension_numbers<[1], [0], [0], [1], [0, 0, 1, 1], [], []>} : vector<16x16xf32>, vector<16x256xf32>, vector<16x256xf32> -> vector<16x256xf32>
    %316 = arith.addf %307, %315 : vector<16x256xf32>
    %c240_i32_295 = arith.constant 240 : i32
    %317 = tpu.dynamic_rotate %259 by %c240_i32_295 dim 1 : vector<16x256xf32>, i32 -> vector<16x256xf32>
    %c7_296 = arith.constant 7 : index
    %c0_297 = arith.constant 0 : index
    %c0_298 = arith.constant 0 : index
    %318 = vector.load %arg3[%c7_296, %c0_297, %c0_298] : memref<9x1x256xf32, #tpu.memory_space<vmem>>, vector<1x1x256xf32>
    %319 = vector.shape_cast %318 : vector<1x1x256xf32> to vector<1x256xf32>
    %320 = vector.broadcast %319 : vector<1x256xf32> to vector<16x256xf32>
    %321 = arith.mulf %317, %320 : vector<16x256xf32>
    %c1_299 = arith.constant 1 : index
    %c7_300 = arith.constant 7 : index
    %c0_301 = arith.constant 0 : index
    %c0_302 = arith.constant 0 : index
    %322 = vector.load %arg8[%c1_299, %c7_300, %c0_301, %c0_302] : memref<2x9x16x16xf32, #tpu.memory_space<vmem>>, vector<1x1x16x16xf32>
    %323 = vector.shape_cast %322 : vector<1x1x16x16xf32> to vector<16x16xf32>
    %cst_303 = arith.constant dense<0.000000e+00> : vector<16x256xf32>
    %324 = tpu.matmul %323, %321, %cst_303 {dimension_numbers = #tpu.dot_dimension_numbers<[1], [0], [0], [1], [0, 0, 1, 1], [], []>} : vector<16x16xf32>, vector<16x256xf32>, vector<16x256xf32> -> vector<16x256xf32>
    %325 = arith.addf %316, %324 : vector<16x256xf32>
    %c239_i32_304 = arith.constant 239 : i32
    %326 = tpu.dynamic_rotate %259 by %c239_i32_304 dim 1 : vector<16x256xf32>, i32 -> vector<16x256xf32>
    %c8_305 = arith.constant 8 : index
    %c0_306 = arith.constant 0 : index
    %c0_307 = arith.constant 0 : index
    %327 = vector.load %arg3[%c8_305, %c0_306, %c0_307] : memref<9x1x256xf32, #tpu.memory_space<vmem>>, vector<1x1x256xf32>
    %328 = vector.shape_cast %327 : vector<1x1x256xf32> to vector<1x256xf32>
    %329 = vector.broadcast %328 : vector<1x256xf32> to vector<16x256xf32>
    %330 = arith.mulf %326, %329 : vector<16x256xf32>
    %c1_308 = arith.constant 1 : index
    %c8_309 = arith.constant 8 : index
    %c0_310 = arith.constant 0 : index
    %c0_311 = arith.constant 0 : index
    %331 = vector.load %arg8[%c1_308, %c8_309, %c0_310, %c0_311] : memref<2x9x16x16xf32, #tpu.memory_space<vmem>>, vector<1x1x16x16xf32>
    %332 = vector.shape_cast %331 : vector<1x1x16x16xf32> to vector<16x16xf32>
    %cst_312 = arith.constant dense<0.000000e+00> : vector<16x256xf32>
    %333 = tpu.matmul %332, %330, %cst_312 {dimension_numbers = #tpu.dot_dimension_numbers<[1], [0], [0], [1], [0, 0, 1, 1], [], []>} : vector<16x16xf32>, vector<16x256xf32>, vector<16x256xf32> -> vector<16x256xf32>
    %334 = arith.addf %325, %333 : vector<16x256xf32>
    %c1_313 = arith.constant 1 : index
    %c0_314 = arith.constant 0 : index
    %c0_315 = arith.constant 0 : index
    %335 = vector.load %arg9[%c1_313, %c0_314, %c0_315] : memref<2x16x1xf32, #tpu.memory_space<vmem>>, vector<1x16x1xf32>
    %336 = vector.shape_cast %335 : vector<1x16x1xf32> to vector<16x1xf32>
    %337 = vector.broadcast %336 : vector<16x1xf32> to vector<16x256xf32>
    %338 = arith.addf %334, %337 : vector<16x256xf32>
    %339 = arith.addf %175, %338 : vector<16x256xf32>
    %c0_316 = arith.constant 0 : index
    %c0_317 = arith.constant 0 : index
    %c0_318 = arith.constant 0 : index
    %340 = vector.load %arg2[%c0_316, %c0_317, %c0_318] : memref<1x4x256xf32, #tpu.memory_space<vmem>>, vector<1x4x256xf32>
    %341 = vector.shape_cast %340 : vector<1x4x256xf32> to vector<4x256xf32>
    %cst_319 = arith.constant dense<0xFF800000> : vector<256xf32>
    %342 = vector.multi_reduction <maximumf>, %341, %cst_319 [0] : vector<4x256xf32> to vector<256xf32>
    %343 = vector.shape_cast %342 : vector<256xf32> to vector<1x256xf32>
    %344 = vector.broadcast %343 : vector<1x256xf32> to vector<4x256xf32>
    %345 = arith.subf %341, %344 : vector<4x256xf32>
    %346 = math.exp %345 : vector<4x256xf32>
    %cst_320 = arith.constant dense<0.000000e+00> : vector<256xf32>
    %347 = vector.multi_reduction <add>, %346, %cst_320 [0] : vector<4x256xf32> to vector<256xf32>
    %348 = vector.shape_cast %347 : vector<256xf32> to vector<1x256xf32>
    %349 = tpu.reciprocal %348 {approx = true} : vector<1x256xf32> -> vector<1x256xf32>
    %350 = vector.broadcast %349 : vector<1x256xf32> to vector<4x256xf32>
    %351 = arith.mulf %346, %350 : vector<4x256xf32>
    %c0_321 = arith.constant 0 : index
    %c0_322 = arith.constant 0 : index
    %352 = vector.load %arg10[%c0_321, %c0_322] : memref<16x4xf32, #tpu.memory_space<vmem>>, vector<16x4xf32>
    %cst_323 = arith.constant dense<0.000000e+00> : vector<16x256xf32>
    %353 = tpu.matmul %352, %351, %cst_323 {dimension_numbers = #tpu.dot_dimension_numbers<[1], [0], [0], [1], [0, 0, 1, 1], [], []>} : vector<16x4xf32>, vector<4x256xf32>, vector<16x256xf32> -> vector<16x256xf32>
    %c0_324 = arith.constant 0 : index
    %c0_325 = arith.constant 0 : index
    %354 = vector.load %arg11[%c0_324, %c0_325] : memref<4x16xf32, #tpu.memory_space<vmem>>, vector<4x16xf32>
    %355 = arith.mulf %339, %353 : vector<16x256xf32>
    %cst_326 = arith.constant dense<0.000000e+00> : vector<4x256xf32>
    %356 = tpu.matmul %354, %355, %cst_326 {dimension_numbers = #tpu.dot_dimension_numbers<[1], [0], [0], [1], [0, 0, 1, 1], [], []>} : vector<4x16xf32>, vector<16x256xf32>, vector<4x256xf32> -> vector<4x256xf32>
    %c0_327 = arith.constant 0 : index
    %c0_328 = arith.constant 0 : index
    %c0_329 = arith.constant 0 : index
    %357 = vector.load %arg12[%c0_327, %c0_328, %c0_329] : memref<1x4x256xf32, #tpu.memory_space<vmem>>, vector<1x4x256xf32>
    %358 = vector.shape_cast %357 : vector<1x4x256xf32> to vector<4x256xf32>
    %359 = vector.shape_cast %356 : vector<4x256xf32> to vector<1x4x256xf32>
    tpu.vector_store %arg12[%c0_327, %c0_328, %c0_329], %359 {strides = array<i32>} : memref<1x4x256xf32, #tpu.memory_space<vmem>>, vector<1x4x256xf32>,
    return
  }
  func.func @transform_0(%arg0: i32) -> (i32, i32, i32) {
    %c0_i32 = arith.constant 0 : i32
    %c0_i32_0 = arith.constant 0 : i32
    %c0_i32_1 = arith.constant 0 : i32
    return %arg0, %c0_i32, %c0_i32_0 : i32, i32, i32
  }
  func.func @transform_1(%arg0: i32) -> (i32, i32, i32) {
    %c0_i32 = arith.constant 0 : i32
    %c0_i32_0 = arith.constant 0 : i32
    %c0_i32_1 = arith.constant 0 : i32
    return %arg0, %c0_i32, %c0_i32_0 : i32, i32, i32
  }
  func.func @transform_2(%arg0: i32) -> (i32, i32, i32) {
    %c0_i32 = arith.constant 0 : i32
    %c0_i32_0 = arith.constant 0 : i32
    %c0_i32_1 = arith.constant 0 : i32
    %c0_i32_2 = arith.constant 0 : i32
    return %c0_i32, %c0_i32_0, %c0_i32_1 : i32, i32, i32
  }
  func.func @transform_3(%arg0: i32) -> (i32, i32) {
    %c0_i32 = arith.constant 0 : i32
    %c0_i32_0 = arith.constant 0 : i32
    %c0_i32_1 = arith.constant 0 : i32
    return %c0_i32, %c0_i32_0 : i32, i32
  }
  func.func @transform_4(%arg0: i32) -> (i32, i32) {
    %c0_i32 = arith.constant 0 : i32
    %c0_i32_0 = arith.constant 0 : i32
    %c0_i32_1 = arith.constant 0 : i32
    return %c0_i32, %c0_i32_0 : i32, i32
  }
  func.func @transform_5(%arg0: i32) -> (i32, i32, i32, i32) {
    %c0_i32 = arith.constant 0 : i32
    %c0_i32_0 = arith.constant 0 : i32
    %c0_i32_1 = arith.constant 0 : i32
    %c0_i32_2 = arith.constant 0 : i32
    %c0_i32_3 = arith.constant 0 : i32
    return %c0_i32, %c0_i32_0, %c0_i32_1, %c0_i32_2 : i32, i32, i32, i32
  }
  func.func @transform_6(%arg0: i32) -> (i32, i32, i32) {
    %c0_i32 = arith.constant 0 : i32
    %c0_i32_0 = arith.constant 0 : i32
    %c0_i32_1 = arith.constant 0 : i32
    %c0_i32_2 = arith.constant 0 : i32
    return %c0_i32, %c0_i32_0, %c0_i32_1 : i32, i32, i32
  }
  func.func @transform_7(%arg0: i32) -> (i32, i32, i32, i32) {
    %c0_i32 = arith.constant 0 : i32
    %c0_i32_0 = arith.constant 0 : i32
    %c0_i32_1 = arith.constant 0 : i32
    %c0_i32_2 = arith.constant 0 : i32
    %c0_i32_3 = arith.constant 0 : i32
    return %c0_i32, %c0_i32_0, %c0_i32_1, %c0_i32_2 : i32, i32, i32, i32
  }
  func.func @transform_8(%arg0: i32) -> (i32, i32, i32) {
    %c0_i32 = arith.constant 0 : i32
    %c0_i32_0 = arith.constant 0 : i32
    %c0_i32_1 = arith.constant 0 : i32
    %c0_i32_2 = arith.constant 0 : i32
    return %c0_i32, %c0_i32_0, %c0_i32_1 : i32, i32, i32
  }
  func.func @transform_9(%arg0: i32) -> (i32, i32) {
    %c0_i32 = arith.constant 0 : i32
    %c0_i32_0 = arith.constant 0 : i32
    %c0_i32_1 = arith.constant 0 : i32
    return %c0_i32, %c0_i32_0 : i32, i32
  }
  func.func @transform_10(%arg0: i32) -> (i32, i32) {
    %c0_i32 = arith.constant 0 : i32
    %c0_i32_0 = arith.constant 0 : i32
    %c0_i32_1 = arith.constant 0 : i32
    return %c0_i32, %c0_i32_0 : i32, i32
  }
  func.func @transform_11(%arg0: i32) -> (i32, i32, i32) {
    %c0_i32 = arith.constant 0 : i32
    %c0_i32_0 = arith.constant 0 : i32
    %c0_i32_1 = arith.constant 0 : i32
    return %arg0, %c0_i32, %c0_i32_0 : i32, i32, i32
  }
}

</mosaic_0001>

<bundles_post_ra>
// kernel: tpu_custom_call.1
= control target key start
LH: loop header
LB: loop body
LE: loop exit
PB: predicated region body
PF: predicated region fallthrough
CT: control target
= control target key end

     0   :  { %16 = vsyncpa [#allocation3], 0  ;;  %s5181_s0 = inlined_call_operand.vmem [shape: f32[2,4,256], index: 0, kind: input, shape index: {}]   ;;  %s5182_s1 = inlined_call_operand.vmem [shape: f32[2,4,256], index: 1, kind: input, shape index: {}]   ;;  %s5183_s2 = inlined_call_operand.vmem [shape: f32[9,1,256], index: 2, kind: input, shape index: {}]   ;;  %s5184_s3 = inlined_call_operand.vmem [shape: f32[16,4], index: 3, kind: input, shape index: {}]   ;;  %s5185_s4 = inlined_call_operand.vmem [shape: f32[16,1], index: 4, kind: input, shape index: {}]   ;;  %s5186_s5 = inlined_call_operand.hbm [shape: f32[2,9,16,16], index: 5, kind: input, shape index: {}]   ;;  %s5187_s6 = inlined_call_operand.vmem [shape: f32[2,16,1], index: 6, kind: input, shape index: {}]   ;;  %s5188_s7 = inlined_call_operand.hbm [shape: f32[2,9,16,16], index: 7, kind: input, shape index: {}]   ;;  %s5189_s8 = inlined_call_operand.vmem [shape: f32[2,16,1], index: 8, kind: input, shape index: {}]   ;;  %s5190_s9 = inlined_call_operand.vmem [shape: f32[16,4], index: 9, kind: input, shape index: {}]   ;;  %s5191_s10 = inlined_call_operand.vmem [shape: f32[4,16], index: 10, kind: input, shape index: {}]   ;;  %s5192_s11 = inlined_call_operand.hbm [shape: f32[2,4,256], index: 11, kind: output, shape index: {}]  }
   0x1   :  { %17 = vsyncpa [#allocation6], 0 }
   0x2   :  { %18 = vsyncpa [#allocation4], 0 }
   0x3   :  { %20 = vsyncpa [#allocation4 + $0x1], 0  ;;  %s4052_s17 = smov 0   ;;  %s4054_s18 = smov 0  }
   0x4   :  { %s4056_s19 = smov 0   ;;  %s4058_s20 = smov 0  }
   0x5 LB: > { %5195 = sst [smem:[#allocation11_spill]] %s3973_s19  ;;  %s4073_s21 = sadd.s32 4294967295, %s3977_s20   ;;  %s3977_s20 = sphi %s4058_s20, %s5206_s20   ;;  %s3973_s19 = sphi %s4056_s19, %s5203_s19   ;;  %s3969_s18 = sphi %s4054_s18, %s5205_s18   ;;  %s3965_s17 = sphi %s4052_s17, %s5204_s17  }
   0x6   : > { %s3577_s22 = sadd.s32 4294967294, %s3977_s20   ;;  %s4077_s23 = sadd.s32 1, %s3977_s20  }
   0x7   : > { %s274_s24 = sadd.s32 1, %s3973_s19  ;;  %s271_s25 = ssub.s32 %s3977_s20, %s4077_s23 }
   0x8   : > { %p284_p0 = scmp.ne.s32.totalorder %s3973_s19, %s3969_s18  ;;  %p272_p1 = scmp.eq.s32.totalorder %s271_s25, 0 }
   0x9   : > { %p285_p2 = scmp.eq.s32.totalorder %s4073_s21, 1  ;;  %p290_p3 = scmp.ne.s32.totalorder %s3969_s18, %s3965_s17 }
   0xa   : > { %p291_p4 = scmp.eq.s32.totalorder %s3577_s22, 1  ;;  %p3578_p7 = scmp.ge.s32.totalorder %s3977_s20, 1 }
   0xb   : > { %s4088_s26 = scalar_select %p272_p1, %s3973_s19, %s274_s24  }
   0xc   : > { %p4090_p5 = por %p285_p2, %p284_p0  ;;  %p4094_p6 = por %p291_p4, %p290_p3 }
   0xd   : > { %5196 = sst [smem:[#allocation12_spill]] %s4088_s26  ;;  %p298_p8 = scmp.lt.s32.totalorder %s3977_s20, 3 }
   0xe   : > { %p3788_p9 = scmp.eq.s32.totalorder %s4073_s21, 0  ;;  %s318_s13 = sshll.u32 %s5186_s5, 4  ;;  %s319_s13 = int_to_ptr.hbm [resolvable:$true] %s318_s13 }
   0xf   : > { %p4101_p10 = pnand %p3578_p7, %p298_p8  ;;  %s3979_s14 = smov [#allocation2]  }
  0x10   : > { %s320_s15 = sshll.u32 %s3979_s14, 4  ;;  %s335_s24 = sshll.u32 %s5188_s7, 4  ;;  %s321_s15 = int_to_ptr.vmem [resolvable:$true] %s320_s15  ;;  %s336_s24 = int_to_ptr.hbm [resolvable:$true] %s335_s24 }
  0x11   : > { %p3777_p11 = pneg %p4101_p10  ;;  %s3980_s25 = smov 128  }
  0x12   : > { %s3981_s26 = smov 8   ;;  %s3982_s19 = smov [#allocation5]  }
  0x13   : > { %p3778_p12 = pnand %p3788_p9, %p3777_p11  ;;  %s337_s30 = sshll.u32 %s3982_s19, 4  ;;  %s338_s30 = int_to_ptr.vmem [resolvable:$true] %s337_s30 }
  0x14   : > { %378 = sbr.rel (%p4101_p10) target bundleno = 1663 (0x67f), region = 64 }
  0x15   : > { %3780 = dma.hbm_to_vmem [thread:$0]  (!%p3778_p12), %s319_s13, 4608, %s321_s15, [#allocation3], %s3980_s25, %s3980_s25, %s3981_s26  }
  0x16   : > { %3783 = dma.hbm_to_vmem [thread:$0]  (!%p3778_p12), %s336_s24, 4608, %s338_s30, [#allocation6], %s3980_s25, %s3980_s25, %s3981_s26  }
  0x19   : > { %3952 = dma.done.wait (%p3788_p9), [#allocation3], 4608  }
  0x1a   : > { %3954 = vsyncadd (%p3788_p9), [#allocation3], 4294962688 }
  0x1b   : > { %3956 = dma.done.wait (%p3788_p9), [#allocation6], 4608  }
  0x1c   : > { %3958 = vsyncadd (%p3788_p9), [#allocation6], 4294962688  ;;  %p429_p13 = scmp.lt.s32.totalorder %s4073_s21, 1  ;;  %v3983_v0 = vmov 0   ;;  %v443_v2 = vld [vmem:[%s5185_s4 + $0x8] sm:$0xff]  ;;  %vm465_vm0 = vcmask 1043456  }
  0x1d   : > { %3838 = vset.pattern.permute.xlu0 %v3983_v0  ;;  %3839 = vset.pattern.permute.xlu1 %v3983_v0  ;;  %v439_v4 = vld [vmem:[%s5184_s3] sm:$0xff]  ;;  %vm458_vm1 = vcmask 31744   ;;  %v440_v8 = vld [vmem:[%s5184_s3 + $0x8] sm:$0xff]  ;;  %s3985_s14 = smov 16   ;;  %s3986_s15 = smov 17   ;;  %vm582_vm7 = vcmask 130048  }
  0x1e   : > { %s430_s19 = scalar_select %p429_p13, %s4073_s21, 1  ;;  %3840 = vset.pattern.permute.xlu2 %v3983_v0  ;;  %451 = vperm.xlu0 %3838, %v443_v2   ;;  %v442_v5 = vld [vmem:[%s5185_s4] sm:$0xff] }
  0x1f   : > { %s3987_s16 = smov 113   ;;  %s3988_s22 = smov 1  }
  0x20   : > { %s3764_s26 = sshll.u32 %s430_s19, 3  ;;  %s3990_s25 = smov 111  }
  0x21   : > { %s433_s13 = scalar_lea.vmem %s5181_s0, %s3764_s26  ;;  %s438_s24 = scalar_lea.vmem %s5182_s1, %s3764_s26 }
  0x22   : > { %v441_v1 = vld [vmem:[%s433_s13] sm:$0xff]  ;;  %s3984_s13 = smov 15   ;;  %s3991_s30 = smov 112  }
  0x23   : > { %455 = vst [vmem:[#allocation1] ss:$2 sm:$0xff] %v441_v1  ;;  %v3294_v3 = vld [vmem:[%s438_s24] sm:$0xff]  ;;  %s3989_s24 = smov 127   ;;  %s426_s26 = sand.u32 1, %s3969_s18  }
  0x24   : > { %s3585_s12 = sshll.u32 %s426_s26, 3 }
  0x26   : > { %446 = vperm.xlu0 %3838, %v442_v5  }
  0x2a   : > { %v456_v6 = vld.sshfl [vmem:[#allocation1] sm:$0xff pattern:$0x75316420]  ;;  %v457_v7 = vld.sshfl [vmem:[#allocation1 + $0x8] sm:$0xff pattern:$0x75316420] }
  0x2b   : > { %3590 = vmatpush.msk.msra.mxu0 %vm465_vm0, %v456_v6  ;;  %3593 = vmatpush.msk.msra.mxu1 %vm465_vm0, %v457_v7  ;;  %3296 = vst [vmem:[#allocation1] ss:$2 sm:$0xff] %v3294_v3 }
  0x2c   : > { %3591 = vmatmul.msk.f32.vlgmr.msra.gmra.mxu0 %vm458_vm1, %v439_v4  ;;  %3594 = vmatmul.msk.f32.vlgmr.msra.gmra.mxu1 %vm458_vm1, %v439_v4 }
  0x32   : > { %v3297_v9 = vld.sshfl [vmem:[#allocation1] sm:$0xff pattern:$0x75316420]  ;;  %v3298_v10 = vld.sshfl [vmem:[#allocation1 + $0x8] sm:$0xff pattern:$0x75316420] }
  0x33   : > { %v3301_v11 = vsel %vm465_vm0, %v3297_v9, -inf  ;;  %v3308_v12 = vsel %vm465_vm0, %v3298_v10, -inf  ;;  %v536_v10 = vlaneseq }
  0x34   : > { %v3302_v13 = vrot.slane %v3301_v11, 4  ;;  %v3309_v14 = vrot.slane %v3308_v12, 4  ;;  %3592 = vmatmul.msk.f32.gmra.mxu0 %vm458_vm1, %v440_v8  ;;  %3595 = vmatmul.msk.f32.gmra.mxu1 %vm458_vm1, %v440_v8 }
  0x36   : > { %v3303_v15 = vmax.f32 %v3301_v11, %v3302_v13  ;;  %v3310_v16 = vmax.f32 %v3308_v12, %v3309_v14  ;;  %v4233_v13 = vand.u32 127, %v536_v10  ;;  %v3596_v14 = vld [vmem:[%s5183_s2 + $0x2] sm:$0x3]  ;;  %v713_v10 = vld [vmem:[#allocation2 + $0x28] sm:$0xff] }
  0x38   : > { %v3304_v17 = vrot.slane %v3303_v15, 2  ;;  %v3311_v18 = vrot.slane %v3310_v16, 2  ;;  %vm563_vm6 = vcmp.lt.s32.totalorder %v4233_v13, 16  ;;  %vm695_vm8 = vcmp.lt.s32.totalorder %v4233_v13, 15 }
  0x39   : > { %vm538_vm9 = vcmp.lt.s32.totalorder %v4233_v13, 17  ;;  %vm778_vm10 = vcmp.lt.s32.totalorder %v4233_v13, 1  ;;  %vm1003_vm11 = vcmp.lt.s32.totalorder %v4233_v13, 113  ;;  %vm1169_vm12 = vcmp.lt.s32.totalorder %v4233_v13, 111 }
  0x3a   : > { %v3305_v19 = vmax.f32 %v3303_v15, %v3304_v17  ;;  %v3312_v20 = vmax.f32 %v3310_v16, %v3311_v18  ;;  %v4241_v18 = vperm.slane %v3596_v14, 0  ;;  %vm920_vm13 = vcmp.lt.s32.totalorder %v4233_v13, 127 }
  0x3b   : > { %vm1086_vm14 = vcmp.lt.s32.totalorder %v4233_v13, 112  ;;  %v3216_v13 = vld [vmem:[#allocation5 + $0x118] sm:$0xff] }
  0x3c   : > { %v3306_v21 = vrot.slane %v3305_v19, 1  ;;  %v3313_v22 = vrot.slane %v3312_v20, 1 }
  0x3e   : > { %v3307_v23 = vmax.f32 %v3305_v19, %v3306_v21  ;;  %v3314_v24 = vmax.f32 %v3312_v20, %v3313_v22  ;;  %v4243_v19 = vperm.slane %v3596_v14, 1 }
  0x40   : > { %v3317_v25 = vrot.slane %v3314_v24, 4 }
  0x42   : > { %v3318_v26 = vsel %vm465_vm0, %v3307_v23, %v3317_v25 }
  0x43   : > { %v3320_v27 = vsub.f32 %v3294_v3, %v3318_v26 }
  0x45   : > { %v3321_v28 = vmul.f32 1.442695, %v3320_v27 }
  0x47   : > { %3841 = vpow2.f32 %v3321_v28  ;;  %v580_v28 = vld [vmem:[#allocation2 + $0x10] sm:$0xff] }
  0x4d   : > { %v3842_v29 = vpop.eup %3841 }
  0x4e   : > { %3324 = vst [vmem:[#allocation1] ss:$2 sm:$0xff] %v3842_v29 }
  0x55   : > { %v3325_v30 = vld.sshfl [vmem:[#allocation1] sm:$0xff pattern:$0x75316420]  ;;  %v3326_v31 = vld.sshfl [vmem:[#allocation1 + $0x8] sm:$0xff pattern:$0x75316420] }
  0x56   : > { %v3329_v32 = vsel %vm465_vm0, %v3325_v30, 0.0  ;;  %v3336_v33 = vsel %vm465_vm0, %v3326_v31, 0.0 }
  0x57   : > { %v3330_v34 = vrot.slane %v3329_v32, 4  ;;  %v3337_v35 = vrot.slane %v3336_v33, 4 }
  0x59   : > { %v3331_v36 = vadd.f32 %v3330_v34, %v3329_v32  ;;  %v3338_v37 = vadd.f32 %v3337_v35, %v3336_v33  ;;  %v581_v32 = vld [vmem:[#allocation2 + $0x18] sm:$0xff] }
  0x5a   : > { %v3605_v33 = vld [vmem:[%s5183_s2 + $0x4] sm:$0x3] }
  0x5b   : > { %v3332_v38 = vrot.slane %v3331_v36, 2  ;;  %v3339_v39 = vrot.slane %v3338_v37, 2  ;;  %v4267_v35 = vperm.slane %v3605_v33, 0 }
  0x5d   : > { %v3333_v40 = vadd.f32 %v3332_v38, %v3331_v36  ;;  %v3340_v41 = vadd.f32 %v3339_v39, %v3338_v37  ;;  %v4269_v36 = vperm.slane %v3605_v33, 1 }
  0x5f   : > { %v3334_v42 = vrot.slane %v3333_v40, 1  ;;  %v3341_v43 = vrot.slane %v3340_v41, 1 }
  0x61   : > { %v3335_v44 = vadd.f32 %v3334_v42, %v3333_v40  ;;  %v3342_v45 = vadd.f32 %v3341_v43, %v3340_v41 }
  0x63   : > { %3843 = vrcp.f32 %v3335_v44 }
  0x64   : > { %3845 = vrcp.f32 %v3342_v45 }
  0x69   : > { %v3844_v46 = vpop.eup %3843 }
  0x6a   : > { %v3846_v47 = vpop.eup %3845 }
  0x6b   : > { %v3347_v48 = vrot.slane %v3846_v47, 4  ;;  %v712_v47 = vld [vmem:[#allocation2 + $0x20] sm:$0xff] }
  0x6d   : > { %v3348_v49 = vsel %vm465_vm0, %v3844_v46, %v3347_v48  ;;  %v543_v48 = vld [vmem:[%s5183_s2] sm:$0x3] }
  0x6e   : > { %v3350_v50 = vmul.f32 %v3842_v29, %v3348_v49  ;;  %v3610_v49 = vld [vmem:[%s5183_s2 + $0x6] sm:$0x3] }
  0x70   : > { %3354 = vst [vmem:[#allocation1] ss:$2 sm:$0xff] %v3350_v50 }
  0x90   : > { %v452_v51 = vpop.permute.xlu0 %451 }
  0x98   : > { %v447_v52 = vpop.permute.xlu0 %446 }
  0xa9   : > { %v487_v53 = vpop.f32.mrf.mxu0  ;;  %v510_v54 = vpop.f32.mrf.mxu1 }
  0xaa   : > { %v488_v55 = vadd.f32 %v487_v53, %v447_v52  ;;  %v511_v56 = vadd.f32 %v510_v54, %v447_v52  ;;  %v4300_v52 = vperm.slane %v543_v48, 0  ;;  %v4302_v53 = vperm.slane %v543_v48, 1  ;;  %v3619_v48 = vld [vmem:[%s5183_s2 + $0xa] sm:$0x3] }
  0xac   : > { %vm516_vm2 = vcmp.ge.f32.partialorder %v488_v55, 0.0  ;;  %v520_v57 = vmul.f32 0.2, %v488_v55  ;;  %vm517_vm3 = vcmp.ge.f32.partialorder %v511_v56, 0.0  ;;  %v521_v58 = vmul.f32 0.2, %v511_v56 }
  0xae   : > { %v4157_v59 = vsel %vm516_vm2, %v488_v55, %v520_v57  ;;  %v4159_v60 = vsel %vm517_vm3, %v511_v56, %v521_v58  ;;  %v4315_v57 = vperm.slane %v3610_v49, 0  ;;  %v4317_v58 = vperm.slane %v3610_v49, 1 }
  0xaf   : > { %691 = vrot.lane.b32.xlu0 %v4159_v60, %s3984_s13  ;;  %555 = vrot.lane.b32.xlu2 %v4157_v59, %s3985_s14 }
  0xb1   : > { %v490_v61 = vpop.f32.mrf.mxu0  ;;  %v513_v63 = vpop.f32.mrf.mxu1 }
  0xb2   : > { %v491_v62 = vadd.f32 %v490_v61, %v452_v51  ;;  %v514_v2 = vadd.f32 %v513_v63, %v452_v51 }
  0xb4   : > { %vm518_vm4 = vcmp.ge.f32.partialorder %v491_v62, 0.0  ;;  %v522_v0 = vmul.f32 0.2, %v491_v62  ;;  %v523_v3 = vmul.f32 0.2, %v514_v2  ;;  %vm519_vm5 = vcmp.ge.f32.partialorder %v514_v2, 0.0 }
  0xb6   : > { %v4165_v1 = vsel %vm518_vm4, %v491_v62, %v522_v0  ;;  %v4173_v4 = vsel %vm519_vm5, %v514_v2, %v523_v3 }
  0xb7   : > { %557 = vrot.lane.b32.xlu1 %v4165_v1, %s3985_s14  ;;  %528 = vrot.lane.b32.xlu0 %v4157_v59, %s3986_s15 }
  0xb8   : > { %559 = vrot.lane.b32.xlu2 %v4159_v60, %s3985_s14 }
  0xbf   : > { %561 = vrot.lane.b32.xlu1 %v4173_v4, %s3985_s14  ;;  %689 = vrot.lane.b32.xlu0 %v4165_v1, %s3984_s13 }
  0xc0   : > { %687 = vrot.lane.b32.xlu2 %v4157_v59, %s3984_s13 }
  0xc7   : > { %532 = vrot.lane.b32.xlu1 %v4159_v60, %s3986_s15  ;;  %999 = vrot.lane.b32.xlu0 %v4159_v60, %s3987_s16 }
  0xc8   : > { %534 = vrot.lane.b32.xlu2 %v4173_v4, %s3986_s15 }
  0xcf   : > { %693 = vrot.lane.b32.xlu1 %v4173_v4, %s3984_s13  ;;  %776 = vrot.lane.b32.xlu0 %v4173_v4, %s3988_s22 }
  0xd0   : > { %774 = vrot.lane.b32.xlu2 %v4159_v60, %s3988_s22 }
  0xd7   : > { %530 = vrot.lane.b32.xlu1 %v4165_v1, %s3986_s15  ;;  %912 = vrot.lane.b32.xlu0 %v4157_v59, %s3989_s24 }
  0xd8   : > { %772 = vrot.lane.b32.xlu2 %v4165_v1, %s3988_s22 }
  0xdf   : > { %770 = vrot.lane.b32.xlu1 %v4157_v59, %s3988_s22  ;;  %997 = vrot.lane.b32.xlu0 %v4165_v1, %s3987_s16 }
  0xe0   : > { %995 = vrot.lane.b32.xlu2 %v4157_v59, %s3987_s16 }
  0xe7   : > { %916 = vrot.lane.b32.xlu1 %v4159_v60, %s3989_s24  ;;  %1167 = vrot.lane.b32.xlu0 %v4173_v4, %s3990_s25 }
  0xe8   : > { %918 = vrot.lane.b32.xlu2 %v4173_v4, %s3989_s24 }
  0xef   : > { %1001 = vrot.lane.b32.xlu1 %v4173_v4, %s3987_s16  ;;  %1080 = vrot.lane.b32.xlu0 %v4165_v1, %s3991_s30 }
  0xf0   : > { %1165 = vrot.lane.b32.xlu2 %v4159_v60, %s3990_s25 }
  0xf7   : > { %914 = vrot.lane.b32.xlu1 %v4165_v1, %s3989_s24  ;;  %1082 = vrot.lane.b32.xlu0 %v4159_v60, %s3991_s30 }
  0xf8   : > { %1163 = vrot.lane.b32.xlu2 %v4165_v1, %s3990_s25 }
  0xff   : > { %1161 = vrot.lane.b32.xlu1 %v4157_v59, %s3990_s25 }
 0x100   : > { %1078 = vrot.lane.b32.xlu2 %v4157_v59, %s3991_s30 }
 0x107   : > { %1084 = vrot.lane.b32.xlu1 %v4173_v4, %s3991_s30 }
 0x109   : > { %v556_v5 = vpop.permute.xlu2 %555 }
 0x112   : > { %v560_v6 = vpop.permute.xlu2 %559 }
 0x113   : > { %v564_v20 = vsel %vm563_vm6, %v556_v5, %v560_v6  ;;  %v566_v21 = vsel %vm563_vm6, %v560_v6, %v556_v5  ;;  %v553_v6 = vld [vmem:[#allocation2] sm:$0xff] }
 0x114   : > { %v575_v26 = vmul.f32 %v4241_v18, %v566_v21  ;;  %v576_v27 = vmul.f32 %v4243_v19, %v564_v20  ;;  %v554_v20 = vld [vmem:[#allocation2 + $0x8] sm:$0xff] }
 0x11a   : > { %v688_v7 = vpop.permute.xlu2 %687 }
 0x121   : > { %v692_v8 = vpop.permute.xlu0 %691 }
 0x122   : > { %v4229_v9 = vpop.permute.xlu2 %534  ;;  %v696_v37 = vsel %vm695_vm8, %v688_v7, %v692_v8  ;;  %v698_v38 = vsel %vm695_vm8, %v692_v8, %v688_v7 }
 0x123   : > { %v707_v45 = vmul.f32 %v4267_v35, %v698_v38  ;;  %v708_v46 = vmul.f32 %v4269_v36, %v696_v37 }
 0x129   : > { %v558_v11 = vpop.permute.xlu1 %557  ;;  %v4231_v12 = vpop.permute.xlu0 %528 }
 0x12a   : > { %v4239_v15 = vpop.permute.xlu2 %774 }
 0x131   : > { %v562_v16 = vpop.permute.xlu1 %561  ;;  %v690_v17 = vpop.permute.xlu0 %689 }
 0x132   : > { %v567_v22 = vsel %vm563_vm6, %v562_v16, %v558_v11  ;;  %v565_v23 = vsel %vm563_vm6, %v558_v11, %v562_v16  ;;  %v773_v31 = vpop.permute.xlu2 %772 }
 0x133   : > { %v577_v24 = vmul.f32 %v4241_v18, %v567_v22  ;;  %v578_v25 = vmul.f32 %v4243_v19, %v565_v23  ;;  %v854_v22 = vld [vmem:[#allocation2 + $0x40] sm:$0xff] }
 0x135   : > { %603 = vmatpush.msra.mxu2 %v577_v24  ;;  %626 = vmatpush.msra.mxu3 %v578_v25  ;;  %v795_v24 = vld [vmem:[#allocation2 + $0x30] sm:$0xff]  ;;  %v3624_v25 = vld [vmem:[%s5183_s2 + $0xc] sm:$0x3] }
 0x137   : > { %604 = vmatpush.msra.mxu2 %v575_v26  ;;  %627 = vmatpush.msra.mxu3 %v576_v27  ;;  %v855_v26 = vld [vmem:[#allocation2 + $0x48] sm:$0xff] }
 0x138   : > { %3597 = vmatmul.msk.f32.vlgmr.msra.gmra.mxu2 %vm582_vm7, %v580_v28  ;;  %3599 = vmatmul.msk.f32.vlgmr.msra.gmra.mxu3 %vm582_vm7, %v580_v28  ;;  %v3634_v27 = vld [vmem:[%s5183_s2 + $0x10] sm:$0x3]  ;;  %v4360_v28 = vperm.slane %v3624_v25, 0 }
 0x139   : > { %v533_v29 = vpop.permute.xlu1 %532  ;;  %v4259_v30 = vpop.permute.xlu0 %999 }
 0x13a   : > { %v4281_v44 = vpop.permute.xlu2 %995  ;;  %v539_v50 = vsel %vm538_vm9, %v4231_v12, %v533_v29  ;;  %v541_v54 = vsel %vm538_vm9, %v533_v29, %v4231_v12  ;;  %v4362_v29 = vperm.slane %v3624_v25, 1 }
 0x13b   : > { %v549_v3 = vmul.f32 %v4300_v52, %v541_v54  ;;  %v550_v5 = vmul.f32 %v4302_v53, %v539_v50  ;;  %v1004_v33 = vsel %vm1003_vm11, %v4281_v44, %v4259_v30  ;;  %v4399_v54 = vperm.slane %v3619_v48, 0 }
 0x140   : > { %3598 = vmatmul.msk.f32.gmra.mxu2 %vm582_vm7, %v581_v32  ;;  %3600 = vmatmul.msk.f32.gmra.mxu3 %vm582_vm7, %v581_v32 }
 0x141   : > { %v694_v34 = vpop.permute.xlu1 %693  ;;  %v777_v41 = vpop.permute.xlu0 %776 }
 0x142   : > { %v697_v39 = vsel %vm695_vm8, %v690_v17, %v694_v34  ;;  %v699_v40 = vsel %vm695_vm8, %v694_v34, %v690_v17  ;;  %v780_v63 = vsel %vm778_vm10, %v773_v31, %v777_v41  ;;  %v782_v0 = vsel %vm778_vm10, %v777_v41, %v773_v31 }
 0x143   : > { %v709_v42 = vmul.f32 %v4267_v35, %v699_v40  ;;  %v710_v43 = vmul.f32 %v4269_v36, %v697_v39  ;;  %v792_v7 = vmul.f32 %v4315_v57, %v782_v0  ;;  %v793_v8 = vmul.f32 %v4317_v58, %v780_v63 }
 0x144   : > { %v1006_v34 = vsel %vm1003_vm11, %v4259_v30, %v4281_v44  ;;  %v4378_v40 = vperm.slane %v3634_v27, 0  ;;  %v4380_v41 = vperm.slane %v3634_v27, 1 }
 0x145   : > { %734 = vmatpush.msrb.mxu2 %v709_v42  ;;  %757 = vmatpush.msrb.mxu3 %v710_v43 }
 0x147   : > { %735 = vmatpush.msrb.mxu2 %v707_v45  ;;  %758 = vmatpush.msrb.mxu3 %v708_v46  ;;  %v1015_v45 = vmul.f32 %v4360_v28, %v1004_v33  ;;  %v1016_v46 = vmul.f32 %v4362_v29, %v1006_v34 }
 0x148   : > { %3606 = vmatmul.msk.f32.vlgmr.msrb.gmra.mxu2 %vm582_vm7, %v712_v47  ;;  %3608 = vmatmul.msk.f32.vlgmr.msrb.gmra.mxu3 %vm582_vm7, %v712_v47  ;;  %v796_v47 = vld [vmem:[#allocation2 + $0x38] sm:$0xff] }
 0x149   : > { %876 = vmatpush.msra.mxu2 %v4165_v1  ;;  %899 = vmatpush.msra.mxu3 %v4173_v4  ;;  %v531_v51 = vpop.permute.xlu1 %530  ;;  %v4325_v2 = vpop.permute.xlu0 %912 }
 0x14a   : > { %v540_v55 = vsel %vm538_vm9, %v531_v51, %v4229_v9  ;;  %v542_v56 = vsel %vm538_vm9, %v4229_v9, %v531_v51  ;;  %v4331_v9 = vpop.permute.xlu2 %918  ;;  %v1020_v51 = vld [vmem:[#allocation2 + $0x60] sm:$0xff] }
 0x14b   : > { %877 = vmatpush.msra.mxu2 %v4157_v59  ;;  %900 = vmatpush.msra.mxu3 %v4159_v60  ;;  %v551_v61 = vmul.f32 %v4300_v52, %v542_v56  ;;  %v552_v62 = vmul.f32 %v4302_v53, %v540_v55  ;;  %v4401_v55 = vperm.slane %v3619_v48, 1 }
 0x14d   : > { %655 = vmatpush.msrb.mxu0 %v551_v61  ;;  %678 = vmatpush.msrb.mxu1 %v552_v62  ;;  %v1245_v61 = vld [vmem:[%s5187_s6 + $0x8] sm:$0xff]  ;;  %v1244_v62 = vld [vmem:[%s5187_s6] sm:$0xff] }
 0x14e   : > { %1253 = vperm.xlu1 %3839, %v1245_v61   ;;  %1248 = vperm.xlu2 %3840, %v1244_v62  }
 0x14f   : > { %656 = vmatpush.msrb.mxu0 %v549_v3  ;;  %679 = vmatpush.msrb.mxu1 %v550_v5 }
 0x150   : > { %3601 = vmatmul.msk.f32.vlgmr.msrb.gmra.mxu0 %vm582_vm7, %v553_v6  ;;  %3603 = vmatmul.msk.f32.vlgmr.msrb.gmra.mxu1 %vm582_vm7, %v553_v6 }
 0x151   : > { %817 = vmatpush.msra.mxu0 %v792_v7  ;;  %840 = vmatpush.msra.mxu1 %v793_v8  ;;  %v771_v11 = vpop.permute.xlu1 %770  ;;  %v998_v21 = vpop.permute.xlu0 %997 }
 0x152   : > { %v779_v12 = vsel %vm778_vm10, %v771_v11, %v4239_v15  ;;  %v781_v14 = vsel %vm778_vm10, %v4239_v15, %v771_v11  ;;  %3607 = vmatmul.msk.f32.gmra.mxu2 %vm582_vm7, %v713_v10  ;;  %3609 = vmatmul.msk.f32.gmra.mxu3 %vm582_vm7, %v713_v10  ;;  %v4347_v23 = vpop.permute.xlu2 %1165  ;;  %v937_v11 = vld [vmem:[#allocation2 + $0x50] sm:$0xff] }
 0x153   : > { %v790_v16 = vmul.f32 %v4315_v57, %v781_v14  ;;  %v791_v17 = vmul.f32 %v4317_v58, %v779_v12 }
 0x155   : > { %818 = vmatpush.msra.mxu0 %v790_v16  ;;  %841 = vmatpush.msra.mxu1 %v791_v17 }
 0x158   : > { %3602 = vmatmul.msk.f32.gmra.mxu0 %vm582_vm7, %v554_v20  ;;  %3604 = vmatmul.msk.f32.gmra.mxu1 %vm582_vm7, %v554_v20 }
 0x159   : > { %v917_v15 = vpop.permute.xlu1 %916  ;;  %v1168_v31 = vpop.permute.xlu0 %1167 }
 0x15a   : > { %3615 = vmatmul.msk.f32.vlgmr.msra.gmra.mxu2 %vm582_vm7, %v854_v22  ;;  %3617 = vmatmul.msk.f32.vlgmr.msra.gmra.mxu3 %vm582_vm7, %v854_v22  ;;  %v1164_v39 = vpop.permute.xlu2 %1163  ;;  %v921_v63 = vsel %vm920_vm13, %v4325_v2, %v917_v15  ;;  %v923_v0 = vsel %vm920_vm13, %v917_v15, %v4325_v2  ;;  %v3629_v22 = vld [vmem:[%s5183_s2 + $0xe] sm:$0x3] }
 0x15b   : > { %v1171_v30 = vsel %vm1169_vm12, %v1164_v39, %v1168_v31  ;;  %v1173_v44 = vsel %vm1169_vm12, %v1168_v31, %v1164_v39  ;;  %v932_v2 = vmul.f32 %v4399_v54, %v921_v63  ;;  %v933_v8 = vmul.f32 %v4401_v55, %v923_v0 }
 0x15c   : > { %v1183_v49 = vmul.f32 %v4378_v40, %v1171_v30  ;;  %v1184_v50 = vmul.f32 %v4380_v41, %v1173_v44  ;;  %v4445_v25 = vperm.slane %v3629_v22, 0  ;;  %v1187_v30 = vld [vmem:[#allocation2 + $0x88] sm:$0xff]  ;;  %v1104_v44 = vld [vmem:[#allocation2 + $0x78] sm:$0xff] }
 0x160   : > { %3611 = vmatmul.msk.f32.vlgmr.msra.gmra.mxu0 %vm582_vm7, %v795_v24  ;;  %3613 = vmatmul.msk.f32.vlgmr.msra.gmra.mxu1 %vm582_vm7, %v795_v24  ;;  %v1186_v24 = vld [vmem:[#allocation2 + $0x80] sm:$0xff] }
 0x161   : > { %v1002_v32 = vpop.permute.xlu1 %1001  ;;  %v1081_v10 = vpop.permute.xlu0 %1080 }
 0x162   : > { %v1005_v37 = vsel %vm1003_vm11, %v998_v21, %v1002_v32  ;;  %v1007_v38 = vsel %vm1003_vm11, %v1002_v32, %v998_v21  ;;  %3616 = vmatmul.msk.f32.gmra.mxu2 %vm582_vm7, %v855_v26  ;;  %3618 = vmatmul.msk.f32.gmra.mxu3 %vm582_vm7, %v855_v26  ;;  %v938_v21 = vld [vmem:[#allocation2 + $0x58] sm:$0xff]  ;;  %v4447_v26 = vperm.slane %v3629_v22, 1 }
 0x163   : > { %v1017_v42 = vmul.f32 %v4360_v28, %v1005_v37  ;;  %v1018_v43 = vmul.f32 %v4362_v29, %v1007_v38 }
 0x165   : > { %1042 = vmatpush.msrb.mxu2 %v1017_v42  ;;  %1065 = vmatpush.msrb.mxu3 %v1018_v43  ;;  %v1103_v43 = vld [vmem:[#allocation2 + $0x70] sm:$0xff] }
 0x167   : > { %1043 = vmatpush.msrb.mxu2 %v1015_v45  ;;  %1066 = vmatpush.msrb.mxu3 %v1016_v46 }
 0x168   : > { %3612 = vmatmul.msk.f32.gmra.mxu0 %vm582_vm7, %v796_v47  ;;  %3614 = vmatmul.msk.f32.gmra.mxu1 %vm582_vm7, %v796_v47 }
 0x169   : > { %1208 = vmatpush.msra.mxu2 %v1183_v49  ;;  %1231 = vmatpush.msra.mxu3 %v1184_v50  ;;  %v915_v56 = vpop.permute.xlu1 %914  ;;  %v1083_v15 = vpop.permute.xlu0 %1082 }
 0x16a   : > { %v922_v3 = vsel %vm920_vm13, %v915_v56, %v4331_v9  ;;  %v924_v5 = vsel %vm920_vm13, %v4331_v9, %v915_v56  ;;  %3625 = vmatmul.msk.f32.vlgmr.msrb.gmra.mxu2 %vm582_vm7, %v1020_v51  ;;  %3627 = vmatmul.msk.f32.vlgmr.msrb.gmra.mxu3 %vm582_vm7, %v1020_v51  ;;  %v1021_v9 = vld [vmem:[#allocation2 + $0x68] sm:$0xff] }
 0x16b   : > { %v934_v6 = vmul.f32 %v4399_v54, %v922_v3  ;;  %v935_v7 = vmul.f32 %v4401_v55, %v924_v5 }
 0x16d   : > { %959 = vmatpush.msrb.mxu0 %v934_v6  ;;  %982 = vmatpush.msrb.mxu1 %v935_v7 }
 0x16f   : > { %960 = vmatpush.msrb.mxu0 %v932_v2  ;;  %983 = vmatpush.msrb.mxu1 %v933_v8 }
 0x170   : > { %3620 = vmatmul.msk.f32.vlgmr.msrb.gmra.mxu0 %vm582_vm7, %v937_v11  ;;  %3622 = vmatmul.msk.f32.vlgmr.msrb.gmra.mxu1 %vm582_vm7, %v937_v11 }
 0x171   : > { %v1162_v12 = vpop.permute.xlu1 %1161 }
 0x172   : > { %v1170_v14 = vsel %vm1169_vm12, %v1162_v12, %v4347_v23  ;;  %v1172_v16 = vsel %vm1169_vm12, %v4347_v23, %v1162_v12  ;;  %3626 = vmatmul.msk.f32.gmra.mxu2 %vm582_vm7, %v1021_v9  ;;  %3628 = vmatmul.msk.f32.gmra.mxu3 %vm582_vm7, %v1021_v9  ;;  %v1079_v23 = vpop.permute.xlu2 %1078 }
 0x173   : > { %v1181_v17 = vmul.f32 %v4378_v40, %v1170_v14  ;;  %v1182_v20 = vmul.f32 %v4380_v41, %v1172_v16  ;;  %v1087_v31 = vsel %vm1086_vm14, %v1079_v23, %v1083_v15  ;;  %v1089_v32 = vsel %vm1086_vm14, %v1083_v15, %v1079_v23 }
 0x174   : > { %v1098_v39 = vmul.f32 %v4445_v25, %v1087_v31  ;;  %v1099_v42 = vmul.f32 %v4447_v26, %v1089_v32 }
 0x175   : > { %1209 = vmatpush.msra.mxu2 %v1181_v17  ;;  %1232 = vmatpush.msra.mxu3 %v1182_v20 }
 0x178   : > { %3621 = vmatmul.msk.f32.gmra.mxu0 %vm582_vm7, %v938_v21  ;;  %3623 = vmatmul.msk.f32.gmra.mxu1 %vm582_vm7, %v938_v21 }
 0x179   : > { %v1085_v27 = vpop.permute.xlu1 %1084 }
 0x17a   : > { %v1088_v33 = vsel %vm1086_vm14, %v1081_v10, %v1085_v27  ;;  %v1090_v34 = vsel %vm1086_vm14, %v1085_v27, %v1081_v10  ;;  %3635 = vmatmul.msk.f32.vlgmr.msra.gmra.mxu2 %vm582_vm7, %v1186_v24  ;;  %3637 = vmatmul.msk.f32.vlgmr.msra.gmra.mxu3 %vm582_vm7, %v1186_v24 }
 0x17b   : > { %v1100_v37 = vmul.f32 %v4445_v25, %v1088_v33  ;;  %v1101_v38 = vmul.f32 %v4447_v26, %v1090_v34 }
 0x17d   : > { %1125 = vmatpush.msra.mxu0 %v1100_v37  ;;  %1148 = vmatpush.msra.mxu1 %v1101_v38 }
 0x17f   : > { %1126 = vmatpush.msra.mxu0 %v1098_v39  ;;  %1149 = vmatpush.msra.mxu1 %v1099_v42 }
 0x180   : > { %3630 = vmatmul.msk.f32.vlgmr.msra.gmra.mxu0 %vm582_vm7, %v1103_v43  ;;  %3632 = vmatmul.msk.f32.vlgmr.msra.gmra.mxu1 %vm582_vm7, %v1103_v43 }
 0x182   : > { %3636 = vmatmul.msk.f32.gmra.mxu2 %vm582_vm7, %v1187_v30  ;;  %3638 = vmatmul.msk.f32.gmra.mxu3 %vm582_vm7, %v1187_v30 }
 0x188   : > { %3631 = vmatmul.msk.f32.gmra.mxu0 %vm582_vm7, %v1104_v44  ;;  %3633 = vmatmul.msk.f32.gmra.mxu1 %vm582_vm7, %v1104_v44 }
 0x1bb   : > { %v606_v45 = vpop.f32.mrf.mxu2  ;;  %v629_v46 = vpop.f32.mrf.mxu3 }
 0x1c3   : > { %v609_v47 = vpop.f32.mrf.mxu2  ;;  %v632_v48 = vpop.f32.mrf.mxu3 }
 0x1cb   : > { %v737_v49 = vpop.f32.mrf.mxu2  ;;  %v760_v50 = vpop.f32.mrf.mxu3 }
 0x1cd   : > { %v658_v51 = vpop.f32.mrf.mxu0  ;;  %v681_v56 = vpop.f32.mrf.mxu1 }
 0x1ce   : > { %v659_v9 = vadd.f32 %v658_v51, %v606_v45  ;;  %v682_v12 = vadd.f32 %v681_v56, %v629_v46 }
 0x1d0   : > { %v766_v21 = vadd.f32 %v737_v49, %v659_v9  ;;  %v767_v22 = vadd.f32 %v760_v50, %v682_v12 }
 0x1d5   : > { %v661_v61 = vpop.f32.mrf.mxu0  ;;  %v684_v62 = vpop.f32.mrf.mxu1 }
 0x1d6   : > { %v740_v63 = vpop.f32.mrf.mxu2  ;;  %v763_v0 = vpop.f32.mrf.mxu3  ;;  %v662_v23 = vadd.f32 %v661_v61, %v609_v47  ;;  %v685_v27 = vadd.f32 %v684_v62, %v632_v48 }
 0x1d8   : > { %v768_v39 = vadd.f32 %v740_v63, %v662_v23  ;;  %v769_v42 = vadd.f32 %v763_v0, %v685_v27  ;;  %v1254_v23 = vpop.permute.xlu1 %1253 }
 0x1dd   : > { %v820_v3 = vpop.f32.mrf.mxu0  ;;  %v843_v5 = vpop.f32.mrf.mxu1 }
 0x1de   : > { %v879_v6 = vpop.f32.mrf.mxu2  ;;  %v902_v7 = vpop.f32.mrf.mxu3  ;;  %v849_v15 = vadd.f32 %v820_v3, %v766_v21  ;;  %v850_v24 = vadd.f32 %v843_v5, %v767_v22 }
 0x1e0   : > { %v908_v33 = vadd.f32 %v879_v6, %v849_v15  ;;  %v909_v34 = vadd.f32 %v902_v7, %v850_v24  ;;  %v1249_v7 = vpop.permute.xlu2 %1248 }
 0x1e5   : > { %v823_v2 = vpop.f32.mrf.mxu0  ;;  %v846_v8 = vpop.f32.mrf.mxu1 }
 0x1e6   : > { %v882_v10 = vpop.f32.mrf.mxu2  ;;  %v905_v11 = vpop.f32.mrf.mxu3  ;;  %v851_v44 = vadd.f32 %v823_v2, %v768_v39  ;;  %v852_v45 = vadd.f32 %v846_v8, %v769_v42  ;;  %v1923_v42 = vld [vmem:[%s5189_s8 + $0x8] sm:$0xff] }
 0x1e8   : > { %v910_v49 = vadd.f32 %v882_v10, %v851_v44  ;;  %v911_v50 = vadd.f32 %v905_v11, %v852_v45 }
 0x1ed   : > { %v962_v14 = vpop.f32.mrf.mxu0  ;;  %v985_v16 = vpop.f32.mrf.mxu1 }
 0x1ee   : > { %v1045_v17 = vpop.f32.mrf.mxu2  ;;  %v1068_v20 = vpop.f32.mrf.mxu3  ;;  %v991_v43 = vadd.f32 %v962_v14, %v908_v33  ;;  %v992_v30 = vadd.f32 %v985_v16, %v909_v34 }
 0x1f0   : > { %v1074_v46 = vadd.f32 %v1045_v17, %v991_v43  ;;  %v1075_v51 = vadd.f32 %v1068_v20, %v992_v30  ;;  %v1922_v43 = vld [vmem:[%s5189_s8] sm:$0xff] }
 0x1f5   : > { %v965_v31 = vpop.f32.mrf.mxu0  ;;  %v988_v32 = vpop.f32.mrf.mxu1 }
 0x1f6   : > { %v1048_v37 = vpop.f32.mrf.mxu2  ;;  %v1071_v38 = vpop.f32.mrf.mxu3  ;;  %v993_v5 = vadd.f32 %v965_v31, %v910_v49  ;;  %v994_v6 = vadd.f32 %v988_v32, %v911_v50 }
 0x1f8   : > { %v1076_v14 = vadd.f32 %v1048_v37, %v993_v5  ;;  %v1077_v2 = vadd.f32 %v1071_v38, %v994_v6 }
 0x1fd   : > { %v1128_v56 = vpop.f32.mrf.mxu0  ;;  %v1151_v3 = vpop.f32.mrf.mxu1 }
 0x1fe   : > { %v1157_v47 = vadd.f32 %v1128_v56, %v1074_v46  ;;  %v1158_v48 = vadd.f32 %v1151_v3, %v1075_v51  ;;  %v1211_v61 = vpop.f32.mrf.mxu2  ;;  %v1234_v62 = vpop.f32.mrf.mxu3 }
 0x200   : > { %v1240_v9 = vadd.f32 %v1211_v61, %v1157_v47  ;;  %v1241_v63 = vadd.f32 %v1234_v62, %v1158_v48 }
 0x202   : > { %v1256_v0 = vadd.f32 %v1249_v7, %v1240_v9  ;;  %v1257_v12 = vadd.f32 %v1249_v7, %v1241_v63  ;;  %v1307_v9 = vld [vmem:[#allocation5 + $0x10] sm:$0xff] }
 0x204   : > { %vm1260_vm15 = vcmp.ge.f32.partialorder %v1256_v0, 0.0  ;;  %vm1261_vm2 = vcmp.ge.f32.partialorder %v1257_v12, 0.0  ;;  %v1264_v8 = vmul.f32 0.2, %v1256_v0  ;;  %v1265_v10 = vmul.f32 0.2, %v1257_v12 }
 0x205   : > { %v1131_v11 = vpop.f32.mrf.mxu0  ;;  %v1154_v16 = vpop.f32.mrf.mxu1 }
 0x206   : > { %v4469_v17 = vsel %vm1260_vm15, %v1256_v0, %v1264_v8  ;;  %v4471_v20 = vsel %vm1261_vm2, %v1257_v12, %v1265_v10  ;;  %v1159_v21 = vadd.f32 %v1131_v11, %v1076_v14  ;;  %v1160_v22 = vadd.f32 %v1154_v16, %v1077_v2  ;;  %v1214_v15 = vpop.f32.mrf.mxu2  ;;  %v1237_v24 = vpop.f32.mrf.mxu3 }
 0x207   : > { %1276 = vrot.lane.b32.xlu1 %v4471_v20, %s3986_s15  ;;  %1294 = vrot.lane.b32.xlu0 %v4471_v20, %s3985_s14 }
 0x208   : > { %v1242_v27 = vadd.f32 %v1214_v15, %v1159_v21  ;;  %v1243_v31 = vadd.f32 %v1237_v24, %v1160_v22  ;;  %1290 = vrot.lane.b32.xlu2 %v4469_v17, %s3985_s14  ;;  %v1308_v22 = vld [vmem:[#allocation5 + $0x18] sm:$0xff]  ;;  %v1288_v24 = vld [vmem:[#allocation5] sm:$0xff] }
 0x20a   : > { %v1258_v32 = vadd.f32 %v1254_v23, %v1242_v27  ;;  %v1259_v33 = vadd.f32 %v1254_v23, %v1243_v31 }
 0x20c   : > { %vm1262_vm3 = vcmp.ge.f32.partialorder %v1258_v32, 0.0  ;;  %vm1263_vm4 = vcmp.ge.f32.partialorder %v1259_v33, 0.0  ;;  %v1266_v34 = vmul.f32 0.2, %v1258_v32  ;;  %v1267_v37 = vmul.f32 0.2, %v1259_v33 }
 0x20e   : > { %v4479_v38 = vsel %vm1262_vm3, %v1258_v32, %v1266_v34  ;;  %v4481_v39 = vsel %vm1263_vm4, %v1259_v33, %v1267_v37 }
 0x20f   : > { %1296 = vrot.lane.b32.xlu1 %v4481_v39, %s3985_s14  ;;  %1292 = vrot.lane.b32.xlu0 %v4479_v38, %s3985_s14 }
 0x210   : > { %1417 = vrot.lane.b32.xlu2 %v4471_v20, %s3984_s13 }
 0x217   : > { %1274 = vrot.lane.b32.xlu1 %v4479_v38, %s3986_s15  ;;  %1272 = vrot.lane.b32.xlu0 %v4469_v17, %s3986_s15 }
 0x218   : > { %1278 = vrot.lane.b32.xlu2 %v4481_v39, %s3986_s15 }
 0x21f   : > { %1413 = vrot.lane.b32.xlu1 %v4469_v17, %s3984_s13  ;;  %1419 = vrot.lane.b32.xlu0 %v4481_v39, %s3984_s13 }
 0x220   : > { %1415 = vrot.lane.b32.xlu2 %v4479_v38, %s3984_s13 }
 0x227   : > { %1494 = vrot.lane.b32.xlu1 %v4481_v39, %s3988_s22  ;;  %1490 = vrot.lane.b32.xlu0 %v4479_v38, %s3988_s22 }
 0x228   : > { %1488 = vrot.lane.b32.xlu2 %v4469_v17, %s3988_s22 }
 0x22f   : > { %1626 = vrot.lane.b32.xlu1 %v4471_v20, %s3989_s24  ;;  %1492 = vrot.lane.b32.xlu0 %v4471_v20, %s3988_s22 }
 0x230   : > { %1701 = vrot.lane.b32.xlu2 %v4471_v20, %s3987_s16 }
 0x237   : > { %1624 = vrot.lane.b32.xlu1 %v4479_v38, %s3989_s24  ;;  %1622 = vrot.lane.b32.xlu0 %v4469_v17, %s3989_s24 }
 0x238   : > { %1628 = vrot.lane.b32.xlu2 %v4481_v39, %s3989_s24 }
 0x23f   : > { %1697 = vrot.lane.b32.xlu1 %v4469_v17, %s3987_s16  ;;  %1703 = vrot.lane.b32.xlu0 %v4481_v39, %s3987_s16 }
 0x240   : > { %1699 = vrot.lane.b32.xlu2 %v4479_v38, %s3987_s16 }
 0x247   : > { %1778 = vrot.lane.b32.xlu1 %v4481_v39, %s3991_s30  ;;  %1774 = vrot.lane.b32.xlu0 %v4479_v38, %s3991_s30 }
 0x248   : > { %1772 = vrot.lane.b32.xlu2 %v4469_v17, %s3991_s30 }
 0x24f   : > { %1849 = vrot.lane.b32.xlu1 %v4479_v38, %s3990_s25  ;;  %1776 = vrot.lane.b32.xlu0 %v4471_v20, %s3991_s30 }
 0x250   : > { %1853 = vrot.lane.b32.xlu2 %v4481_v39, %s3990_s25 }
 0x257   : > { %1851 = vrot.lane.b32.xlu1 %v4471_v20, %s3990_s25  ;;  %1847 = vrot.lane.b32.xlu0 %v4469_v17, %s3990_s25 }
 0x258   : > { %1931 = vperm.xlu2 %3840, %v1923_v42  }
 0x25f   : > { %1926 = vperm.xlu0 %3838, %v1922_v43  }
 0x262   : > { %v1291_v30 = vpop.permute.xlu2 %1290 }
 0x26a   : > { %v1418_v44 = vpop.permute.xlu2 %1417 }
 0x272   : > { %v1279_v51 = vpop.permute.xlu2 %1278 }
 0x279   : > { %v1277_v45 = vpop.permute.xlu1 %1276  ;;  %v1295_v46 = vpop.permute.xlu0 %1294 }
 0x27a   : > { %v1298_v56 = vsel %vm563_vm6, %v1291_v30, %v1295_v46  ;;  %v1300_v3 = vsel %vm563_vm6, %v1295_v46, %v1291_v30  ;;  %v1416_v5 = vpop.permute.xlu2 %1415  ;;  %v1289_v46 = vld [vmem:[#allocation5 + $0x8] sm:$0xff] }
 0x27b   : > { %v1302_v6 = vmul.f32 %v1300_v3, %v4241_v18  ;;  %v1303_v7 = vmul.f32 %v1298_v56, %v4243_v19 }
 0x281   : > { %v1297_v49 = vpop.permute.xlu1 %1296  ;;  %v1293_v50 = vpop.permute.xlu0 %1292 }
 0x282   : > { %v1299_v47 = vsel %vm563_vm6, %v1293_v50, %v1297_v49  ;;  %v1301_v48 = vsel %vm563_vm6, %v1297_v49, %v1293_v50  ;;  %v1489_v15 = vpop.permute.xlu2 %1488 }
 0x283   : > { %v1304_v61 = vmul.f32 %v1301_v48, %v4241_v18  ;;  %v1305_v62 = vmul.f32 %v1299_v47, %v4243_v19  ;;  %v1431_v48 = vld [vmem:[#allocation5 + $0x28] sm:$0xff] }
 0x285   : > { %1329 = vmatpush.msrb.mxu0 %v1304_v61  ;;  %1352 = vmatpush.msrb.mxu1 %v1305_v62 }
 0x287   : > { %1330 = vmatpush.msrb.mxu0 %v1302_v6  ;;  %1353 = vmatpush.msrb.mxu1 %v1303_v7  ;;  %v1505_v6 = vld [vmem:[#allocation5 + $0x30] sm:$0xff]  ;;  %v1564_v7 = vld [vmem:[#allocation5 + $0x40] sm:$0xff] }
 0x288   : > { %3639 = vmatmul.msk.f32.vlgmr.msrb.gmra.mxu0 %vm582_vm7, %v1307_v9  ;;  %3641 = vmatmul.msk.f32.vlgmr.msrb.gmra.mxu1 %vm582_vm7, %v1307_v9 }
 0x289   : > { %v1275_v63 = vpop.permute.xlu1 %1274  ;;  %v1273_v0 = vpop.permute.xlu0 %1272 }
 0x28a   : > { %v1281_v12 = vsel %vm538_vm9, %v1275_v63, %v1279_v51  ;;  %v1283_v14 = vsel %vm538_vm9, %v1279_v51, %v1275_v63  ;;  %v1280_v2 = vsel %vm538_vm9, %v1273_v0, %v1277_v45  ;;  %v1282_v8 = vsel %vm538_vm9, %v1277_v45, %v1273_v0  ;;  %v1430_v45 = vld [vmem:[#allocation5 + $0x20] sm:$0xff] }
 0x28b   : > { %v1286_v10 = vmul.f32 %v1283_v14, %v4300_v52  ;;  %v1287_v11 = vmul.f32 %v1281_v12, %v4302_v53  ;;  %v1284_v16 = vmul.f32 %v1282_v8, %v4300_v52  ;;  %v1285_v21 = vmul.f32 %v1280_v2, %v4302_v53 }
 0x28d   : > { %1381 = vmatpush.msrb.mxu2 %v1286_v10  ;;  %1404 = vmatpush.msrb.mxu3 %v1287_v11  ;;  %v1506_v11 = vld [vmem:[#allocation5 + $0x38] sm:$0xff] }
 0x28f   : > { %1382 = vmatpush.msrb.mxu2 %v1284_v16  ;;  %1405 = vmatpush.msrb.mxu3 %v1285_v21 }
 0x290   : > { %3640 = vmatmul.msk.f32.gmra.mxu0 %vm582_vm7, %v1308_v22  ;;  %3642 = vmatmul.msk.f32.gmra.mxu1 %vm582_vm7, %v1308_v22 }
 0x291   : > { %3643 = vmatmul.msk.f32.vlgmr.msrb.gmra.mxu2 %vm582_vm7, %v1288_v24  ;;  %3645 = vmatmul.msk.f32.vlgmr.msrb.gmra.mxu3 %vm582_vm7, %v1288_v24  ;;  %v1414_v23 = vpop.permute.xlu1 %1413  ;;  %v1420_v27 = vpop.permute.xlu0 %1419 }
 0x292   : > { %v1421_v31 = vsel %vm695_vm8, %v1414_v23, %v1418_v44  ;;  %v1423_v32 = vsel %vm695_vm8, %v1418_v44, %v1414_v23  ;;  %v1422_v33 = vsel %vm695_vm8, %v1416_v5, %v1420_v27  ;;  %v1424_v34 = vsel %vm695_vm8, %v1420_v27, %v1416_v5  ;;  %v1702_v44 = vpop.permute.xlu2 %1701 }
 0x293   : > { %v1427_v37 = vmul.f32 %v1424_v34, %v4267_v35  ;;  %v1428_v42 = vmul.f32 %v1422_v33, %v4269_v36  ;;  %v1425_v43 = vmul.f32 %v1423_v32, %v4267_v35  ;;  %v1426_v30 = vmul.f32 %v1421_v31, %v4269_v36 }
 0x295   : > { %1452 = vmatpush.msra.mxu0 %v1427_v37  ;;  %1475 = vmatpush.msra.mxu1 %v1428_v42  ;;  %v1639_v42 = vld [vmem:[#allocation5 + $0x50] sm:$0xff] }
 0x297   : > { %1453 = vmatpush.msra.mxu0 %v1425_v43  ;;  %1476 = vmatpush.msra.mxu1 %v1426_v30 }
 0x298   : > { %3647 = vmatmul.msk.f32.vlgmr.msra.gmra.mxu0 %vm582_vm7, %v1430_v45  ;;  %3649 = vmatmul.msk.f32.vlgmr.msra.gmra.mxu1 %vm582_vm7, %v1430_v45  ;;  %v1714_v45 = vld [vmem:[#allocation5 + $0x60] sm:$0xff] }
 0x299   : > { %3644 = vmatmul.msk.f32.gmra.mxu2 %vm582_vm7, %v1289_v46  ;;  %3646 = vmatmul.msk.f32.gmra.mxu3 %vm582_vm7, %v1289_v46  ;;  %v1495_v51 = vpop.permute.xlu1 %1494  ;;  %v1491_v49 = vpop.permute.xlu0 %1490 }
 0x29a   : > { %1586 = vmatpush.msrb.mxu0 %v4479_v38  ;;  %1609 = vmatpush.msrb.mxu1 %v4481_v39  ;;  %v1497_v50 = vsel %vm778_vm10, %v1491_v49, %v1495_v51  ;;  %v1499_v56 = vsel %vm778_vm10, %v1495_v51, %v1491_v49  ;;  %v1629_v61 = vpop.permute.xlu2 %1628 }
 0x29b   : > { %v1502_v3 = vmul.f32 %v1499_v56, %v4315_v57  ;;  %v1503_v47 = vmul.f32 %v1497_v50, %v4317_v58 }
 0x29c   : > { %1587 = vmatpush.msrb.mxu0 %v4469_v17  ;;  %1610 = vmatpush.msrb.mxu1 %v4471_v20 }
 0x29d   : > { %1527 = vmatpush.msra.mxu2 %v1502_v3  ;;  %1550 = vmatpush.msra.mxu3 %v1503_v47  ;;  %v1640_v47 = vld [vmem:[#allocation5 + $0x58] sm:$0xff] }
 0x2a0   : > { %3648 = vmatmul.msk.f32.gmra.mxu0 %vm582_vm7, %v1431_v48  ;;  %3650 = vmatmul.msk.f32.gmra.mxu1 %vm582_vm7, %v1431_v48  ;;  %v1715_v48 = vld [vmem:[#allocation5 + $0x68] sm:$0xff] }
 0x2a1   : > { %v1627_v38 = vpop.permute.xlu1 %1626  ;;  %v1493_v39 = vpop.permute.xlu0 %1492 }
 0x2a2   : > { %v1496_v62 = vsel %vm778_vm10, %v1489_v15, %v1493_v39  ;;  %v1498_v5 = vsel %vm778_vm10, %v1493_v39, %v1489_v15  ;;  %v1700_v16 = vpop.permute.xlu2 %1699  ;;  %v1565_v15 = vld [vmem:[#allocation5 + $0x48] sm:$0xff] }
 0x2a3   : > { %v1500_v17 = vmul.f32 %v1498_v5, %v4315_v57  ;;  %v1501_v20 = vmul.f32 %v1496_v62, %v4317_v58 }
 0x2a5   : > { %1528 = vmatpush.msra.mxu2 %v1500_v17  ;;  %1551 = vmatpush.msra.mxu3 %v1501_v20 }
 0x2a6   : > { %3651 = vmatmul.msk.f32.vlgmr.msra.gmra.mxu2 %vm582_vm7, %v1505_v6  ;;  %3653 = vmatmul.msk.f32.vlgmr.msra.gmra.mxu3 %vm582_vm7, %v1505_v6 }
 0x2a8   : > { %3655 = vmatmul.msk.f32.vlgmr.msrb.gmra.mxu0 %vm582_vm7, %v1564_v7  ;;  %3657 = vmatmul.msk.f32.vlgmr.msrb.gmra.mxu1 %vm582_vm7, %v1564_v7 }
 0x2a9   : > { %v1625_v9 = vpop.permute.xlu1 %1624  ;;  %v1623_v63 = vpop.permute.xlu0 %1622 }
 0x2aa   : > { %v1631_v0 = vsel %vm920_vm13, %v1625_v9, %v1629_v61  ;;  %v1633_v12 = vsel %vm920_vm13, %v1629_v61, %v1625_v9  ;;  %v1630_v14 = vsel %vm920_vm13, %v1623_v63, %v1627_v38  ;;  %v1632_v2 = vsel %vm920_vm13, %v1627_v38, %v1623_v63  ;;  %v1773_v46 = vpop.permute.xlu2 %1772 }
 0x2ab   : > { %v1636_v8 = vmul.f32 %v1631_v0, %v4399_v54  ;;  %v1637_v10 = vmul.f32 %v1633_v12, %v4401_v55  ;;  %v1634_v21 = vmul.f32 %v1630_v14, %v4399_v54  ;;  %v1635_v22 = vmul.f32 %v1632_v2, %v4401_v55  ;;  %v1789_v0 = vld [vmem:[#allocation5 + $0x70] sm:$0xff] }
 0x2ad   : > { %1661 = vmatpush.msrb.mxu2 %v1636_v8  ;;  %1684 = vmatpush.msrb.mxu3 %v1637_v10 }
 0x2ae   : > { %3652 = vmatmul.msk.f32.gmra.mxu2 %vm582_vm7, %v1506_v11  ;;  %3654 = vmatmul.msk.f32.gmra.mxu3 %vm582_vm7, %v1506_v11 }
 0x2af   : > { %1662 = vmatpush.msrb.mxu2 %v1634_v21  ;;  %1685 = vmatpush.msrb.mxu3 %v1635_v22  ;;  %v1790_v21 = vld [vmem:[#allocation5 + $0x78] sm:$0xff]  ;;  %v1865_v22 = vld [vmem:[#allocation5 + $0x88] sm:$0xff] }
 0x2b0   : > { %3656 = vmatmul.msk.f32.gmra.mxu0 %vm582_vm7, %v1565_v15  ;;  %3658 = vmatmul.msk.f32.gmra.mxu1 %vm582_vm7, %v1565_v15 }
 0x2b1   : > { %v1698_v24 = vpop.permute.xlu1 %1697  ;;  %v1704_v23 = vpop.permute.xlu0 %1703 }
 0x2b2   : > { %v1705_v27 = vsel %vm1003_vm11, %v1698_v24, %v1702_v44  ;;  %v1707_v31 = vsel %vm1003_vm11, %v1702_v44, %v1698_v24  ;;  %v1706_v32 = vsel %vm1003_vm11, %v1700_v16, %v1704_v23  ;;  %v1708_v33 = vsel %vm1003_vm11, %v1704_v23, %v1700_v16  ;;  %v1854_v38 = vpop.permute.xlu2 %1853  ;;  %v1864_v16 = vld [vmem:[#allocation5 + $0x80] sm:$0xff] }
 0x2b3   : > { %v1711_v34 = vmul.f32 %v1706_v32, %v4360_v28  ;;  %v1712_v37 = vmul.f32 %v1708_v33, %v4362_v29  ;;  %v1709_v43 = vmul.f32 %v1705_v27, %v4360_v28  ;;  %v1710_v30 = vmul.f32 %v1707_v31, %v4362_v29 }
 0x2b5   : > { %1736 = vmatpush.msra.mxu0 %v1711_v34  ;;  %1759 = vmatpush.msra.mxu1 %v1712_v37 }
 0x2b6   : > { %3659 = vmatmul.msk.f32.vlgmr.msrb.gmra.mxu2 %vm582_vm7, %v1639_v42  ;;  %3661 = vmatmul.msk.f32.vlgmr.msrb.gmra.mxu3 %vm582_vm7, %v1639_v42 }
 0x2b7   : > { %1737 = vmatpush.msra.mxu0 %v1709_v43  ;;  %1760 = vmatpush.msra.mxu1 %v1710_v30 }
 0x2b8   : > { %3663 = vmatmul.msk.f32.vlgmr.msra.gmra.mxu0 %vm582_vm7, %v1714_v45  ;;  %3665 = vmatmul.msk.f32.vlgmr.msra.gmra.mxu1 %vm582_vm7, %v1714_v45 }
 0x2b9   : > { %v1779_v44 = vpop.permute.xlu1 %1778  ;;  %v1775_v51 = vpop.permute.xlu0 %1774 }
 0x2ba   : > { %v1781_v49 = vsel %vm1086_vm14, %v1775_v51, %v1779_v44  ;;  %v1783_v50 = vsel %vm1086_vm14, %v1779_v44, %v1775_v51 }
 0x2bb   : > { %v1786_v56 = vmul.f32 %v1781_v49, %v4445_v25  ;;  %v1787_v3 = vmul.f32 %v1783_v50, %v4447_v26 }
 0x2bd   : > { %1811 = vmatpush.msra.mxu2 %v1786_v56  ;;  %1834 = vmatpush.msra.mxu3 %v1787_v3 }
 0x2be   : > { %3660 = vmatmul.msk.f32.gmra.mxu2 %vm582_vm7, %v1640_v47  ;;  %3662 = vmatmul.msk.f32.gmra.mxu3 %vm582_vm7, %v1640_v47 }
 0x2c0   : > { %3664 = vmatmul.msk.f32.gmra.mxu0 %vm582_vm7, %v1715_v48  ;;  %3666 = vmatmul.msk.f32.gmra.mxu1 %vm582_vm7, %v1715_v48 }
 0x2c1   : > { %v1850_v39 = vpop.permute.xlu1 %1849  ;;  %v1777_v61 = vpop.permute.xlu0 %1776 }
 0x2c2   : > { %v1856_v62 = vsel %vm1169_vm12, %v1850_v39, %v1854_v38  ;;  %v1858_v5 = vsel %vm1169_vm12, %v1854_v38, %v1850_v39  ;;  %v1780_v17 = vsel %vm1086_vm14, %v1773_v46, %v1777_v61  ;;  %v1782_v20 = vsel %vm1086_vm14, %v1777_v61, %v1773_v46 }
 0x2c3   : > { %v1861_v6 = vmul.f32 %v1856_v62, %v4378_v40  ;;  %v1862_v7 = vmul.f32 %v1858_v5, %v4380_v41  ;;  %v1784_v9 = vmul.f32 %v1780_v17, %v4445_v25  ;;  %v1785_v63 = vmul.f32 %v1782_v20, %v4447_v26 }
 0x2c5   : > { %1812 = vmatpush.msra.mxu2 %v1784_v9  ;;  %1835 = vmatpush.msra.mxu3 %v1785_v63 }
 0x2c6   : > { %1886 = vmatpush.msrb.mxu0 %v1861_v6  ;;  %1909 = vmatpush.msrb.mxu1 %v1862_v7 }
 0x2c7   : > { %3667 = vmatmul.msk.f32.vlgmr.msra.gmra.mxu2 %vm582_vm7, %v1789_v0  ;;  %3669 = vmatmul.msk.f32.vlgmr.msra.gmra.mxu3 %vm582_vm7, %v1789_v0 }
 0x2c9   : > { %v1852_v12 = vpop.permute.xlu1 %1851  ;;  %v1848_v14 = vpop.permute.xlu0 %1847 }
 0x2ca   : > { %v1855_v2 = vsel %vm1169_vm12, %v1848_v14, %v1852_v12  ;;  %v1857_v8 = vsel %vm1169_vm12, %v1852_v12, %v1848_v14 }
 0x2cb   : > { %v1859_v10 = vmul.f32 %v1855_v2, %v4378_v40  ;;  %v1860_v11 = vmul.f32 %v1857_v8, %v4380_v41 }
 0x2cd   : > { %1887 = vmatpush.msrb.mxu0 %v1859_v10  ;;  %1910 = vmatpush.msrb.mxu1 %v1860_v11 }
 0x2ce   : > { %3671 = vmatmul.msk.f32.vlgmr.msrb.gmra.mxu0 %vm582_vm7, %v1864_v16  ;;  %3673 = vmatmul.msk.f32.vlgmr.msrb.gmra.mxu1 %vm582_vm7, %v1864_v16 }
 0x2cf   : > { %3668 = vmatmul.msk.f32.gmra.mxu2 %vm582_vm7, %v1790_v21  ;;  %3670 = vmatmul.msk.f32.gmra.mxu3 %vm582_vm7, %v1790_v21 }
 0x2d6   : > { %3672 = vmatmul.msk.f32.gmra.mxu0 %vm582_vm7, %v1865_v22  ;;  %3674 = vmatmul.msk.f32.gmra.mxu1 %vm582_vm7, %v1865_v22 }
 0x305   : > { %v1332_v15 = vpop.f32.mrf.mxu0  ;;  %v1355_v24 = vpop.f32.mrf.mxu1 }
 0x30d   : > { %v1335_v23 = vpop.f32.mrf.mxu0  ;;  %v1358_v27 = vpop.f32.mrf.mxu1 }
 0x314   : > { %v1384_v33 = vpop.f32.mrf.mxu2  ;;  %v1407_v34 = vpop.f32.mrf.mxu3 }
 0x315   : > { %v1455_v31 = vpop.f32.mrf.mxu0  ;;  %v1478_v32 = vpop.f32.mrf.mxu1  ;;  %v1385_v38 = vadd.f32 %v1384_v33, %v1332_v15  ;;  %v1408_v39 = vadd.f32 %v1407_v34, %v1355_v24 }
 0x317   : > { %v1484_v5 = vadd.f32 %v1455_v31, %v1385_v38  ;;  %v1485_v17 = vadd.f32 %v1478_v32, %v1408_v39 }
 0x31c   : > { %v1387_v43 = vpop.f32.mrf.mxu2  ;;  %v1410_v30 = vpop.f32.mrf.mxu3 }
 0x31d   : > { %v1458_v37 = vpop.f32.mrf.mxu0  ;;  %v1481_v42 = vpop.f32.mrf.mxu1  ;;  %v1388_v63 = vadd.f32 %v1387_v43, %v1335_v23  ;;  %v1411_v0 = vadd.f32 %v1410_v30, %v1358_v27 }
 0x31f   : > { %v1486_v10 = vadd.f32 %v1458_v37, %v1388_v63  ;;  %v1487_v11 = vadd.f32 %v1481_v42, %v1411_v0  ;;  %v1927_v37 = vpop.permute.xlu0 %1926 }
 0x325   : > { %v1589_v45 = vpop.f32.mrf.mxu0  ;;  %v1612_v46 = vpop.f32.mrf.mxu1 }
 0x329   : > { %v1530_v44 = vpop.f32.mrf.mxu2  ;;  %v1553_v51 = vpop.f32.mrf.mxu3 }
 0x32a   : > { %v1559_v20 = vadd.f32 %v1530_v44, %v1484_v5  ;;  %v1560_v6 = vadd.f32 %v1553_v51, %v1485_v17 }
 0x32c   : > { %v1618_v2 = vadd.f32 %v1589_v45, %v1559_v20  ;;  %v1619_v8 = vadd.f32 %v1612_v46, %v1560_v6  ;;  %v1932_v6 = vpop.permute.xlu2 %1931 }
 0x32d   : > { %v1592_v49 = vpop.f32.mrf.mxu0  ;;  %v1615_v50 = vpop.f32.mrf.mxu1 }
 0x331   : > { %v1533_v56 = vpop.f32.mrf.mxu2  ;;  %v1556_v3 = vpop.f32.mrf.mxu3 }
 0x332   : > { %v1561_v22 = vadd.f32 %v1533_v56, %v1486_v10  ;;  %v1562_v15 = vadd.f32 %v1556_v3, %v1487_v11 }
 0x334   : > { %v1620_v34 = vadd.f32 %v1592_v49, %v1561_v22  ;;  %v1621_v44 = vadd.f32 %v1615_v50, %v1562_v15 }
 0x335   : > { %v1739_v47 = vpop.f32.mrf.mxu0  ;;  %v1762_v48 = vpop.f32.mrf.mxu1 }
 0x339   : > { %v1664_v61 = vpop.f32.mrf.mxu2  ;;  %v1687_v62 = vpop.f32.mrf.mxu3 }
 0x33a   : > { %v1693_v16 = vadd.f32 %v1664_v61, %v1618_v2  ;;  %v1694_v21 = vadd.f32 %v1687_v62, %v1619_v8 }
 0x33c   : > { %v1768_v24 = vadd.f32 %v1739_v47, %v1693_v16  ;;  %v1769_v33 = vadd.f32 %v1762_v48, %v1694_v21 }
 0x33d   : > { %v1742_v7 = vpop.f32.mrf.mxu0  ;;  %v1765_v9 = vpop.f32.mrf.mxu1 }
 0x341   : > { %v1667_v12 = vpop.f32.mrf.mxu2  ;;  %v1690_v14 = vpop.f32.mrf.mxu3 }
 0x342   : > { %v1695_v43 = vadd.f32 %v1667_v12, %v1620_v34  ;;  %v1696_v30 = vadd.f32 %v1690_v14, %v1621_v44  ;;  %v1978_v44 = vld [vmem:[#allocation2 + $0xa0] sm:$0xff] }
 0x344   : > { %v1770_v61 = vadd.f32 %v1742_v7, %v1695_v43  ;;  %v1771_v56 = vadd.f32 %v1765_v9, %v1696_v30 }
 0x34a   : > { %v1814_v31 = vpop.f32.mrf.mxu2  ;;  %v1837_v32 = vpop.f32.mrf.mxu3 }
 0x34b   : > { %v1843_v51 = vadd.f32 %v1814_v31, %v1768_v24  ;;  %v1844_v38 = vadd.f32 %v1837_v32, %v1769_v33  ;;  %v1889_v23 = vpop.f32.mrf.mxu0  ;;  %v1912_v27 = vpop.f32.mrf.mxu1 }
 0x34d   : > { %v1918_v45 = vadd.f32 %v1889_v23, %v1843_v51  ;;  %v1919_v46 = vadd.f32 %v1912_v27, %v1844_v38 }
 0x34f   : > { %v1934_v42 = vadd.f32 %v1927_v37, %v1918_v45  ;;  %v1935_v39 = vadd.f32 %v1927_v37, %v1919_v46 }
 0x351   : > { %v4684_v3 = vadd.f32 %v1934_v42, %v4157_v59  ;;  %v4687_v47 = vadd.f32 %v1935_v39, %v4159_v60 }
 0x352   : > { %v1817_v49 = vpop.f32.mrf.mxu2  ;;  %v1840_v50 = vpop.f32.mrf.mxu3 }
 0x353   : > { %5200 = vst [vmem:[#allocation13_spill] sm:$0xff] %v4687_v47  ;;  %v1845_v48 = vadd.f32 %v1817_v49, %v1770_v61  ;;  %v1846_v62 = vadd.f32 %v1840_v50, %v1771_v56  ;;  %2088 = vrot.lane.b32.xlu2 %v4687_v47, %s3984_s13  ;;  %1965 = vrot.lane.b32.xlu1 %v4687_v47, %s3985_s14  ;;  %v1892_v5 = vpop.f32.mrf.mxu0  ;;  %v1915_v17 = vpop.f32.mrf.mxu1  ;;  %v1979_v61 = vld [vmem:[#allocation2 + $0xa8] sm:$0xff] }
 0x354   : > { %1961 = vrot.lane.b32.xlu0 %v4684_v3, %s3985_s14 }
 0x355   : > { %v1920_v59 = vadd.f32 %v1892_v5, %v1845_v48  ;;  %v1921_v20 = vadd.f32 %v1915_v17, %v1846_v62 }
 0x357   : > { %v1936_v60 = vadd.f32 %v1932_v6, %v1920_v59  ;;  %v1937_v7 = vadd.f32 %v1932_v6, %v1921_v20 }
 0x359   : > { %v4696_v9 = vadd.f32 %v1936_v60, %v4165_v1  ;;  %v4699_v63 = vadd.f32 %v1937_v7, %v4173_v4  ;;  %v3712_v1 = vld [vmem:[%s5187_s6 + $0x18] sm:$0xff]  ;;  %v3711_v4 = vld [vmem:[%s5187_s6 + $0x10] sm:$0xff] }
 0x35a   : > { %v1959_v7 = vld [vmem:[#allocation2 + $0x90] sm:$0xff] }
 0x35b   : > { %1967 = vrot.lane.b32.xlu2 %v4699_v63, %s3985_s14  ;;  %1963 = vrot.lane.b32.xlu1 %v4696_v9, %s3985_s14 }
 0x35c   : > { %1946 = vrot.lane.b32.xlu0 %v4687_v47, %s3986_s15 }
 0x363   : > { %1942 = vrot.lane.b32.xlu2 %v4684_v3, %s3986_s15  ;;  %2084 = vrot.lane.b32.xlu1 %v4684_v3, %s3984_s13 }
 0x364   : > { %2090 = vrot.lane.b32.xlu0 %v4699_v63, %s3984_s13 }
 0x36b   : > { %2086 = vrot.lane.b32.xlu2 %v4696_v9, %s3984_s13  ;;  %1948 = vrot.lane.b32.xlu1 %v4699_v63, %s3986_s15 }
 0x36c   : > { %1944 = vrot.lane.b32.xlu0 %v4696_v9, %s3986_s15 }
 0x373   : > { %2372 = vrot.lane.b32.xlu2 %v4687_v47, %s3987_s16  ;;  %2163 = vrot.lane.b32.xlu1 %v4687_v47, %s3988_s22 }
 0x374   : > { %2159 = vrot.lane.b32.xlu0 %v4684_v3, %s3988_s22 }
 0x37b   : > { %2165 = vrot.lane.b32.xlu2 %v4699_v63, %s3988_s22  ;;  %2161 = vrot.lane.b32.xlu1 %v4696_v9, %s3988_s22 }
 0x37c   : > { %2297 = vrot.lane.b32.xlu0 %v4687_v47, %s3989_s24 }
 0x383   : > { %2293 = vrot.lane.b32.xlu2 %v4684_v3, %s3989_s24  ;;  %2368 = vrot.lane.b32.xlu1 %v4684_v3, %s3987_s16 }
 0x384   : > { %2374 = vrot.lane.b32.xlu0 %v4699_v63, %s3987_s16 }
 0x38b   : > { %2370 = vrot.lane.b32.xlu2 %v4696_v9, %s3987_s16  ;;  %2299 = vrot.lane.b32.xlu1 %v4699_v63, %s3989_s24 }
 0x38c   : > { %2295 = vrot.lane.b32.xlu0 %v4696_v9, %s3989_s24 }
 0x393   : > { %2524 = vrot.lane.b32.xlu2 %v4699_v63, %s3990_s25  ;;  %2522 = vrot.lane.b32.xlu1 %v4687_v47, %s3990_s25 }
 0x394   : > { %2518 = vrot.lane.b32.xlu0 %v4684_v3, %s3990_s25 }
 0x39b   : > { %2445 = vrot.lane.b32.xlu2 %v4696_v9, %s3991_s30  ;;  %2520 = vrot.lane.b32.xlu1 %v4696_v9, %s3990_s25 }
 0x39c   : > { %2449 = vrot.lane.b32.xlu0 %v4699_v63, %s3991_s30 }
 0x3a3   : > { %2447 = vrot.lane.b32.xlu2 %v4687_v47, %s3991_s30  ;;  %2443 = vrot.lane.b32.xlu1 %v4684_v3, %s3991_s30 }
 0x3a4   : > { %2603 = vperm.xlu0 %3838, %v3712_v1   ;;  %v2101_v1 = vld [vmem:[#allocation2 + $0xb0] sm:$0xff] }
 0x3ab   : > { %2598 = vperm.xlu1 %3839, %v3711_v4  }
 0x3ad   : > { %v2089_v0 = vpop.permute.xlu2 %2088 }
 0x3b5   : > { %v1968_v12 = vpop.permute.xlu2 %1967 }
 0x3bd   : > { %v1943_v14 = vpop.permute.xlu2 %1942 }
 0x3c5   : > { %v1966_v2 = vpop.permute.xlu1 %1965  ;;  %v2087_v21 = vpop.permute.xlu2 %2086 }
 0x3c6   : > { %v1962_v8 = vpop.permute.xlu0 %1961 }
 0x3c7   : > { %v1969_v11 = vsel %vm563_vm6, %v1962_v8, %v1966_v2  ;;  %v1971_v16 = vsel %vm563_vm6, %v1966_v2, %v1962_v8 }
 0x3c8   : > { %v1973_v32 = vmul.f32 %v1971_v16, %v4241_v18  ;;  %v1974_v34 = vmul.f32 %v1969_v11, %v4243_v19 }
 0x3cd   : > { %v1964_v10 = vpop.permute.xlu1 %1963  ;;  %v4787_v45 = vpop.permute.xlu2 %2372 }
 0x3ce   : > { %v1947_v22 = vpop.permute.xlu0 %1946  ;;  %v1970_v15 = vsel %vm563_vm6, %v1964_v10, %v1968_v12  ;;  %v1972_v24 = vsel %vm563_vm6, %v1968_v12, %v1964_v10  ;;  %v1960_v12 = vld [vmem:[#allocation2 + $0x98] sm:$0xff] }
 0x3cf   : > { %v1975_v33 = vmul.f32 %v1972_v24, %v4241_v18  ;;  %v1976_v31 = vmul.f32 %v1970_v15, %v4243_v19  ;;  %v1950_v50 = vsel %vm538_vm9, %v1943_v14, %v1947_v22  ;;  %v1952_v48 = vsel %vm538_vm9, %v1947_v22, %v1943_v14  ;;  %v2102_v14 = vld [vmem:[#allocation2 + $0xb8] sm:$0xff] }
 0x3d0   : > { %v1954_v20 = vmul.f32 %v1952_v48, %v4300_v52  ;;  %v1955_v6 = vmul.f32 %v1950_v50, %v4302_v53 }
 0x3d1   : > { %2000 = vmatpush.msrb.mxu2 %v1975_v33  ;;  %2023 = vmatpush.msrb.mxu3 %v1976_v31 }
 0x3d3   : > { %2001 = vmatpush.msrb.mxu2 %v1973_v32  ;;  %2024 = vmatpush.msrb.mxu3 %v1974_v34  ;;  %v2176_v32 = vld [vmem:[#allocation2 + $0xc0] sm:$0xff]  ;;  %v2235_v34 = vld [vmem:[#allocation2 + $0xd0] sm:$0xff] }
 0x3d4   : > { %3675 = vmatmul.msk.f32.vlgmr.msrb.gmra.mxu2 %vm582_vm7, %v1978_v44  ;;  %3677 = vmatmul.msk.f32.vlgmr.msrb.gmra.mxu3 %vm582_vm7, %v1978_v44 }
 0x3d5   : > { %v2085_v51 = vpop.permute.xlu1 %2084  ;;  %v2166_v60 = vpop.permute.xlu2 %2165 }
 0x3d6   : > { %v2091_v38 = vpop.permute.xlu0 %2090  ;;  %v2092_v43 = vsel %vm695_vm8, %v2085_v51, %v2089_v0  ;;  %v2094_v30 = vsel %vm695_vm8, %v2089_v0, %v2085_v51 }
 0x3d7   : > { %v2093_v23 = vsel %vm695_vm8, %v2087_v21, %v2091_v38  ;;  %v2095_v27 = vsel %vm695_vm8, %v2091_v38, %v2087_v21  ;;  %v2096_v42 = vmul.f32 %v2094_v30, %v4267_v35  ;;  %v2097_v39 = vmul.f32 %v2092_v43, %v4269_v36 }
 0x3d8   : > { %v2098_v46 = vmul.f32 %v2095_v27, %v4267_v35  ;;  %v2099_v37 = vmul.f32 %v2093_v23, %v4269_v36 }
 0x3da   : > { %2123 = vmatpush.msra.mxu2 %v2098_v46  ;;  %2146 = vmatpush.msra.mxu3 %v2099_v37 }
 0x3dc   : > { %2124 = vmatpush.msra.mxu2 %v2096_v42  ;;  %2147 = vmatpush.msra.mxu3 %v2097_v39 }
 0x3dd   : > { %3676 = vmatmul.msk.f32.gmra.mxu2 %vm582_vm7, %v1979_v61  ;;  %3678 = vmatmul.msk.f32.gmra.mxu3 %vm582_vm7, %v1979_v61  ;;  %v1949_v56 = vpop.permute.xlu1 %1948  ;;  %v2294_v2 = vpop.permute.xlu2 %2293  ;;  %v2177_v61 = vld [vmem:[#allocation2 + $0xc8] sm:$0xff] }
 0x3de   : > { %2257 = vmatpush.msrb.mxu2 %v4696_v9  ;;  %2280 = vmatpush.msrb.mxu3 %v4699_v63  ;;  %v1945_v49 = vpop.permute.xlu0 %1944 }
 0x3df   : > { %v1951_v62 = vsel %vm538_vm9, %v1945_v49, %v1949_v56  ;;  %v1953_v5 = vsel %vm538_vm9, %v1949_v56, %v1945_v49  ;;  %v2236_v56 = vld [vmem:[#allocation2 + $0xd8] sm:$0xff] }
 0x3e0   : > { %v1956_v17 = vmul.f32 %v1953_v5, %v4300_v52  ;;  %v1957_v59 = vmul.f32 %v1951_v62, %v4302_v53  ;;  %2258 = vmatpush.msrb.mxu2 %v4684_v3  ;;  %2281 = vmatpush.msrb.mxu3 %v4687_v47 }
 0x3e2   : > { %2052 = vmatpush.msra.mxu0 %v1956_v17  ;;  %2075 = vmatpush.msra.mxu1 %v1957_v59 }
 0x3e4   : > { %2053 = vmatpush.msra.mxu0 %v1954_v20  ;;  %2076 = vmatpush.msra.mxu1 %v1955_v6 }
 0x3e5   : > { %3679 = vmatmul.msk.f32.vlgmr.msra.gmra.mxu0 %vm582_vm7, %v1959_v7  ;;  %3681 = vmatmul.msk.f32.vlgmr.msra.gmra.mxu1 %vm582_vm7, %v1959_v7  ;;  %v2164_v4 = vpop.permute.xlu1 %2163  ;;  %v2371_v51 = vpop.permute.xlu2 %2370  ;;  %v2310_v7 = vld [vmem:[#allocation2 + $0xe0] sm:$0xff] }
 0x3e6   : > { %3683 = vmatmul.msk.f32.vlgmr.msra.gmra.mxu2 %vm582_vm7, %v2101_v1  ;;  %3685 = vmatmul.msk.f32.vlgmr.msra.gmra.mxu3 %vm582_vm7, %v2101_v1  ;;  %v2160_v0 = vpop.permute.xlu0 %2159  ;;  %v2385_v1 = vld [vmem:[#allocation2 + $0xf0] sm:$0xff] }
 0x3e7   : > { %v2167_v8 = vsel %vm778_vm10, %v2160_v0, %v2164_v4  ;;  %v2169_v11 = vsel %vm778_vm10, %v2164_v4, %v2160_v0 }
 0x3e8   : > { %v2171_v33 = vmul.f32 %v2169_v11, %v4315_v57  ;;  %v2172_v31 = vmul.f32 %v2167_v8, %v4317_v58 }
 0x3ed   : > { %3680 = vmatmul.msk.f32.gmra.mxu0 %vm582_vm7, %v1960_v12  ;;  %3682 = vmatmul.msk.f32.gmra.mxu1 %vm582_vm7, %v1960_v12  ;;  %v2162_v10 = vpop.permute.xlu1 %2161  ;;  %v2525_v20 = vpop.permute.xlu2 %2524  ;;  %v2311_v12 = vld [vmem:[#allocation2 + $0xe8] sm:$0xff] }
 0x3ee   : > { %3684 = vmatmul.msk.f32.gmra.mxu2 %vm582_vm7, %v2102_v14  ;;  %3686 = vmatmul.msk.f32.gmra.mxu3 %vm582_vm7, %v2102_v14  ;;  %v2298_v16 = vpop.permute.xlu0 %2297  ;;  %v2168_v21 = vsel %vm778_vm10, %v2162_v10, %v2166_v60  ;;  %v2170_v22 = vsel %vm778_vm10, %v2166_v60, %v2162_v10 }
 0x3ef   : > { %v2173_v15 = vmul.f32 %v2170_v22, %v4315_v57  ;;  %v2174_v24 = vmul.f32 %v2168_v21, %v4317_v58  ;;  %v2301_v50 = vsel %vm920_vm13, %v2294_v2, %v2298_v16  ;;  %v2303_v48 = vsel %vm920_vm13, %v2298_v16, %v2294_v2  ;;  %v2386_v2 = vld [vmem:[#allocation2 + $0xf8] sm:$0xff] }
 0x3f0   : > { %v2305_v6 = vmul.f32 %v2301_v50, %v4399_v54  ;;  %v2306_v60 = vmul.f32 %v2303_v48, %v4401_v55 }
 0x3f1   : > { %2198 = vmatpush.msrb.mxu0 %v2173_v15  ;;  %2221 = vmatpush.msrb.mxu1 %v2174_v24 }
 0x3f3   : > { %2199 = vmatpush.msrb.mxu0 %v2171_v33  ;;  %2222 = vmatpush.msrb.mxu1 %v2172_v31 }
 0x3f5   : > { %3687 = vmatmul.msk.f32.vlgmr.msrb.gmra.mxu0 %vm582_vm7, %v2176_v32  ;;  %3689 = vmatmul.msk.f32.vlgmr.msrb.gmra.mxu1 %vm582_vm7, %v2176_v32  ;;  %v2369_v44 = vpop.permute.xlu1 %2368  ;;  %v2446_v14 = vpop.permute.xlu2 %2445 }
 0x3f6   : > { %3691 = vmatmul.msk.f32.vlgmr.msrb.gmra.mxu2 %vm582_vm7, %v2235_v34  ;;  %3693 = vmatmul.msk.f32.vlgmr.msrb.gmra.mxu3 %vm582_vm7, %v2235_v34  ;;  %v2375_v38 = vpop.permute.xlu0 %2374  ;;  %v2376_v43 = vsel %vm1003_vm11, %v2369_v44, %v4787_v45  ;;  %v2378_v30 = vsel %vm1003_vm11, %v4787_v45, %v2369_v44 }
 0x3f7   : > { %v2377_v23 = vsel %vm1003_vm11, %v2371_v51, %v2375_v38  ;;  %v2379_v27 = vsel %vm1003_vm11, %v2375_v38, %v2371_v51  ;;  %v2380_v42 = vmul.f32 %v2376_v43, %v4360_v28  ;;  %v2381_v39 = vmul.f32 %v2378_v30, %v4362_v29  ;;  %v2535_v38 = vld [vmem:[#allocation2 + $0x110] sm:$0xff] }
 0x3f8   : > { %v2382_v46 = vmul.f32 %v2377_v23, %v4360_v28  ;;  %v2383_v37 = vmul.f32 %v2379_v27, %v4362_v29 }
 0x3fa   : > { %2407 = vmatpush.msra.mxu2 %v2382_v46  ;;  %2430 = vmatpush.msra.mxu3 %v2383_v37 }
 0x3fc   : > { %2408 = vmatpush.msra.mxu2 %v2380_v42  ;;  %2431 = vmatpush.msra.mxu3 %v2381_v39  ;;  %v2460_v42 = vld [vmem:[#allocation2 + $0x100] sm:$0xff]  ;;  %v2536_v39 = vld [vmem:[#allocation2 + $0x118] sm:$0xff] }
 0x3fd   : > { %3688 = vmatmul.msk.f32.gmra.mxu0 %vm582_vm7, %v2177_v61  ;;  %3690 = vmatmul.msk.f32.gmra.mxu1 %vm582_vm7, %v2177_v61  ;;  %v2300_v49 = vpop.permute.xlu1 %2299  ;;  %v2448_v23 = vpop.permute.xlu2 %2447  ;;  %v2461_v61 = vld [vmem:[#allocation2 + $0x108] sm:$0xff] }
 0x3fe   : > { %3692 = vmatmul.msk.f32.gmra.mxu2 %vm582_vm7, %v2236_v56  ;;  %3694 = vmatmul.msk.f32.gmra.mxu3 %vm582_vm7, %v2236_v56  ;;  %v2296_v45 = vpop.permute.xlu0 %2295 }
 0x3ff   : > { %v2302_v62 = vsel %vm920_vm13, %v2296_v45, %v2300_v49  ;;  %v2304_v5 = vsel %vm920_vm13, %v2300_v49, %v2296_v45 }
 0x400   : > { %v2307_v17 = vmul.f32 %v2302_v62, %v4399_v54  ;;  %v2308_v59 = vmul.f32 %v2304_v5, %v4401_v55 }
 0x402   : > { %2332 = vmatpush.msra.mxu0 %v2307_v17  ;;  %2355 = vmatpush.msra.mxu1 %v2308_v59 }
 0x404   : > { %2333 = vmatpush.msra.mxu0 %v2305_v6  ;;  %2356 = vmatpush.msra.mxu1 %v2306_v60 }
 0x405   : > { %3695 = vmatmul.msk.f32.vlgmr.msra.gmra.mxu0 %vm582_vm7, %v2310_v7  ;;  %3697 = vmatmul.msk.f32.vlgmr.msra.gmra.mxu1 %vm582_vm7, %v2310_v7  ;;  %v2523_v4 = vpop.permute.xlu1 %2522 }
 0x406   : > { %3699 = vmatmul.msk.f32.vlgmr.msra.gmra.mxu2 %vm582_vm7, %v2385_v1  ;;  %3701 = vmatmul.msk.f32.vlgmr.msra.gmra.mxu3 %vm582_vm7, %v2385_v1  ;;  %v2519_v0 = vpop.permute.xlu0 %2518 }
 0x407   : > { %v2526_v8 = vsel %vm1169_vm12, %v2519_v0, %v2523_v4  ;;  %v2528_v11 = vsel %vm1169_vm12, %v2523_v4, %v2519_v0 }
 0x408   : > { %v2530_v44 = vmul.f32 %v2526_v8, %v4378_v40  ;;  %v2531_v51 = vmul.f32 %v2528_v11, %v4380_v41 }
 0x40d   : > { %3696 = vmatmul.msk.f32.gmra.mxu0 %vm582_vm7, %v2311_v12  ;;  %3698 = vmatmul.msk.f32.gmra.mxu1 %vm582_vm7, %v2311_v12  ;;  %v2521_v10 = vpop.permute.xlu1 %2520 }
 0x40e   : > { %3700 = vmatmul.msk.f32.gmra.mxu2 %vm582_vm7, %v2386_v2  ;;  %3702 = vmatmul.msk.f32.gmra.mxu3 %vm582_vm7, %v2386_v2  ;;  %v2450_v16 = vpop.permute.xlu0 %2449  ;;  %v2527_v21 = vsel %vm1169_vm12, %v2521_v10, %v2525_v20  ;;  %v2529_v22 = vsel %vm1169_vm12, %v2525_v20, %v2521_v10 }
 0x40f   : > { %v2452_v15 = vsel %vm1086_vm14, %v2446_v14, %v2450_v16  ;;  %v2454_v24 = vsel %vm1086_vm14, %v2450_v16, %v2446_v14  ;;  %v2532_v33 = vmul.f32 %v2527_v21, %v4378_v40  ;;  %v2533_v31 = vmul.f32 %v2529_v22, %v4380_v41 }
 0x410   : > { %v2457_v32 = vmul.f32 %v2452_v15, %v4445_v25  ;;  %v2458_v34 = vmul.f32 %v2454_v24, %v4447_v26 }
 0x411   : > { %2557 = vmatpush.msrb.mxu2 %v2532_v33  ;;  %2580 = vmatpush.msrb.mxu3 %v2533_v31 }
 0x412   : > { %2482 = vmatpush.msrb.mxu0 %v2457_v32  ;;  %2505 = vmatpush.msrb.mxu1 %v2458_v34 }
 0x413   : > { %2558 = vmatpush.msrb.mxu2 %v2530_v44  ;;  %2581 = vmatpush.msrb.mxu3 %v2531_v51 }
 0x415   : > { %v2444_v27 = vpop.permute.xlu1 %2443 }
 0x416   : > { %v2451_v43 = vsel %vm1086_vm14, %v2444_v27, %v2448_v23  ;;  %v2453_v30 = vsel %vm1086_vm14, %v2448_v23, %v2444_v27  ;;  %3707 = vmatmul.msk.f32.vlgmr.msrb.gmra.mxu2 %vm582_vm7, %v2535_v38  ;;  %3709 = vmatmul.msk.f32.vlgmr.msrb.gmra.mxu3 %vm582_vm7, %v2535_v38 }
 0x417   : > { %v2455_v46 = vmul.f32 %v2451_v43, %v4445_v25  ;;  %v2456_v37 = vmul.f32 %v2453_v30, %v4447_v26 }
 0x419   : > { %2483 = vmatpush.msrb.mxu0 %v2455_v46  ;;  %2506 = vmatpush.msrb.mxu1 %v2456_v37 }
 0x41a   : > { %3703 = vmatmul.msk.f32.vlgmr.msrb.gmra.mxu0 %vm582_vm7, %v2460_v42  ;;  %3705 = vmatmul.msk.f32.vlgmr.msrb.gmra.mxu1 %vm582_vm7, %v2460_v42 }
 0x41e   : > { %3708 = vmatmul.msk.f32.gmra.mxu2 %vm582_vm7, %v2536_v39  ;;  %3710 = vmatmul.msk.f32.gmra.mxu3 %vm582_vm7, %v2536_v39 }
 0x422   : > { %3704 = vmatmul.msk.f32.gmra.mxu0 %vm582_vm7, %v2461_v61  ;;  %3706 = vmatmul.msk.f32.gmra.mxu1 %vm582_vm7, %v2461_v61 }
 0x457   : > { %v2003_v56 = vpop.f32.mrf.mxu2  ;;  %v2026_v49 = vpop.f32.mrf.mxu3 }
 0x460   : > { %v2006_v45 = vpop.f32.mrf.mxu2  ;;  %v2029_v50 = vpop.f32.mrf.mxu3 }
 0x462   : > { %v2055_v48 = vpop.f32.mrf.mxu0  ;;  %v2078_v62 = vpop.f32.mrf.mxu1 }
 0x463   : > { %v2056_v22 = vadd.f32 %v2055_v48, %v2003_v56  ;;  %v2079_v15 = vadd.f32 %v2078_v62, %v2026_v49 }
 0x469   : > { %v2126_v5 = vpop.f32.mrf.mxu2  ;;  %v2149_v17 = vpop.f32.mrf.mxu3 }
 0x46a   : > { %v2058_v59 = vpop.f32.mrf.mxu0  ;;  %v2081_v20 = vpop.f32.mrf.mxu1  ;;  %v2155_v24 = vadd.f32 %v2126_v5, %v2056_v22  ;;  %v2156_v33 = vadd.f32 %v2149_v17, %v2079_v15 }
 0x46b   : > { %v2059_v43 = vadd.f32 %v2058_v59, %v2006_v45  ;;  %v2082_v30 = vadd.f32 %v2081_v20, %v2029_v50  ;;  %v2599_v45 = vpop.permute.xlu1 %2598 }
 0x471   : > { %v2129_v6 = vpop.f32.mrf.mxu2  ;;  %v2152_v60 = vpop.f32.mrf.mxu3 }
 0x472   : > { %v2201_v7 = vpop.f32.mrf.mxu0  ;;  %v2224_v1 = vpop.f32.mrf.mxu1  ;;  %v2157_v42 = vadd.f32 %v2129_v6, %v2059_v43  ;;  %v2158_v39 = vadd.f32 %v2152_v60, %v2082_v30  ;;  %v3750_v30 = vld [vmem:[%s5189_s8 + $0x18] sm:$0xff] }
 0x473   : > { %v2230_v34 = vadd.f32 %v2201_v7, %v2155_v24  ;;  %v2231_v44 = vadd.f32 %v2224_v1, %v2156_v33 }
 0x479   : > { %v2260_v4 = vpop.f32.mrf.mxu2  ;;  %v2283_v0 = vpop.f32.mrf.mxu3 }
 0x47a   : > { %v2204_v12 = vpop.f32.mrf.mxu0  ;;  %v2227_v14 = vpop.f32.mrf.mxu1  ;;  %v2289_v23 = vadd.f32 %v2260_v4, %v2230_v34  ;;  %v2290_v27 = vadd.f32 %v2283_v0, %v2231_v44 }
 0x47b   : > { %v2232_v56 = vadd.f32 %v2204_v12, %v2157_v42  ;;  %v2233_v49 = vadd.f32 %v2227_v14, %v2158_v39  ;;  %v2604_v34 = vpop.permute.xlu0 %2603 }
 0x481   : > { %v2263_v2 = vpop.f32.mrf.mxu2  ;;  %v2286_v8 = vpop.f32.mrf.mxu3 }
 0x482   : > { %v2335_v10 = vpop.f32.mrf.mxu0  ;;  %v2358_v11 = vpop.f32.mrf.mxu1  ;;  %v2291_v7 = vadd.f32 %v2263_v2, %v2232_v56  ;;  %v2292_v1 = vadd.f32 %v2286_v8, %v2233_v49 }
 0x483   : > { %v2364_v46 = vadd.f32 %v2335_v10, %v2289_v23  ;;  %v2365_v37 = vadd.f32 %v2358_v11, %v2290_v27 }
 0x489   : > { %v2410_v16 = vpop.f32.mrf.mxu2  ;;  %v2433_v21 = vpop.f32.mrf.mxu3 }
 0x48a   : > { %v2338_v31 = vpop.f32.mrf.mxu0  ;;  %v2361_v32 = vpop.f32.mrf.mxu1  ;;  %v2439_v61 = vadd.f32 %v2410_v16, %v2364_v46  ;;  %v2440_v47 = vadd.f32 %v2433_v21, %v2365_v37  ;;  %v3749_v46 = vld [vmem:[%s5189_s8 + $0x10] sm:$0xff] }
 0x48b   : > { %v2366_v50 = vadd.f32 %v2338_v31, %v2291_v7  ;;  %v2367_v59 = vadd.f32 %v2361_v32, %v2292_v1 }
 0x491   : > { %v2413_v51 = vpop.f32.mrf.mxu2  ;;  %v2436_v38 = vpop.f32.mrf.mxu3 }
 0x492   : > { %v2441_v60 = vadd.f32 %v2413_v51, %v2366_v50  ;;  %v2442_v10 = vadd.f32 %v2436_v38, %v2367_v59 }
 0x497   : > { %v2485_v48 = vpop.f32.mrf.mxu0  ;;  %v2508_v62 = vpop.f32.mrf.mxu1 }
 0x498   : > { %v2514_v5 = vadd.f32 %v2485_v48, %v2439_v61  ;;  %v2515_v17 = vadd.f32 %v2508_v62, %v2440_v47 }
 0x499   : > { %v2560_v22 = vpop.f32.mrf.mxu2  ;;  %v2583_v15 = vpop.f32.mrf.mxu3 }
 0x49a   : > { %v2589_v4 = vadd.f32 %v2560_v22, %v2514_v5  ;;  %v2590_v0 = vadd.f32 %v2583_v15, %v2515_v17 }
 0x49c   : > { %v2606_v20 = vadd.f32 %v2599_v45, %v2589_v4  ;;  %v2607_v6 = vadd.f32 %v2599_v45, %v2590_v0 }
 0x49e   : > { %vm2610_vm5 = vcmp.ge.f32.partialorder %v2606_v20, 0.0  ;;  %v2614_v12 = vmul.f32 0.2, %v2606_v20  ;;  %vm2611_vm15 = vcmp.ge.f32.partialorder %v2607_v6, 0.0  ;;  %v2615_v14 = vmul.f32 0.2, %v2607_v6 }
 0x49f   : > { %v2488_v11 = vpop.f32.mrf.mxu0  ;;  %v2511_v16 = vpop.f32.mrf.mxu1 }
 0x4a0   : > { %v4905_v47 = vsel %vm2610_vm5, %v2606_v20, %v2614_v12  ;;  %v4907_v2 = vsel %vm2611_vm15, %v2607_v6, %v2615_v14  ;;  %v2516_v8 = vadd.f32 %v2488_v11, %v2441_v60  ;;  %v2517_v21 = vadd.f32 %v2511_v16, %v2442_v10  ;;  %v2639_v60 = vld [vmem:[#allocation5 + $0x90] sm:$0xff] }
 0x4a1   : > { %v2563_v24 = vpop.f32.mrf.mxu2  ;;  %v2586_v33 = vpop.f32.mrf.mxu3  ;;  %2626 = vrot.lane.b32.xlu1 %v4907_v2, %s3986_s15  ;;  %2641 = vrot.lane.b32.xlu2 %v4905_v47, %s3985_s14 }
 0x4a2   : > { %v2591_v31 = vadd.f32 %v2563_v24, %v2516_v8  ;;  %v2592_v32 = vadd.f32 %v2586_v33, %v2517_v21  ;;  %2622 = vrot.lane.b32.xlu0 %v4905_v47, %s3986_s15 }
 0x4a4   : > { %v2608_v44 = vadd.f32 %v2604_v34, %v2591_v31  ;;  %v2609_v51 = vadd.f32 %v2604_v34, %v2592_v32  ;;  %v2658_v31 = vld [vmem:[#allocation5 + $0xa0] sm:$0xff]  ;;  %v2640_v32 = vld [vmem:[#allocation5 + $0x98] sm:$0xff] }
 0x4a6   : > { %vm2612_vm2 = vcmp.ge.f32.partialorder %v2608_v44, 0.0  ;;  %v2616_v38 = vmul.f32 0.2, %v2608_v44  ;;  %vm2613_vm3 = vcmp.ge.f32.partialorder %v2609_v51, 0.0  ;;  %v2617_v23 = vmul.f32 0.2, %v2609_v51 }
 0x4a8   : > { %v4915_v27 = vsel %vm2612_vm2, %v2608_v44, %v2616_v38  ;;  %v4917_v43 = vsel %vm2613_vm3, %v2609_v51, %v2617_v23  ;;  %v2659_v23 = vld [vmem:[#allocation5 + $0xa8] sm:$0xff] }
 0x4a9   : > { %2643 = vrot.lane.b32.xlu1 %v4915_v27, %s3985_s14  ;;  %2624 = vrot.lane.b32.xlu2 %v4915_v27, %s3986_s15 }
 0x4aa   : > { %2628 = vrot.lane.b32.xlu0 %v4917_v43, %s3986_s15 }
 0x4b1   : > { %2766 = vrot.lane.b32.xlu1 %v4915_v27, %s3984_s13  ;;  %2647 = vrot.lane.b32.xlu2 %v4917_v43, %s3985_s14 }
 0x4b2   : > { %2645 = vrot.lane.b32.xlu0 %v4907_v2, %s3985_s14 }
 0x4b9   : > { %2845 = vrot.lane.b32.xlu1 %v4917_v43, %s3988_s22  ;;  %2764 = vrot.lane.b32.xlu2 %v4905_v47, %s3984_s13 }
 0x4ba   : > { %2841 = vrot.lane.b32.xlu0 %v4915_v27, %s3988_s22 }
 0x4c1   : > { %2839 = vrot.lane.b32.xlu1 %v4905_v47, %s3988_s22  ;;  %2770 = vrot.lane.b32.xlu2 %v4917_v43, %s3984_s13 }
 0x4c2   : > { %2768 = vrot.lane.b32.xlu0 %v4907_v2, %s3984_s13  ;;  %s3766_s13 = sshll.u32 %s4073_s21, 3 }
 0x4c9   : > { %2979 = vrot.lane.b32.xlu1 %v4917_v43, %s3989_s24  ;;  %2843 = vrot.lane.b32.xlu2 %v4907_v2, %s3988_s22  ;;  %s428_s22 = scalar_lea.vmem [#allocation7], %s3585_s12 }
 0x4ca   : > { %2975 = vrot.lane.b32.xlu0 %v4915_v27, %s3989_s24 }
 0x4d1   : > { %3050 = vrot.lane.b32.xlu1 %v4915_v27, %s3987_s16  ;;  %2973 = vrot.lane.b32.xlu2 %v4905_v47, %s3989_s24 }
 0x4d2   : > { %2977 = vrot.lane.b32.xlu0 %v4907_v2, %s3989_s24  ;;  %s3481_s24 = sshll.u32 %s428_s22, 4  ;;  %s3482_s24 = int_to_ptr.vmem [resolvable:$true] %s3481_s24 }
 0x4d9   : > { %3129 = vrot.lane.b32.xlu1 %v4917_v43, %s3991_s30  ;;  %3048 = vrot.lane.b32.xlu2 %v4905_v47, %s3987_s16 }
 0x4da   : > { %3125 = vrot.lane.b32.xlu0 %v4915_v27, %s3991_s30 }
 0x4e1   : > { %3123 = vrot.lane.b32.xlu1 %v4905_v47, %s3991_s30  ;;  %3054 = vrot.lane.b32.xlu2 %v4917_v43, %s3987_s16 }
 0x4e2   : > { %3052 = vrot.lane.b32.xlu0 %v4907_v2, %s3987_s16  ;;  %s3479_s16 = scalar_lea.hbm %s5192_s11, %s3766_s13  ;;  %s3927_s13 = scalar_lea.hbm %s5192_s11, 16 }
 0x4e9   : > { %3204 = vrot.lane.b32.xlu1 %v4917_v43, %s3990_s25  ;;  %3127 = vrot.lane.b32.xlu2 %v4907_v2, %s3991_s30  ;;  %s3468_s30 = scalar_lea.sflag [#allocation4], %s426_s26 }
 0x4ea   : > { %3200 = vrot.lane.b32.xlu0 %v4915_v27, %s3990_s25 }
 0x4f1   : > { %3283 = vperm.xlu1 %3839, %v3750_v30   ;;  %3198 = vrot.lane.b32.xlu2 %v4905_v47, %s3990_s25 }
 0x4f2   : > { %3202 = vrot.lane.b32.xlu0 %v4907_v2, %s3990_s25  ;;  %s3483_s25 = sshll.u32 %s3479_s16, 4  ;;  %s3484_s25 = int_to_ptr.hbm [resolvable:$true] %s3483_s25 }
 0x4f3   : > { %s3921_s19 = sshra.s32 %s3484_s25, 4  ;;  %s3922_s19 = int_to_ptr.hbm [resolvable:$true] %s3921_s19 }
 0x4f4   : > { %s3923_s21 = scalar_lea.hbm %s3922_s19, 8  ;;  %p3928_p3 = scmp.lt.s32.totalorder %s3922_s19, %s5192_s11 }
 0x4f5   : > { %p3924_p0 = scmp.ne.s32.totalorder %s3922_s19, %s3923_s21  ;;  %p3929_p4 = scmp.lt.s32.totalorder %s3927_s13, %s3923_s21 }
 0x4f7   : > { %p3925_p1 = pnand %p3924_p0, %p4090_p5  ;;  %p3930_p7 = por %p3929_p4, %p3928_p3 }
 0x4f9   : > { %3278 = vperm.xlu2 %3840, %v3749_v46   ;;  %p3926_p2 = pneg %p3925_p1 }
 0x4fb   : > { %v2642_v37 = vpop.permute.xlu2 %2641  ;;  %p3931_p8 = pnand %p3930_p7, %p3926_p2 }
 0x503   : > { %v2625_v42 = vpop.permute.xlu2 %2624 }
 0x50b   : > { %v2648_v39 = vpop.permute.xlu2 %2647 }
 0x513   : > { %v2627_v61 = vpop.permute.xlu1 %2626  ;;  %v4983_v56 = vpop.permute.xlu2 %2764 }
 0x514   : > { %v2623_v49 = vpop.permute.xlu0 %2622 }
 0x515   : > { %v2630_v5 = vsel %vm538_vm9, %v2623_v49, %v2627_v61  ;;  %v2632_v17 = vsel %vm538_vm9, %v2627_v61, %v2623_v49 }
 0x516   : > { %v2634_v20 = vmul.f32 %v2632_v17, %v4300_v52  ;;  %v2635_v6 = vmul.f32 %v2630_v5, %v4302_v53 }
 0x51b   : > { %v2644_v48 = vpop.permute.xlu1 %2643  ;;  %v2771_v62 = vpop.permute.xlu2 %2770 }
 0x51c   : > { %v2629_v7 = vpop.permute.xlu0 %2628  ;;  %v2650_v1 = vsel %vm563_vm6, %v2644_v48, %v2648_v39  ;;  %v2652_v22 = vsel %vm563_vm6, %v2648_v39, %v2644_v48 }
 0x51d   : > { %v2631_v15 = vsel %vm538_vm9, %v2625_v42, %v2629_v7  ;;  %v2633_v4 = vsel %vm538_vm9, %v2629_v7, %v2625_v42  ;;  %v2655_v0 = vmul.f32 %v2652_v22, %v4241_v18  ;;  %v2656_v45 = vmul.f32 %v2650_v1, %v4243_v19  ;;  %v2781_v7 = vld [vmem:[#allocation5 + $0xb0] sm:$0xff]  ;;  %v2856_v1 = vld [vmem:[#allocation5 + $0xc0] sm:$0xff] }
 0x51e   : > { %v2636_v50 = vmul.f32 %v2633_v4, %v4300_v52  ;;  %v2637_v59 = vmul.f32 %v2631_v15, %v4302_v53  ;;  %v2782_v4 = vld [vmem:[#allocation5 + $0xb8] sm:$0xff] }
 0x51f   : > { %2680 = vmatpush.msra.mxu0 %v2655_v0  ;;  %2703 = vmatpush.msra.mxu1 %v2656_v45 }
 0x520   : > { %2732 = vmatpush.msra.mxu2 %v2636_v50  ;;  %2755 = vmatpush.msra.mxu3 %v2637_v59 }
 0x522   : > { %2733 = vmatpush.msra.mxu2 %v2634_v20  ;;  %2756 = vmatpush.msra.mxu3 %v2635_v6 }
 0x523   : > { %3719 = vmatmul.msk.f32.vlgmr.msra.gmra.mxu3 %vm582_vm7, %v2639_v60  ;;  %v2767_v10 = vpop.permute.xlu1 %2766  ;;  %3717 = vmatmul.msk.f32.vlgmr.msra.gmra.mxu2 %vm582_vm7, %v2639_v60  ;;  %v2844_v16 = vpop.permute.xlu2 %2843 }
 0x524   : > { %v2646_v12 = vpop.permute.xlu0 %2645  ;;  %v2773_v14 = vsel %vm695_vm8, %v2767_v10, %v2771_v62  ;;  %v2775_v11 = vsel %vm695_vm8, %v2771_v62, %v2767_v10 }
 0x525   : > { %v2649_v52 = vsel %vm563_vm6, %v2642_v37, %v2646_v12  ;;  %v2651_v53 = vsel %vm563_vm6, %v2646_v12, %v2642_v37  ;;  %v2778_v24 = vmul.f32 %v2775_v11, %v4267_v35  ;;  %v2779_v33 = vmul.f32 %v2773_v14, %v4269_v36  ;;  %v2915_v12 = vld [vmem:[#allocation5 + $0xd0] sm:$0xff]  ;;  %v2990_v14 = vld [vmem:[#allocation5 + $0xe0] sm:$0xff] }
 0x526   : > { %v2653_v8 = vmul.f32 %v2651_v53, %v4241_v18  ;;  %v2654_v21 = vmul.f32 %v2649_v52, %v4243_v19 }
 0x528   : > { %2681 = vmatpush.msra.mxu0 %v2653_v8  ;;  %2704 = vmatpush.msra.mxu1 %v2654_v21  ;;  %v2916_v8 = vld [vmem:[#allocation5 + $0xd8] sm:$0xff]  ;;  %v2991_v21 = vld [vmem:[#allocation5 + $0xe8] sm:$0xff] }
 0x529   : > { %3713 = vmatmul.msk.f32.vlgmr.msra.gmra.mxu0 %vm582_vm7, %v2658_v31  ;;  %3715 = vmatmul.msk.f32.vlgmr.msra.gmra.mxu1 %vm582_vm7, %v2658_v31 }
 0x52a   : > { %2803 = vmatpush.msrb.mxu0 %v2778_v24  ;;  %2826 = vmatpush.msrb.mxu1 %v2779_v33 }
 0x52b   : > { %3720 = vmatmul.msk.f32.gmra.mxu3 %vm582_vm7, %v2640_v32  ;;  %v2846_v34 = vpop.permute.xlu1 %2845  ;;  %3718 = vmatmul.msk.f32.gmra.mxu2 %vm582_vm7, %v2640_v32  ;;  %v2974_v30 = vpop.permute.xlu2 %2973 }
 0x52c   : > { %v2842_v18 = vpop.permute.xlu0 %2841 }
 0x52d   : > { %v2848_v19 = vsel %vm778_vm10, %v2842_v18, %v2846_v34  ;;  %v2850_v44 = vsel %vm778_vm10, %v2846_v34, %v2842_v18 }
 0x52e   : > { %v2853_v51 = vmul.f32 %v2850_v44, %v4315_v57  ;;  %v2854_v38 = vmul.f32 %v2848_v19, %v4317_v58 }
 0x530   : > { %2878 = vmatpush.msrb.mxu2 %v2853_v51  ;;  %2901 = vmatpush.msrb.mxu3 %v2854_v38 }
 0x531   : > { %3714 = vmatmul.msk.f32.gmra.mxu0 %vm582_vm7, %v2659_v23  ;;  %3716 = vmatmul.msk.f32.gmra.mxu1 %vm582_vm7, %v2659_v23 }
 0x533   : > { %v2840_v46 = vpop.permute.xlu1 %2839  ;;  %v5043_v22 = vpop.permute.xlu2 %3048 }
 0x534   : > { %v2769_v37 = vpop.permute.xlu0 %2768  ;;  %v2847_v42 = vsel %vm778_vm10, %v2840_v46, %v2844_v16  ;;  %v2849_v39 = vsel %vm778_vm10, %v2844_v16, %v2840_v46  ;;  %v3140_v46 = vld [vmem:[#allocation5 + $0x100] sm:$0xff] }
 0x535   : > { %v2772_v61 = vsel %vm695_vm8, %v4983_v56, %v2769_v37  ;;  %v2774_v49 = vsel %vm695_vm8, %v2769_v37, %v4983_v56  ;;  %v2851_v48 = vmul.f32 %v2849_v39, %v4315_v57  ;;  %v2852_v62 = vmul.f32 %v2847_v42, %v4317_v58  ;;  %v3356_v37 = vld.sshfl [vmem:[#allocation1 + $0x8] sm:$0xff pattern:$0x75316420]  ;;  %v3355_v42 = vld.sshfl [vmem:[#allocation1] sm:$0xff pattern:$0x75316420] }
 0x536   : > { %v2776_v5 = vmul.f32 %v2774_v49, %v4267_v35  ;;  %v2777_v17 = vmul.f32 %v2772_v61, %v4269_v36  ;;  %v3066_v49 = vld [vmem:[#allocation5 + $0xf8] sm:$0xff] }
 0x537   : > { %2879 = vmatpush.msrb.mxu2 %v2851_v48  ;;  %2902 = vmatpush.msrb.mxu3 %v2852_v62  ;;  %v3141_v48 = vld [vmem:[#allocation5 + $0x108] sm:$0xff] }
 0x538   : > { %2804 = vmatpush.msrb.mxu0 %v2776_v5  ;;  %2827 = vmatpush.msrb.mxu1 %v2777_v17 }
 0x539   : > { %3721 = vmatmul.msk.f32.vlgmr.msrb.gmra.mxu0 %vm582_vm7, %v2781_v7  ;;  %3723 = vmatmul.msk.f32.vlgmr.msrb.gmra.mxu1 %vm582_vm7, %v2781_v7 }
 0x53a   : > { %3725 = vmatmul.msk.f32.vlgmr.msrb.gmra.mxu2 %vm582_vm7, %v2856_v1  ;;  %3727 = vmatmul.msk.f32.vlgmr.msrb.gmra.mxu3 %vm582_vm7, %v2856_v1 }
 0x53b   : > { %2937 = vmatpush.msra.mxu0 %v4915_v27  ;;  %2960 = vmatpush.msra.mxu1 %v4917_v43  ;;  %v2980_v35 = vpop.permute.xlu1 %2979  ;;  %v2857_v27 = vld [vmem:[#allocation5 + $0xc8] sm:$0xff] }
 0x53c   : > { %v2976_v36 = vpop.permute.xlu0 %2975 }
 0x53d   : > { %2938 = vmatpush.msra.mxu0 %v4905_v47  ;;  %2961 = vmatpush.msra.mxu1 %v4907_v2  ;;  %v2982_v57 = vsel %vm920_vm13, %v2976_v36, %v2980_v35  ;;  %v2984_v58 = vsel %vm920_vm13, %v2980_v35, %v2976_v36  ;;  %v3055_v47 = vpop.permute.xlu2 %3054  ;;  %v3215_v35 = vld [vmem:[#allocation5 + $0x110] sm:$0xff]  ;;  %v3351_v36 = vld [vmem:[%s5190_s9] sm:$0xff] }
 0x53e   : > { %v2987_v56 = vmul.f32 %v2982_v57, %v4399_v54  ;;  %v2988_v15 = vmul.f32 %v2984_v58, %v4401_v55 }
 0x540   : > { %3012 = vmatpush.msra.mxu2 %v2987_v56  ;;  %3035 = vmatpush.msra.mxu3 %v2988_v15 }
 0x541   : > { %3722 = vmatmul.msk.f32.gmra.mxu0 %vm582_vm7, %v2782_v4  ;;  %3724 = vmatmul.msk.f32.gmra.mxu1 %vm582_vm7, %v2782_v4 }
 0x542   : > { %3726 = vmatmul.msk.f32.gmra.mxu2 %vm582_vm7, %v2857_v27  ;;  %3728 = vmatmul.msk.f32.gmra.mxu3 %vm582_vm7, %v2857_v27 }
 0x543   : > { %v3051_v2 = vpop.permute.xlu1 %3050 }
 0x544   : > { %v2978_v43 = vpop.permute.xlu0 %2977  ;;  %v3057_v0 = vsel %vm1003_vm11, %v3051_v2, %v3055_v47  ;;  %v3059_v45 = vsel %vm1003_vm11, %v3055_v47, %v3051_v2 }
 0x545   : > { %v2981_v50 = vsel %vm920_vm13, %v2974_v30, %v2978_v43  ;;  %v2983_v59 = vsel %vm920_vm13, %v2978_v43, %v2974_v30  ;;  %v3062_v20 = vmul.f32 %v3057_v0, %v4360_v28  ;;  %v3063_v6 = vmul.f32 %v3059_v45, %v4362_v29  ;;  %v3128_v24 = vpop.permute.xlu2 %3127  ;;  %v3065_v30 = vld [vmem:[#allocation5 + $0xf0] sm:$0xff] }
 0x546   : > { %v2985_v60 = vmul.f32 %v2981_v50, %v4399_v54  ;;  %v2986_v10 = vmul.f32 %v2983_v59, %v4401_v55 }
 0x547   : > { %3087 = vmatpush.msrb.mxu0 %v3062_v20  ;;  %3110 = vmatpush.msrb.mxu1 %v3063_v6 }
 0x548   : > { %3013 = vmatpush.msra.mxu2 %v2985_v60  ;;  %3036 = vmatpush.msra.mxu3 %v2986_v10 }
 0x549   : > { %3729 = vmatmul.msk.f32.vlgmr.msra.gmra.mxu0 %vm582_vm7, %v2915_v12  ;;  %3731 = vmatmul.msk.f32.vlgmr.msra.gmra.mxu1 %vm582_vm7, %v2915_v12 }
 0x54a   : > { %3733 = vmatmul.msk.f32.vlgmr.msra.gmra.mxu2 %vm582_vm7, %v2990_v14  ;;  %3735 = vmatmul.msk.f32.vlgmr.msra.gmra.mxu3 %vm582_vm7, %v2990_v14 }
 0x54b   : > { %v3130_v11 = vpop.permute.xlu1 %3129 }
 0x54c   : > { %v3126_v52 = vpop.permute.xlu0 %3125 }
 0x54d   : > { %v3132_v54 = vsel %vm1086_vm14, %v3126_v52, %v3130_v11  ;;  %v3134_v55 = vsel %vm1086_vm14, %v3130_v11, %v3126_v52  ;;  %v3199_v62 = vpop.permute.xlu2 %3198 }
 0x54e   : > { %v3137_v53 = vmul.f32 %v3132_v54, %v4445_v25  ;;  %v3138_v16 = vmul.f32 %v3134_v55, %v4447_v26 }
 0x550   : > { %3162 = vmatpush.msrb.mxu2 %v3137_v53  ;;  %3185 = vmatpush.msrb.mxu3 %v3138_v16 }
 0x551   : > { %3730 = vmatmul.msk.f32.gmra.mxu0 %vm582_vm7, %v2916_v8  ;;  %3732 = vmatmul.msk.f32.gmra.mxu1 %vm582_vm7, %v2916_v8 }
 0x552   : > { %3734 = vmatmul.msk.f32.gmra.mxu2 %vm582_vm7, %v2991_v21  ;;  %3736 = vmatmul.msk.f32.gmra.mxu3 %vm582_vm7, %v2991_v21 }
 0x553   : > { %v3124_v33 = vpop.permute.xlu1 %3123 }
 0x554   : > { %v3053_v31 = vpop.permute.xlu0 %3052  ;;  %v3131_v32 = vsel %vm1086_vm14, %v3124_v33, %v3128_v24  ;;  %v3133_v34 = vsel %vm1086_vm14, %v3128_v24, %v3124_v33 }
 0x555   : > { %v3056_v18 = vsel %vm1003_vm11, %v5043_v22, %v3053_v31  ;;  %v3058_v19 = vsel %vm1003_vm11, %v3053_v31, %v5043_v22  ;;  %v3135_v44 = vmul.f32 %v3131_v32, %v4445_v25  ;;  %v3136_v51 = vmul.f32 %v3133_v34, %v4447_v26 }
 0x556   : > { %v3060_v38 = vmul.f32 %v3056_v18, %v4360_v28  ;;  %v3061_v23 = vmul.f32 %v3058_v19, %v4362_v29 }
 0x557   : > { %3163 = vmatpush.msrb.mxu2 %v3135_v44  ;;  %3186 = vmatpush.msrb.mxu3 %v3136_v51 }
 0x558   : > { %3088 = vmatpush.msrb.mxu0 %v3060_v38  ;;  %3111 = vmatpush.msrb.mxu1 %v3061_v23 }
 0x559   : > { %3737 = vmatmul.msk.f32.vlgmr.msrb.gmra.mxu0 %vm582_vm7, %v3065_v30  ;;  %3739 = vmatmul.msk.f32.vlgmr.msrb.gmra.mxu1 %vm582_vm7, %v3065_v30 }
 0x55a   : > { %3741 = vmatmul.msk.f32.vlgmr.msrb.gmra.mxu2 %vm582_vm7, %v3140_v46  ;;  %3743 = vmatmul.msk.f32.vlgmr.msrb.gmra.mxu3 %vm582_vm7, %v3140_v46 }
 0x55b   : > { %v3205_v25 = vpop.permute.xlu1 %3204  ;;  %3754 = vmatpush.msk.msra.mxu3 %vm465_vm0, %v3356_v37  ;;  %3751 = vmatpush.msk.msra.mxu2 %vm465_vm0, %v3355_v42 }
 0x55c   : > { %v3201_v28 = vpop.permute.xlu0 %3200 }
 0x55d   : > { %v3207_v29 = vsel %vm1169_vm12, %v3201_v28, %v3205_v25  ;;  %v3209_v26 = vsel %vm1169_vm12, %v3205_v25, %v3201_v28 }
 0x55e   : > { %v3212_v39 = vmul.f32 %v3207_v29, %v4378_v40  ;;  %v3213_v61 = vmul.f32 %v3209_v26, %v4380_v41 }
 0x560   : > { %3237 = vmatpush.msra.mxu0 %v3212_v39  ;;  %3260 = vmatpush.msra.mxu1 %v3213_v61 }
 0x561   : > { %3738 = vmatmul.msk.f32.gmra.mxu0 %vm582_vm7, %v3066_v49  ;;  %3740 = vmatmul.msk.f32.gmra.mxu1 %vm582_vm7, %v3066_v49 }
 0x562   : > { %3742 = vmatmul.msk.f32.gmra.mxu2 %vm582_vm7, %v3141_v48  ;;  %3744 = vmatmul.msk.f32.gmra.mxu3 %vm582_vm7, %v3141_v48 }
 0x564   : > { %v3203_v5 = vpop.permute.xlu0 %3202 }
 0x565   : > { %v3206_v17 = vsel %vm1169_vm12, %v3199_v62, %v3203_v5  ;;  %v3208_v7 = vsel %vm1169_vm12, %v3203_v5, %v3199_v62 }
 0x566   : > { %v3210_v1 = vmul.f32 %v3206_v17, %v4378_v40  ;;  %v3211_v22 = vmul.f32 %v3208_v7, %v4380_v41  ;;  %v3352_v40 = vld [vmem:[%s5190_s9 + $0x8] sm:$0xff] }
 0x568   : > { %3238 = vmatpush.msra.mxu0 %v3210_v1  ;;  %3261 = vmatpush.msra.mxu1 %v3211_v22 }
 0x569   : > { %3745 = vmatmul.msk.f32.vlgmr.msra.gmra.mxu0 %vm582_vm7, %v3215_v35  ;;  %3747 = vmatmul.msk.f32.vlgmr.msra.gmra.mxu1 %vm582_vm7, %v3215_v35 }
 0x56a   : > { %3752 = vmatmul.msk.f32.vlgmr.msra.gmra.mxu2 %vm458_vm1, %v3351_v36  ;;  %3755 = vmatmul.msk.f32.vlgmr.msra.gmra.mxu3 %vm458_vm1, %v3351_v36 }
 0x571   : > { %3746 = vmatmul.msk.f32.gmra.mxu0 %vm582_vm7, %v3216_v13  ;;  %3748 = vmatmul.msk.f32.gmra.mxu1 %vm582_vm7, %v3216_v13 }
 0x572   : > { %3753 = vmatmul.msk.f32.gmra.mxu2 %vm458_vm1, %v3352_v40  ;;  %3756 = vmatmul.msk.f32.gmra.mxu3 %vm458_vm1, %v3352_v40 }
 0x5a6   : > { %v2683_v41 = vpop.f32.mrf.mxu0  ;;  %v2706_v57 = vpop.f32.mrf.mxu1 }
 0x5a7   : > { %v2758_v58 = vpop.f32.mrf.mxu3  ;;  %v2735_v56 = vpop.f32.mrf.mxu2 }
 0x5a8   : > { %v2759_v24 = vadd.f32 %v2758_v58, %v2706_v57  ;;  %v2736_v33 = vadd.f32 %v2735_v56, %v2683_v41 }
 0x5ae   : > { %v2686_v15 = vpop.f32.mrf.mxu0  ;;  %v2709_v4 = vpop.f32.mrf.mxu1 }
 0x5af   : > { %v2761_v27 = vpop.f32.mrf.mxu3  ;;  %v2738_v47 = vpop.f32.mrf.mxu2 }
 0x5b0   : > { %v2762_v19 = vadd.f32 %v2761_v27, %v2709_v4  ;;  %v2739_v44 = vadd.f32 %v2738_v47, %v2686_v15  ;;  %v3279_v47 = vpop.permute.xlu2 %3278 }
 0x5b6   : > { %v2806_v2 = vpop.f32.mrf.mxu0  ;;  %v2829_v43 = vpop.f32.mrf.mxu1 }
 0x5b7   : > { %v2835_v34 = vadd.f32 %v2806_v2, %v2736_v33  ;;  %v2836_v18 = vadd.f32 %v2829_v43, %v2759_v24 }
 0x5bd   : > { %v2881_v0 = vpop.f32.mrf.mxu2  ;;  %v2904_v45 = vpop.f32.mrf.mxu3 }
 0x5be   : > { %v2809_v50 = vpop.f32.mrf.mxu0  ;;  %v2832_v59 = vpop.f32.mrf.mxu1  ;;  %v2910_v51 = vadd.f32 %v2881_v0, %v2835_v34  ;;  %v2911_v38 = vadd.f32 %v2904_v45, %v2836_v18 }
 0x5bf   : > { %v2837_v23 = vadd.f32 %v2809_v50, %v2739_v44  ;;  %v2838_v30 = vadd.f32 %v2832_v59, %v2762_v19  ;;  %v3284_v0 = vpop.permute.xlu1 %3283 }
 0x5c5   : > { %v2884_v20 = vpop.f32.mrf.mxu2  ;;  %v2907_v6 = vpop.f32.mrf.mxu3 }
 0x5c6   : > { %v2940_v60 = vpop.f32.mrf.mxu0  ;;  %v2963_v10 = vpop.f32.mrf.mxu1  ;;  %v2912_v42 = vadd.f32 %v2884_v20, %v2837_v23  ;;  %v2913_v25 = vadd.f32 %v2907_v6, %v2838_v30 }
 0x5c7   : > { %v2969_v46 = vadd.f32 %v2940_v60, %v2910_v51  ;;  %v2970_v37 = vadd.f32 %v2963_v10, %v2911_v38 }
 0x5cd   : > { %v3015_v12 = vpop.f32.mrf.mxu2  ;;  %v3038_v14 = vpop.f32.mrf.mxu3 }
 0x5ce   : > { %v2943_v11 = vpop.f32.mrf.mxu0  ;;  %v2966_v52 = vpop.f32.mrf.mxu1  ;;  %v3044_v26 = vadd.f32 %v3015_v12, %v2969_v46  ;;  %v3045_v39 = vadd.f32 %v3038_v14, %v2970_v37  ;;  %v5201_v12 = vld [vmem:[#allocation13_spill] sm:$0xff] }
 0x5cf   : > { %v2971_v48 = vadd.f32 %v2943_v11, %v2912_v42  ;;  %v2972_v62 = vadd.f32 %v2966_v52, %v2913_v25 }
 0x5d5   : > { %v3018_v54 = vpop.f32.mrf.mxu2  ;;  %v3041_v55 = vpop.f32.mrf.mxu3 }
 0x5d6   : > { %v3090_v53 = vpop.f32.mrf.mxu0  ;;  %v3113_v16 = vpop.f32.mrf.mxu1  ;;  %v3046_v7 = vadd.f32 %v3018_v54, %v2971_v48  ;;  %v3047_v1 = vadd.f32 %v3041_v55, %v2972_v62 }
 0x5d7   : > { %v3119_v5 = vadd.f32 %v3090_v53, %v3044_v26  ;;  %v3120_v17 = vadd.f32 %v3113_v16, %v3045_v39 }
 0x5dd   : > { %v3165_v8 = vpop.f32.mrf.mxu2  ;;  %v3188_v21 = vpop.f32.mrf.mxu3 }
 0x5de   : > { %v3093_v31 = vpop.f32.mrf.mxu0  ;;  %v3116_v32 = vpop.f32.mrf.mxu1  ;;  %v3194_v22 = vadd.f32 %v3165_v8, %v3119_v5  ;;  %v3195_v35 = vadd.f32 %v3188_v21, %v3120_v17 }
 0x5df   : > { %v3121_v36 = vadd.f32 %v3093_v31, %v3046_v7  ;;  %v3122_v13 = vadd.f32 %v3116_v32, %v3047_v1 }
 0x5e5   : > { %v3168_v28 = vpop.f32.mrf.mxu2  ;;  %v3191_v29 = vpop.f32.mrf.mxu3 }
 0x5e6   : > { %v3240_v61 = vpop.f32.mrf.mxu0  ;;  %v3263_v49 = vpop.f32.mrf.mxu1  ;;  %v3196_v57 = vadd.f32 %v3168_v28, %v3121_v36  ;;  %v3197_v58 = vadd.f32 %v3191_v29, %v3122_v13 }
 0x5e7   : > { %v3269_v40 = vadd.f32 %v3240_v61, %v3194_v22  ;;  %v3270_v41 = vadd.f32 %v3263_v49, %v3195_v35 }
 0x5e9   : > { %v3286_v45 = vadd.f32 %v3279_v47, %v3269_v40  ;;  %v3287_v50 = vadd.f32 %v3279_v47, %v3270_v41 }
 0x5eb   : > { %v3290_v10 = vadd.f32 %v3286_v45, %v4684_v3  ;;  %v3291_v14 = vadd.f32 %v3287_v50, %v5201_v12 }
 0x5ed   : > { %v3384_v56 = vpop.f32.mrf.mxu2  ;;  %v3407_v15 = vpop.f32.mrf.mxu3 }
 0x5ee   : > { %v3243_v4 = vpop.f32.mrf.mxu0  ;;  %v3266_v27 = vpop.f32.mrf.mxu1  ;;  %v3414_v53 = vmul.f32 %v3384_v56, %v3290_v10  ;;  %v3415_v16 = vmul.f32 %v3407_v15, %v3291_v14 }
 0x5ef   : > { %v3271_v2 = vadd.f32 %v3243_v4, %v3196_v57  ;;  %v3272_v43 = vadd.f32 %v3266_v27, %v3197_v58 }
 0x5f1   : > { %v3288_v59 = vadd.f32 %v3284_v0, %v3271_v2  ;;  %v3289_v20 = vadd.f32 %v3284_v0, %v3272_v43 }
 0x5f3   : > { %v3292_v6 = vadd.f32 %v3288_v59, %v4696_v9  ;;  %v3293_v60 = vadd.f32 %v3289_v20, %v4699_v63  ;;  %v3413_v9 = vld [vmem:[%s5191_s10] sm:$0xf] }
 0x5f5   : > { %v3387_v11 = vpop.f32.mrf.mxu2  ;;  %v3410_v52 = vpop.f32.mrf.mxu3 }
 0x5f6   : > { %v3416_v54 = vmul.f32 %v3387_v11, %v3292_v6  ;;  %v3417_v55 = vmul.f32 %v3410_v52, %v3293_v60 }
 0x5f8   : > { %3435 = vmatpush.msrb.mxu0 %v3416_v54  ;;  %3455 = vmatpush.msrb.mxu1 %v3417_v55 }
 0x5fa   : > { %3436 = vmatpush.msrb.mxu0 %v3414_v53  ;;  %3456 = vmatpush.msrb.mxu1 %v3415_v16 }
 0x5fb   : > { %3758 = vmatmul.msk.f32.vlgmr.msrb.gmra.mxu1 %vm582_vm7, %v3413_v9  ;;  %3757 = vmatmul.msk.f32.vlgmr.msrb.gmra.mxu0 %vm582_vm7, %v3413_v9 }
 0x678   : > { %v3458_v3 = vpop.f32.mrf.mxu1  ;;  %v3438_v63 = vpop.f32.mrf.mxu0 }
 0x679   : > { %v3463_v8 = vrot.slane %v3458_v3, 4 }
 0x67b   : > { %v3464_v21 = vsel %vm465_vm0, %v3438_v63, %v3463_v8 }
 0x67c   : > { %3466 = vst [vmem:[%s428_s22] sm:$0xff] %v3464_v21 }
 0x67d   : > { %3934 = shalt.err (!%p3931_p8)
}
 0x67e   : > { %3775 = dma.vmem_to_hbm [thread:$0]  (%p4090_p5), %s3482_s24, 128, %s3484_s25, %s3468_s30  }
 0x67f PF: > { %p3792_p9 = scmp.ge.s32.totalorder %s3977_s20, 2  ;;  %s3495_s26 = sand.u32 1, %s3965_s17  }
 0x680   : > { %s3496_s16 = scalar_lea.sflag [#allocation4], %s3495_s26 }
 0x681   : > { %p3785_p10 = pnand %p3792_p9, %p4094_p6 }
 0x683   : > { %p3786_p11 = pneg %p3785_p10 }
 0x685   : > { %3960 = dma.done.wait (%p3786_p11), %s3496_s16, 128  }
 0x686   : > { %3962 = vsyncadd (%p3786_p11), %s3496_s16, 4294967168  ;;  %s5202_s22 = sld [smem:[#allocation11_spill]]  ;;  %p23_p12 = scmp.ge.s32.totalorder %s4077_s23, 4  }
 0x687   : > { %s5203_s19 = sld [smem:[#allocation12_spill]]  ;;  %s5204_s17 = smov %s3969_s18 }
 0x688   : > { %s5206_s20 = smov %s4077_s23  ;;  %25 = sbr.rel (!%p23_p12) target bundleno = 5 (0x5), region = 154 }
 0x68c   : > { %s5205_s18 = smov %s5202_s22 }
 0x68d   :  { %3502 = vsyncpa [#allocation3], 1 }
 0x68e   :  { %3504 = vsyncpa [#allocation3 + $0x1], 1 }
 0x68f   :  { %3505 = vsyncpa [#allocation6], 1 }
 0x690   :  { %3506 = vsyncpa [#allocation4], 1 }
 0x691   :  { %3508 = vsyncpa [#allocation4 + $0x1], 1 }

</bundles_post_ra>
